<compile_context>
chip_gen: v7x
topology: tpu7x:2x2x1
jax: 0.10.0
libtpu: 0.0.40
codegen_flags: <defaults>
</compile_context>

<pallas_src>
import jax
import jax.numpy as jnp
from jax.experimental import pallas as pl
from jax.experimental.pallas import tpu as pltpu

# fixed sizes implied by the module definition
IMG_FEAT = 2048               # image_fc: Linear(2048, 512)
TXT_FEAT = 768                # BERT-base CLS width
NUM_DIM = 4                   # numerical_dim (zip, beds, baths, sqft)
HID = 512                     # fc1 / image_fc output
CAT = HID + TXT_FEAT + HID    # 1792, fc2 input


def price_predictor_kernel(img_ref, txt_ref, num_ref,
                           w_img_ref, b_img_ref,
                           w_fc1_ref, b_fc1_ref,
                           w2_img_ref, w2_txt_ref, w2_num_ref, b2_ref,
                           out_ref):
    # ---- image branch -------------------------------------------------------
    # img_ref is (TB, HW, 2048): lane axis = channels, sublane axis = spatial.
    # Sum over spatial; the 1/(H*W) mean scale is folded into w_img.
    img_pooled = jnp.sum(img_ref[...], axis=1)                    # (TB, 2048) f32
    img_h = jnp.dot(img_pooled.astype(jnp.bfloat16), w_img_ref[...],
                    preferred_element_type=jnp.float32)           # MXU, f32 acc
    img_h = img_h + b_img_ref[...]                                # (TB, 512)
    # TODO(synk): dropout(p=0.5) is identity here (inference semantics).

    # ---- numerical branch: fc1 as 4 broadcast FMAs on the VPU ---------------
    num = num_ref[...]                                            # (TB, 4)
    w_fc1 = w_fc1_ref[...]                                        # (4, 512)
    num_h = num[:, 0:1] * w_fc1[0:1, :]
    for k in range(1, NUM_DIM):
        num_h = num_h + num[:, k:k + 1] * w_fc1[k:k + 1, :]
    num_h = num_h + b_fc1_ref[...]                                # (TB, 512)

    # ---- text branch: CLS features pass through -----------------------------
    txt = txt_ref[...]                                            # (TB, 768)

    # ---- fc2 on concat([img_h, txt, num_h]) as VPU multiply + lane reduce ---
    out = (jnp.sum(img_h * w2_img_ref[...], axis=-1, keepdims=True)
           + jnp.sum(txt * w2_txt_ref[...], axis=-1, keepdims=True)
           + jnp.sum(num_h * w2_num_ref[...], axis=-1, keepdims=True)
           + b2_ref[...])                                         # (TB, 1)
    out_ref[...] = out.astype(out_ref.dtype)


def price_predictor_forward(image_nchw, text_cls, numerical, params):
    """image_nchw: (B, 2048, H, W) image-backbone feature map (NCHW)
       text_cls:   (B, 768) BERT CLS features
       numerical:  (B, 1, 4) or (B, 4)
       returns:    (B, 1) price prediction"""
    B, C, H, W = image_nchw.shape
    assert C == IMG_FEAT
    HW = H * W

    # Lane-dense layout: (B, HW, 2048) so channels land on the 128-lane axis.
    img = jnp.transpose(image_nchw.reshape(B, C, HW), (0, 2, 1)).astype(jnp.float32)
    txt = text_cls.astype(jnp.float32)
    num2d = numerical.reshape(B, NUM_DIM).astype(jnp.float32)

    # PyTorch Linear stores weight as (out, in); transpose to (in, out).
    # Fold the mean-pool 1/(H*W) into w_img; cast the big weight to bf16.
    w_img = (params["image_fc_w"].T.astype(jnp.float32) / float(HW)).astype(jnp.bfloat16)
    b_img = params["image_fc_b"].reshape(1, HID).astype(jnp.float32)
    w_fc1 = params["fc1_w"].T.astype(jnp.float32)                 # (4, 512)
    b_fc1 = params["fc1_b"].reshape(1, HID).astype(jnp.float32)
    w2 = params["fc2_w"].reshape(1, CAT).astype(jnp.float32)      # (1, 1792)
    w2_img = w2[:, :HID]                                          # (1, 512)
    w2_txt = w2[:, HID:HID + TXT_FEAT]                            # (1, 768)
    w2_num = w2[:, HID + TXT_FEAT:]                               # (1, 512)
    b2 = params["fc2_b"].reshape(1, 1).astype(jnp.float32)

    # ---- batch tiling: cap the image tile so VMEM use is independent of B ---
    max_img_tile_bytes = 8 * 1024 * 1024
    tb_cap = max(8, (max_img_tile_bytes // (HW * C * 4)) // 8 * 8)
    if B <= tb_cap:
        TB, B_pad = B, B
    else:
        TB = tb_cap
        B_pad = pl.cdiv(B, TB) * TB

    def pad_batch(x):
        if B_pad == B:
            return x
        return jnp.pad(x, ((0, B_pad - B),) + ((0, 0),) * (x.ndim - 1))

    img_p, txt_p, num_p = pad_batch(img), pad_batch(txt), pad_batch(num2d)

    grid = (B_pad // TB,)
    in_specs = [
        pl.BlockSpec((TB, HW, C), lambda i: (i, 0, 0)),           # image tile
        pl.BlockSpec((TB, TXT_FEAT), lambda i: (i, 0)),           # text tile
        pl.BlockSpec((TB, NUM_DIM), lambda i: (i, 0)),            # numerical tile
        # weights / biases: constant block index -> resident across batch tiles
        pl.BlockSpec((IMG_FEAT, HID), lambda i: (0, 0)),          # w_img (bf16)
        pl.BlockSpec((1, HID), lambda i: (0, 0)),                 # b_img
        pl.BlockSpec((NUM_DIM, HID), lambda i: (0, 0)),           # w_fc1
        pl.BlockSpec((1, HID), lambda i: (0, 0)),                 # b_fc1
        pl.BlockSpec((1, HID), lambda i: (0, 0)),                 # w2 (img slice)
        pl.BlockSpec((1, TXT_FEAT), lambda i: (0, 0)),            # w2 (txt slice)
        pl.BlockSpec((1, HID), lambda i: (0, 0)),                 # w2 (num slice)
        pl.BlockSpec((1, 1), lambda i: (0, 0)),                   # b2
    ]
    out_specs = pl.BlockSpec((TB, 1), lambda i: (i, 0))

    out = pl.pallas_call(
        price_predictor_kernel,
        out_shape=jax.ShapeDtypeStruct((B_pad, 1), jnp.float32),
        grid=grid,
        in_specs=in_specs,
        out_specs=out_specs,
        compiler_params=pltpu.CompilerParams(
            dimension_semantics=("parallel",)),   # batch-parallel (v7x megacore)
    )(img_p, txt_p, num_p,
      w_img, b_img, w_fc1, b_fc1,
      w2_img, w2_txt, w2_num, b2)
    return out[:B]


def make_params(key):
    ks = jax.random.split(key, 6)
    scale = 0.02
    return {
        "fc1_w": scale * jax.random.normal(ks[0], (HID, NUM_DIM), jnp.float32),
        "fc1_b": scale * jax.random.normal(ks[1], (HID,), jnp.float32),
        "image_fc_w": scale * jax.random.normal(ks[2], (HID, IMG_FEAT), jnp.float32),
        "image_fc_b": scale * jax.random.normal(ks[3], (HID,), jnp.float32),
        "fc2_w": scale * jax.random.normal(ks[4], (1, CAT), jnp.float32),
        "fc2_b": scale * jax.random.normal(ks[5], (1,), jnp.float32),
    }


if __name__ == "__main__":
    key = jax.random.PRNGKey(0)
    k_img, k_txt, k_num, k_par = jax.random.split(key, 4)

    B, H, W = 2, 4, 4
    image_feat_map = jax.random.normal(k_img, (B, IMG_FEAT, H, W), jnp.float32)
    text_cls = jax.random.normal(k_txt, (B, TXT_FEAT), jnp.float32)
    numerical = jax.random.normal(k_num, (B, 1, NUM_DIM), jnp.float32)
    params = make_params(k_par)

    out = price_predictor_forward(image_feat_map, text_cls, numerical, params)
    out = jax.block_until_ready(out)

    # pure-JAX f32 reference check (kernel uses bf16 for the image_fc weight,
    # so tolerances are loosened accordingly)
    img_feat = image_feat_map.reshape(B, IMG_FEAT, -1).mean(-1)
    img_h = img_feat @ params["image_fc_w"].T + params["image_fc_b"]
    num_h = numerical.reshape(B, NUM_DIM) @ params["fc1_w"].T + params["fc1_b"]
    xcat = jnp.concatenate([img_h, text_cls, num_h], axis=1)
    ref = xcat @ params["fc2_w"].T + params["fc2_b"]
    assert out.shape == (B, 1)
    assert jnp.allclose(out, ref, atol=1e-2, rtol=1e-2)

    print("KERNEL_OK")
</pallas_src>

<mosaic_0001>
module attributes {stable_mosaic.version = 11 : i64} {
  func.func @price_predictor_kernel(%arg0: i32, %arg1: memref<2x16x2048xf32, #tpu.memory_space<vmem>>, %arg2: memref<2x768xf32, #tpu.memory_space<vmem>>, %arg3: memref<2x4xf32, #tpu.memory_space<vmem>>, %arg4: memref<2048x512xbf16, #tpu.memory_space<vmem>>, %arg5: memref<1x512xf32, #tpu.memory_space<vmem>>, %arg6: memref<4x512xf32, #tpu.memory_space<vmem>>, %arg7: memref<1x512xf32, #tpu.memory_space<vmem>>, %arg8: memref<1x512xf32, #tpu.memory_space<vmem>>, %arg9: memref<1x768xf32, #tpu.memory_space<vmem>>, %arg10: memref<1x512xf32, #tpu.memory_space<vmem>>, %arg11: memref<1x1xf32, #tpu.memory_space<vmem>>, %arg12: memref<2x1xf32, #tpu.memory_space<vmem>>) attributes {dimension_semantics = [#tpu.dimension_semantics<parallel>], iteration_bounds = array<i64: 1>, scalar_prefetch = 0 : i64, scratch_operands = 0 : i64, tpu.core_type = #tpu.core_type<tc>, window_params = [{transform_indices = @transform_0, window_bounds = array<i64: 2, 16, 2048>}, {transform_indices = @transform_1, window_bounds = array<i64: 2, 768>}, {transform_indices = @transform_2, window_bounds = array<i64: 2, 4>}, {pipeline_mode = #tpu.pipeline_mode<synchronous>, transform_indices = @transform_3, window_bounds = array<i64: 2048, 512>}, {pipeline_mode = #tpu.pipeline_mode<synchronous>, transform_indices = @transform_4, window_bounds = array<i64: 1, 512>}, {pipeline_mode = #tpu.pipeline_mode<synchronous>, transform_indices = @transform_5, window_bounds = array<i64: 4, 512>}, {pipeline_mode = #tpu.pipeline_mode<synchronous>, transform_indices = @transform_6, window_bounds = array<i64: 1, 512>}, {pipeline_mode = #tpu.pipeline_mode<synchronous>, transform_indices = @transform_7, window_bounds = array<i64: 1, 512>}, {pipeline_mode = #tpu.pipeline_mode<synchronous>, transform_indices = @transform_8, window_bounds = array<i64: 1, 768>}, {pipeline_mode = #tpu.pipeline_mode<synchronous>, transform_indices = @transform_9, window_bounds = array<i64: 1, 512>}, {pipeline_mode = #tpu.pipeline_mode<synchronous>, transform_indices = @transform_10, window_bounds = array<i64: 1, 1>}, {transform_indices = @transform_11, window_bounds = array<i64: 2, 1>}]} {
    %c0 = arith.constant 0 : index
    %c0_0 = arith.constant 0 : index
    %c0_1 = arith.constant 0 : index
    %0 = vector.load %arg1[%c0, %c0_0, %c0_1] : memref<2x16x2048xf32, #tpu.memory_space<vmem>>, vector<2x16x2048xf32>
    %cst = arith.constant dense<0.000000e+00> : vector<2x2048xf32>
    %1 = vector.multi_reduction <add>, %0, %cst [1] : vector<2x16x2048xf32> to vector<2x2048xf32>
    %2 = arith.truncf %1 : vector<2x2048xf32> to vector<2x2048xbf16>
    %c0_2 = arith.constant 0 : index
    %c0_3 = arith.constant 0 : index
    %3 = vector.load %arg4[%c0_2, %c0_3] : memref<2048x512xbf16, #tpu.memory_space<vmem>>, vector<2048x512xbf16>
    %cst_4 = arith.constant dense<0.000000e+00> : vector<2x512xf32>
    %4 = tpu.matmul %2, %3, %cst_4 {dimension_numbers = #tpu.dot_dimension_numbers<[1], [0], [0], [1], [0, 0, 1, 1], [], []>} : vector<2x2048xbf16>, vector<2048x512xbf16>, vector<2x512xf32> -> vector<2x512xf32>
    %c0_5 = arith.constant 0 : index
    %c0_6 = arith.constant 0 : index
    %5 = vector.load %arg5[%c0_5, %c0_6] : memref<1x512xf32, #tpu.memory_space<vmem>>, vector<1x512xf32>
    %6 = vector.broadcast %5 : vector<1x512xf32> to vector<2x512xf32>
    %7 = arith.addf %4, %6 : vector<2x512xf32>
    %c0_7 = arith.constant 0 : index
    %c0_8 = arith.constant 0 : index
    %8 = vector.load %arg3[%c0_7, %c0_8] : memref<2x4xf32, #tpu.memory_space<vmem>>, vector<2x4xf32>
    %c0_9 = arith.constant 0 : index
    %c0_10 = arith.constant 0 : index
    %9 = vector.load %arg6[%c0_9, %c0_10] : memref<4x512xf32, #tpu.memory_space<vmem>>, vector<4x512xf32>
    %10 = vector.extract_strided_slice %8 {offsets = [0, 0], sizes = [2, 1], strides = [1, 1]} : vector<2x4xf32> to vector<2x1xf32>
    %11 = vector.extract_strided_slice %9 {offsets = [0, 0], sizes = [1, 512], strides = [1, 1]} : vector<4x512xf32> to vector<1x512xf32>
    %12 = vector.broadcast %10 : vector<2x1xf32> to vector<2x512xf32>
    %13 = vector.broadcast %11 : vector<1x512xf32> to vector<2x512xf32>
    %14 = arith.mulf %12, %13 : vector<2x512xf32>
    %15 = vector.extract_strided_slice %8 {offsets = [0, 1], sizes = [2, 1], strides = [1, 1]} : vector<2x4xf32> to vector<2x1xf32>
    %16 = vector.extract_strided_slice %9 {offsets = [1, 0], sizes = [1, 512], strides = [1, 1]} : vector<4x512xf32> to vector<1x512xf32>
    %17 = vector.broadcast %15 : vector<2x1xf32> to vector<2x512xf32>
    %18 = vector.broadcast %16 : vector<1x512xf32> to vector<2x512xf32>
    %19 = arith.mulf %17, %18 : vector<2x512xf32>
    %20 = arith.addf %14, %19 : vector<2x512xf32>
    %21 = vector.extract_strided_slice %8 {offsets = [0, 2], sizes = [2, 1], strides = [1, 1]} : vector<2x4xf32> to vector<2x1xf32>
    %22 = vector.extract_strided_slice %9 {offsets = [2, 0], sizes = [1, 512], strides = [1, 1]} : vector<4x512xf32> to vector<1x512xf32>
    %23 = vector.broadcast %21 : vector<2x1xf32> to vector<2x512xf32>
    %24 = vector.broadcast %22 : vector<1x512xf32> to vector<2x512xf32>
    %25 = arith.mulf %23, %24 : vector<2x512xf32>
    %26 = arith.addf %20, %25 : vector<2x512xf32>
    %27 = vector.extract_strided_slice %8 {offsets = [0, 3], sizes = [2, 1], strides = [1, 1]} : vector<2x4xf32> to vector<2x1xf32>
    %28 = vector.extract_strided_slice %9 {offsets = [3, 0], sizes = [1, 512], strides = [1, 1]} : vector<4x512xf32> to vector<1x512xf32>
    %29 = vector.broadcast %27 : vector<2x1xf32> to vector<2x512xf32>
    %30 = vector.broadcast %28 : vector<1x512xf32> to vector<2x512xf32>
    %31 = arith.mulf %29, %30 : vector<2x512xf32>
    %32 = arith.addf %26, %31 : vector<2x512xf32>
    %c0_11 = arith.constant 0 : index
    %c0_12 = arith.constant 0 : index
    %33 = vector.load %arg7[%c0_11, %c0_12] : memref<1x512xf32, #tpu.memory_space<vmem>>, vector<1x512xf32>
    %34 = vector.broadcast %33 : vector<1x512xf32> to vector<2x512xf32>
    %35 = arith.addf %32, %34 : vector<2x512xf32>
    %c0_13 = arith.constant 0 : index
    %c0_14 = arith.constant 0 : index
    %36 = vector.load %arg2[%c0_13, %c0_14] : memref<2x768xf32, #tpu.memory_space<vmem>>, vector<2x768xf32>
    %c0_15 = arith.constant 0 : index
    %c0_16 = arith.constant 0 : index
    %37 = vector.load %arg8[%c0_15, %c0_16] : memref<1x512xf32, #tpu.memory_space<vmem>>, vector<1x512xf32>
    %38 = vector.broadcast %37 : vector<1x512xf32> to vector<2x512xf32>
    %39 = arith.mulf %7, %38 : vector<2x512xf32>
    %cst_17 = arith.constant dense<0.000000e+00> : vector<2xf32>
    %40 = vector.multi_reduction <add>, %39, %cst_17 [1] : vector<2x512xf32> to vector<2xf32>
    %41 = vector.shape_cast %40 : vector<2xf32> to vector<2x1xf32>
    %c0_18 = arith.constant 0 : index
    %c0_19 = arith.constant 0 : index
    %42 = vector.load %arg9[%c0_18, %c0_19] : memref<1x768xf32, #tpu.memory_space<vmem>>, vector<1x768xf32>
    %43 = vector.broadcast %42 : vector<1x768xf32> to vector<2x768xf32>
    %44 = arith.mulf %36, %43 : vector<2x768xf32>
    %cst_20 = arith.constant dense<0.000000e+00> : vector<2xf32>
    %45 = vector.multi_reduction <add>, %44, %cst_20 [1] : vector<2x768xf32> to vector<2xf32>
    %46 = vector.shape_cast %45 : vector<2xf32> to vector<2x1xf32>
    %47 = arith.addf %41, %46 : vector<2x1xf32>
    %c0_21 = arith.constant 0 : index
    %c0_22 = arith.constant 0 : index
    %48 = vector.load %arg10[%c0_21, %c0_22] : memref<1x512xf32, #tpu.memory_space<vmem>>, vector<1x512xf32>
    %49 = vector.broadcast %48 : vector<1x512xf32> to vector<2x512xf32>
    %50 = arith.mulf %35, %49 : vector<2x512xf32>
    %cst_23 = arith.constant dense<0.000000e+00> : vector<2xf32>
    %51 = vector.multi_reduction <add>, %50, %cst_23 [1] : vector<2x512xf32> to vector<2xf32>
    %52 = vector.shape_cast %51 : vector<2xf32> to vector<2x1xf32>
    %53 = arith.addf %47, %52 : vector<2x1xf32>
    %c0_24 = arith.constant 0 : index
    %c0_25 = arith.constant 0 : index
    %54 = vector.load %arg11[%c0_24, %c0_25] : memref<1x1xf32, #tpu.memory_space<vmem>>, vector<1x1xf32>
    %55 = vector.broadcast %54 : vector<1x1xf32> to vector<2x1xf32>
    %56 = arith.addf %53, %55 : vector<2x1xf32>
    %c0_26 = arith.constant 0 : index
    %c0_27 = arith.constant 0 : index
    %57 = vector.load %arg12[%c0_26, %c0_27] : memref<2x1xf32, #tpu.memory_space<vmem>>, vector<2x1xf32>
    tpu.vector_store %arg12[%c0_26, %c0_27], %56 {strides = array<i32>} : memref<2x1xf32, #tpu.memory_space<vmem>>, vector<2x1xf32>,
    return
  }
  func.func @transform_0(%arg0: i32) -> (i32, i32, i32) {
    %c0_i32 = arith.constant 0 : i32
    %c0_i32_0 = arith.constant 0 : i32
    %c0_i32_1 = arith.constant 0 : i32
    return %arg0, %c0_i32, %c0_i32_0 : i32, i32, i32
  }
  func.func @transform_1(%arg0: i32) -> (i32, i32) {
    %c0_i32 = arith.constant 0 : i32
    %c0_i32_0 = arith.constant 0 : i32
    return %arg0, %c0_i32 : i32, i32
  }
  func.func @transform_2(%arg0: i32) -> (i32, i32) {
    %c0_i32 = arith.constant 0 : i32
    %c0_i32_0 = arith.constant 0 : i32
    return %arg0, %c0_i32 : i32, i32
  }
  func.func @transform_3(%arg0: i32) -> (i32, i32) {
    %c0_i32 = arith.constant 0 : i32
    %c0_i32_0 = arith.constant 0 : i32
    %c0_i32_1 = arith.constant 0 : i32
    return %c0_i32, %c0_i32_0 : i32, i32
  }
  func.func @transform_4(%arg0: i32) -> (i32, i32) {
    %c0_i32 = arith.constant 0 : i32
    %c0_i32_0 = arith.constant 0 : i32
    %c0_i32_1 = arith.constant 0 : i32
    return %c0_i32, %c0_i32_0 : i32, i32
  }
  func.func @transform_5(%arg0: i32) -> (i32, i32) {
    %c0_i32 = arith.constant 0 : i32
    %c0_i32_0 = arith.constant 0 : i32
    %c0_i32_1 = arith.constant 0 : i32
    return %c0_i32, %c0_i32_0 : i32, i32
  }
  func.func @transform_6(%arg0: i32) -> (i32, i32) {
    %c0_i32 = arith.constant 0 : i32
    %c0_i32_0 = arith.constant 0 : i32
    %c0_i32_1 = arith.constant 0 : i32
    return %c0_i32, %c0_i32_0 : i32, i32
  }
  func.func @transform_7(%arg0: i32) -> (i32, i32) {
    %c0_i32 = arith.constant 0 : i32
    %c0_i32_0 = arith.constant 0 : i32
    %c0_i32_1 = arith.constant 0 : i32
    return %c0_i32, %c0_i32_0 : i32, i32
  }
  func.func @transform_8(%arg0: i32) -> (i32, i32) {
    %c0_i32 = arith.constant 0 : i32
    %c0_i32_0 = arith.constant 0 : i32
    %c0_i32_1 = arith.constant 0 : i32
    return %c0_i32, %c0_i32_0 : i32, i32
  }
  func.func @transform_9(%arg0: i32) -> (i32, i32) {
    %c0_i32 = arith.constant 0 : i32
    %c0_i32_0 = arith.constant 0 : i32
    %c0_i32_1 = arith.constant 0 : i32
    return %c0_i32, %c0_i32_0 : i32, i32
  }
  func.func @transform_10(%arg0: i32) -> (i32, i32) {
    %c0_i32 = arith.constant 0 : i32
    %c0_i32_0 = arith.constant 0 : i32
    %c0_i32_1 = arith.constant 0 : i32
    return %c0_i32, %c0_i32_0 : i32, i32
  }
  func.func @transform_11(%arg0: i32) -> (i32, i32) {
    %c0_i32 = arith.constant 0 : i32
    %c0_i32_0 = arith.constant 0 : i32
    return %arg0, %c0_i32 : i32, i32
  }
}

</mosaic_0001>

<bundles_post_ra>
// kernel: tpu_custom_call.1
= control target key start
LH: loop header
LB: loop body
LE: loop exit
PB: predicated region body
PF: predicated region fallthrough
CT: control target
= control target key end

     0   :  { %s6670_s0 = inlined_call_operand.hbm [shape: f32[2,16,2048], index: 0, kind: input, shape index: {}]   ;;  %s6671_s1 = inlined_call_operand.hbm [shape: f32[2,768], index: 1, kind: input, shape index: {}]   ;;  %s6672_s2 = inlined_call_operand.hbm [shape: f32[2,4], index: 2, kind: input, shape index: {}]   ;;  %s6673_s3 = inlined_call_operand.hbm [shape: bf16[2048,512], index: 3, kind: input, shape index: {}]   ;;  %s6674_s4 = inlined_call_operand.hbm [shape: f32[1,512], index: 4, kind: input, shape index: {}]   ;;  %s6675_s5 = inlined_call_operand.hbm [shape: f32[4,512], index: 5, kind: input, shape index: {}]   ;;  %s6676_s6 = inlined_call_operand.hbm [shape: f32[1,512], index: 6, kind: input, shape index: {}]   ;;  %s6677_s7 = inlined_call_operand.hbm [shape: f32[1,512], index: 7, kind: input, shape index: {}]   ;;  %s6678_s8 = inlined_call_operand.hbm [shape: f32[1,768], index: 8, kind: input, shape index: {}]   ;;  %s6679_s9 = inlined_call_operand.hbm [shape: f32[1,512], index: 9, kind: input, shape index: {}]   ;;  %s6680_s10 = inlined_call_operand.<no memory space> [shape: f32[1,1], index: 10, kind: input, shape index: {}]   ;;  %s6681_s11 = inlined_call_operand.vmem [shape: f32[2,1], index: 11, kind: output, shape index: {}]  }
   0x1   :  { %v16_v0 = vstv %s6680_s10 }
   0x2   :  { %17 = vst [vmem:[#allocation2] sm:$0x1] %v16_v0 }
   0x3   :  { %18 = vsyncpa [#allocation4], 0 }
   0x4   :  { %19 = vsyncpa [#allocation6], 0 }
   0x5   :  { %20 = vsyncpa [#allocation9], 0 }
   0x6   :  { %21 = vsyncpa [#allocation12], 0 }
   0x7   :  { %22 = vsyncpa [#allocation15], 0 }
   0x8   :  { %23 = vsyncpa [#allocation18], 0  ;;  %s6356_s19 = smov [#allocation5]   ;;  %s6357_s21 = smov [#allocation8]  }
   0x9   :  { %s42_s20 = sshll.u32 %s6356_s19, 4  ;;  %s61_s22 = sshll.u32 %s6357_s21, 4  ;;  %s43_s20 = int_to_ptr.vmem [resolvable:$true] %s42_s20  ;;  %s6438_s22 = int_to_ptr.vmem [resolvable:$true] %s61_s22 }
   0xa   :  { %s6124_s25 = scalar_lea.hbm %s6671_s1, 192 }
   0xb   :  { %p6125_p0 = scmp.ne.s32.totalorder %s6671_s1, %s6124_s25  ;;  %p6128_p1 = scmp.lt.u32.totalorder %s6124_s25, %s6671_s1 }
   0xd   :  { %p6130_p2 = pnand %p6128_p1, %p6125_p0 }
   0xf   :  { %6133 = shalt.err (!%p6130_p2)
}
  0x10   :  { %s6134_s29 = scalar_lea.vmem %s43_s20, 192  ;;  %p6139_p4 = scmp.lt.s32.totalorder %s43_s20, %s43_s20 }
  0x11   :  { %p6135_p3 = scmp.ne.s32.totalorder %s43_s20, %s6134_s29  ;;  %p6140_p5 = scmp.lt.s32.totalorder %s6134_s29, %s6134_s29 }
  0x13   :  { %p6141_p6 = por %p6140_p5, %p6139_p4 }
  0x15   :  { %p6142_p7 = pnand %p6141_p6, %p6135_p3 }
  0x17   :  { %6145 = shalt.err (!%p6142_p7)
}
  0x18   :  { %45 = dma.hbm_to_vmem [thread:$0]  %s6671_s1, 192, %s43_s20, [#allocation6]  }
  0x19   :  { %s6146_s15 = scalar_lea.hbm %s6673_s3, 65536 }
  0x1a   :  { %p6147_p8 = scmp.ne.s32.totalorder %s6673_s3, %s6146_s15  ;;  %p6150_p9 = scmp.lt.u32.totalorder %s6146_s15, %s6673_s3 }
  0x1c   :  { %p6152_p10 = pnand %p6150_p9, %p6147_p8 }
  0x1e   :  { %6155 = shalt.err (!%p6152_p10)
}
  0x1f   :  { %s6156_s21 = scalar_lea.vmem %s6438_s22, 65536  ;;  %p6161_p12 = scmp.lt.s32.totalorder %s6438_s22, %s6438_s22 }
  0x20   :  { %p6157_p11 = scmp.ne.s32.totalorder %s6438_s22, %s6156_s21  ;;  %p6162_p13 = scmp.lt.s32.totalorder %s6156_s21, %s6156_s21 }
  0x22   :  { %p6163_p0 = por %p6162_p13, %p6161_p12 }
  0x24   :  { %p6164_p1 = pnand %p6163_p0, %p6157_p11 }
  0x26   :  { %6167 = shalt.err (!%p6164_p1)
}
  0x27   :  { %s6358_s1 = smov 256   ;;  %s6359_s20 = smov 16  }
  0x28   :  { %67 = dma.hbm_to_vmem [thread:$0]  %s6673_s3, 65536, %s6438_s22, [#allocation9], %s6358_s1, %s6358_s1, %s6359_s20  }
  0x29   :  { %s6360_s25 = smov [#allocation11]   ;;  %s6361_s10 = smov [#allocation14]  }
  0x2a   :  { %s84_s26 = sshll.u32 %s6360_s25, 4  ;;  %s104_s27 = sshll.u32 %s6361_s10, 4  ;;  %s85_s26 = int_to_ptr.vmem [resolvable:$true] %s84_s26  ;;  %s105_s27 = int_to_ptr.vmem [resolvable:$true] %s104_s27 }
  0x2b   :  { %s6168_s30 = scalar_lea.hbm %s6675_s5, 256 }
  0x2c   :  { %p6169_p2 = scmp.ne.s32.totalorder %s6675_s5, %s6168_s30  ;;  %p6172_p3 = scmp.lt.u32.totalorder %s6168_s30, %s6675_s5 }
  0x2e   :  { %p6174_p4 = pnand %p6172_p3, %p6169_p2 }
  0x30   :  { %6177 = shalt.err (!%p6174_p4)
}
  0x31   :  { %s6178_s3 = scalar_lea.vmem %s85_s26, 256  ;;  %p6183_p6 = scmp.lt.s32.totalorder %s85_s26, %s85_s26 }
  0x32   :  { %p6179_p5 = scmp.ne.s32.totalorder %s85_s26, %s6178_s3  ;;  %p6184_p7 = scmp.lt.s32.totalorder %s6178_s3, %s6178_s3 }
  0x34   :  { %p6185_p8 = por %p6184_p7, %p6183_p6 }
  0x36   :  { %p6186_p9 = pnand %p6185_p8, %p6179_p5 }
  0x38   :  { %6189 = shalt.err (!%p6186_p9)
}
  0x39   :  { %87 = dma.hbm_to_vmem [thread:$0]  %s6675_s5, 256, %s85_s26, [#allocation12]  }
  0x3a   :  { %s6190_s19 = scalar_lea.hbm %s6677_s7, 64 }
  0x3b   :  { %p6191_p10 = scmp.ne.s32.totalorder %s6677_s7, %s6190_s19  ;;  %p6194_p11 = scmp.lt.u32.totalorder %s6190_s19, %s6677_s7 }
  0x3d   :  { %p6196_p12 = pnand %p6194_p11, %p6191_p10 }
  0x3f   :  { %6199 = shalt.err (!%p6196_p12)
}
  0x40   :  { %s6200_s24 = scalar_lea.vmem %s105_s27, 64  ;;  %p6205_p0 = scmp.lt.s32.totalorder %s105_s27, %s105_s27 }
  0x41   :  { %p6201_p13 = scmp.ne.s32.totalorder %s105_s27, %s6200_s24  ;;  %p6206_p1 = scmp.lt.s32.totalorder %s6200_s24, %s6200_s24 }
  0x43   :  { %p6207_p2 = por %p6206_p1, %p6205_p0 }
  0x45   :  { %p6208_p3 = pnand %p6207_p2, %p6201_p13 }
  0x47   :  { %6211 = shalt.err (!%p6208_p3)
}
  0x48   :  { %107 = dma.hbm_to_vmem [thread:$0]  %s6677_s7, 64, %s105_s27, [#allocation15]  }
  0x49   :  { %s6362_s26 = smov [#allocation3]   ;;  %s6212_s30 = scalar_lea.hbm %s6670_s0, 8192 }
  0x4a   :  { %s29_s10 = sshll.u32 %s6362_s26, 4  ;;  %p6213_p4 = scmp.ne.s32.totalorder %s6670_s0, %s6212_s30  ;;  %s30_s10 = int_to_ptr.vmem [resolvable:$true] %s29_s10 }
  0x4b   :  { %p6216_p5 = scmp.lt.u32.totalorder %s6212_s30, %s6670_s0 }
  0x4d   :  { %p6218_p6 = pnand %p6216_p5, %p6213_p4 }
  0x4f   :  { %6221 = shalt.err (!%p6218_p6)
}
  0x50   :  { %s6222_s3 = scalar_lea.vmem %s30_s10, 8192  ;;  %p6227_p8 = scmp.lt.s32.totalorder %s30_s10, %s30_s10 }
  0x51   :  { %p6223_p7 = scmp.ne.s32.totalorder %s30_s10, %s6222_s3  ;;  %p6228_p9 = scmp.lt.s32.totalorder %s6222_s3, %s6222_s3 }
  0x53   :  { %p6229_p10 = por %p6228_p9, %p6227_p8 }
  0x55   :  { %p6230_p11 = pnand %p6229_p10, %p6223_p7 }
  0x57   :  { %6233 = shalt.err (!%p6230_p11)
}
  0x58   :  { %s6363_s7 = smov 2048   ;;  %s6364_s27 = smov 128  }
  0x59   :  { %35 = dma.hbm_to_vmem [thread:$0]  %s6670_s0, 8192, %s30_s10, [#allocation4], %s6363_s7, %s6363_s7, %s6364_s27  }
  0x5a   :  { %s6365_s17 = smov [#allocation7]   ;;  %s6366_s19 = smov [#allocation10]  }
  0x5b   :  { %s52_s18 = sshll.u32 %s6365_s17, 4  ;;  %s74_s21 = sshll.u32 %s6366_s19, 4  ;;  %s53_s18 = int_to_ptr.vmem [resolvable:$true] %s52_s18  ;;  %s75_s21 = int_to_ptr.vmem [resolvable:$true] %s74_s21 }
  0x5c   :  { %s6234_s23 = scalar_lea.hbm %s6672_s2, 32 }
  0x5d   :  { %p6235_p12 = scmp.ne.s32.totalorder %s6672_s2, %s6234_s23  ;;  %p6238_p13 = scmp.lt.u32.totalorder %s6234_s23, %s6672_s2 }
  0x5f   :  { %p6240_p0 = pnand %p6238_p13, %p6235_p12 }
  0x61   :  { %6243 = shalt.err (!%p6240_p0)
}
  0x62   :  { %s6244_s0 = scalar_lea.vmem %s53_s18, 32  ;;  %p6249_p2 = scmp.lt.s32.totalorder %s53_s18, %s53_s18 }
  0x63   :  { %p6245_p1 = scmp.ne.s32.totalorder %s53_s18, %s6244_s0  ;;  %p6250_p3 = scmp.lt.s32.totalorder %s6244_s0, %s6244_s0 }
  0x65   :  { %p6251_p4 = por %p6250_p3, %p6249_p2 }
  0x67   :  { %p6252_p5 = pnand %p6251_p4, %p6245_p1 }
  0x69   :  { %6255 = shalt.err (!%p6252_p5)
}
  0x6a   :  { %55 = dma.hbm_to_vmem [thread:$0]  %s6672_s2, 32, %s53_s18, [#allocation6]  }
  0x6b   :  { %s6256_s12 = scalar_lea.hbm %s6674_s4, 64 }
  0x6c   :  { %p6257_p6 = scmp.ne.s32.totalorder %s6674_s4, %s6256_s12  ;;  %p6260_p7 = scmp.lt.u32.totalorder %s6256_s12, %s6674_s4 }
  0x6e   :  { %p6262_p8 = pnand %p6260_p7, %p6257_p6 }
  0x70   :  { %6265 = shalt.err (!%p6262_p8)
}
  0x71   :  { %s6266_s7 = scalar_lea.vmem %s75_s21, 64  ;;  %p6271_p10 = scmp.lt.s32.totalorder %s75_s21, %s75_s21 }
  0x72   :  { %p6267_p9 = scmp.ne.s32.totalorder %s75_s21, %s6266_s7  ;;  %p6272_p11 = scmp.lt.s32.totalorder %s6266_s7, %s6266_s7 }
  0x74   :  { %p6273_p12 = por %p6272_p11, %p6271_p10 }
  0x76   :  { %p6274_p13 = pnand %p6273_p12, %p6267_p9 }
  0x78   :  { %6277 = shalt.err (!%p6274_p13)
}
  0x79   :  { %77 = dma.hbm_to_vmem [thread:$0]  %s6674_s4, 64, %s75_s21, [#allocation9]  }
  0x7a   :  { %s6367_s22 = smov [#allocation13]   ;;  %s6368_s17 = smov [#allocation16]  }
  0x7b   :  { %s94_s16 = sshll.u32 %s6367_s22, 4  ;;  %s114_s18 = sshll.u32 %s6368_s17, 4  ;;  %s95_s16 = int_to_ptr.vmem [resolvable:$true] %s94_s16  ;;  %s115_s18 = int_to_ptr.vmem [resolvable:$true] %s114_s18 }
  0x7c   :  { %s6278_s20 = scalar_lea.hbm %s6676_s6, 64 }
  0x7d   :  { %p6279_p0 = scmp.ne.s32.totalorder %s6676_s6, %s6278_s20  ;;  %p6282_p1 = scmp.lt.u32.totalorder %s6278_s20, %s6676_s6 }
  0x7f   :  { %p6284_p2 = pnand %p6282_p1, %p6279_p0 }
  0x81   :  { %6287 = shalt.err (!%p6284_p2)
}
  0x82   :  { %s6288_s4 = scalar_lea.vmem %s95_s16, 64  ;;  %p6293_p4 = scmp.lt.s32.totalorder %s95_s16, %s95_s16 }
  0x83   :  { %p6289_p3 = scmp.ne.s32.totalorder %s95_s16, %s6288_s4  ;;  %p6294_p5 = scmp.lt.s32.totalorder %s6288_s4, %s6288_s4 }
  0x85   :  { %p6295_p6 = por %p6294_p5, %p6293_p4 }
  0x87   :  { %p6296_p7 = pnand %p6295_p6, %p6289_p3 }
  0x89   :  { %6299 = shalt.err (!%p6296_p7)
}
  0x8a   :  { %97 = dma.hbm_to_vmem [thread:$0]  %s6676_s6, 64, %s95_s16, [#allocation12]  }
  0x8b   :  { %s6300_s28 = scalar_lea.hbm %s6678_s8, 96 }
  0x8c   :  { %p6301_p8 = scmp.ne.s32.totalorder %s6678_s8, %s6300_s28  ;;  %p6304_p9 = scmp.lt.u32.totalorder %s6300_s28, %s6678_s8 }
  0x8e   :  { %p6306_p10 = pnand %p6304_p9, %p6301_p8 }
  0x90   :  { %6309 = shalt.err (!%p6306_p10)
}
  0x91   :  { %s6310_s14 = scalar_lea.vmem %s115_s18, 96  ;;  %p6315_p12 = scmp.lt.s32.totalorder %s115_s18, %s115_s18 }
  0x92   :  { %p6311_p11 = scmp.ne.s32.totalorder %s115_s18, %s6310_s14  ;;  %p6316_p13 = scmp.lt.s32.totalorder %s6310_s14, %s6310_s14 }
  0x94   :  { %p6317_p0 = por %p6316_p13, %p6315_p12 }
  0x96   :  { %p6318_p1 = pnand %p6317_p0, %p6311_p11 }
  0x98   :  { %6321 = shalt.err (!%p6318_p1)
}
  0x99   :  { %117 = dma.hbm_to_vmem [thread:$0]  %s6678_s8, 96, %s115_s18, [#allocation15]  }
  0x9a   :  { %s6369_s3 = smov [#allocation17]   ;;  %s6322_s22 = scalar_lea.hbm %s6679_s9, 64 }
  0x9b   :  { %s124_s7 = sshll.u32 %s6369_s3, 4  ;;  %p6323_p2 = scmp.ne.s32.totalorder %s6679_s9, %s6322_s22  ;;  %s125_s7 = int_to_ptr.vmem [resolvable:$true] %s124_s7 }
  0x9c   :  { %p6326_p3 = scmp.lt.u32.totalorder %s6322_s22, %s6679_s9 }
  0x9e   :  { %p6328_p4 = pnand %p6326_p3, %p6323_p2 }
  0xa0   :  { %6331 = shalt.err (!%p6328_p4)
}
  0xa1   :  { %s6332_s20 = scalar_lea.vmem %s125_s7, 64  ;;  %p6337_p6 = scmp.lt.s32.totalorder %s125_s7, %s125_s7 }
  0xa2   :  { %p6333_p5 = scmp.ne.s32.totalorder %s125_s7, %s6332_s20  ;;  %p6338_p7 = scmp.lt.s32.totalorder %s6332_s20, %s6332_s20 }
  0xa4   :  { %p6339_p8 = por %p6338_p7, %p6337_p6 }
  0xa6   :  { %p6340_p9 = pnand %p6339_p8, %p6333_p5 }
  0xa8   :  { %6343 = shalt.err (!%p6340_p9)
}
  0xa9   :  { %127 = dma.hbm_to_vmem [thread:$0]  %s6679_s9, 64, %s125_s7, [#allocation18]  }
  0xaa   :  { %6344 = dma.done.wait [#allocation4], 8192  }
  0xab   :  { %6345 = vsyncadd [#allocation4], 4294959104 }
  0xac   :  { %6346 = dma.done.wait [#allocation6], 224  }
  0xad   :  { %6347 = vsyncadd [#allocation6], 4294967072 }
  0xae   :  { %6348 = dma.done.wait [#allocation9], 65600  }
  0xaf   :  { %6349 = vsyncadd [#allocation9], 4294901696 }
  0xb0   :  { %6350 = dma.done.wait [#allocation12], 320  }
  0xb1   :  { %6351 = vsyncadd [#allocation12], 4294966976 }
  0xb2   :  { %6352 = dma.done.wait [#allocation15], 160  }
  0xb3   :  { %6353 = vsyncadd [#allocation15], 4294967136 }
  0xb4   :  { %6354 = dma.done.wait [#allocation18], 64  }
  0xb5   :  { %6355 = vsyncadd [#allocation18], 4294967232  ;;  %v5356_v1 = vld [vmem:[#allocation8 + $0x4] ss:$16 sps:$4 sm:$0xff]   ;;  %v5358_v2 = vld [vmem:[#allocation8 + $0xc] ss:$16 sps:$4 sm:$0xff]  }
  0xb6   :  { %3687 = vmatprep.subr.bf16.mxu0 %v5356_v1  ;;  %v5360_v3 = vld [vmem:[#allocation8] ss:$16 sps:$4 sm:$0xff]   ;;  %v5361_v4 = vld [vmem:[#allocation8 + $0x8] ss:$16 sps:$4 sm:$0xff]   ;;  %4015 = vmatprep.subr.bf16.mxu1 %v5358_v2  ;;  %v5362_v5 = vld [vmem:[#allocation8 + $0x24] ss:$16 sps:$4 sm:$0xff]  }
  0xb7   :  { %3688 = vmatpush1.bf16.msra.mxu0 %v5360_v3  ;;  %4016 = vmatpush1.bf16.msra.mxu1 %v5361_v4  ;;  %v5364_v6 = vld [vmem:[#allocation8 + $0x2c] ss:$16 sps:$4 sm:$0xff]   ;;  %v5366_v7 = vld [vmem:[#allocation8 + $0x20] ss:$16 sps:$4 sm:$0xff]   ;;  %v5367_v8 = vld [vmem:[#allocation8 + $0x28] ss:$16 sps:$4 sm:$0xff]  }
  0xb8   :  { %3689 = vmatprep.subr.bf16.mxu0 %v5362_v5  ;;  %4017 = vmatprep.subr.bf16.mxu1 %v5364_v6  ;;  %v5368_v9 = vld [vmem:[#allocation8 + $0x44] ss:$16 sps:$4 sm:$0xff]   ;;  %v5370_v10 = vld [vmem:[#allocation8 + $0x4c] ss:$16 sps:$4 sm:$0xff]   ;;  %v5372_v11 = vld [vmem:[#allocation8 + $0x40] ss:$16 sps:$4 sm:$0xff]  }
  0xb9   :  { %v5373_v12 = vld [vmem:[#allocation8 + $0x48] ss:$16 sps:$4 sm:$0xff]   ;;  %v5374_v13 = vld [vmem:[#allocation8 + $0x64] ss:$16 sps:$4 sm:$0xff]   ;;  %v5376_v14 = vld [vmem:[#allocation8 + $0x6c] ss:$16 sps:$4 sm:$0xff]  }
  0xba   :  { %v5378_v15 = vld [vmem:[#allocation8 + $0x60] ss:$16 sps:$4 sm:$0xff]   ;;  %v5379_v16 = vld [vmem:[#allocation8 + $0x68] ss:$16 sps:$4 sm:$0xff]   ;;  %v5380_v17 = vld [vmem:[#allocation8 + $0x84] ss:$16 sps:$4 sm:$0xff]  }
  0xbb   :  { %3690 = vmatpush1.bf16.msra.mxu0 %v5366_v7  ;;  %4018 = vmatpush1.bf16.msra.mxu1 %v5367_v8  ;;  %v5382_v18 = vld [vmem:[#allocation8 + $0x8c] ss:$16 sps:$4 sm:$0xff]   ;;  %v5384_v19 = vld [vmem:[#allocation8 + $0x80] ss:$16 sps:$4 sm:$0xff]   ;;  %v5385_v20 = vld [vmem:[#allocation8 + $0x88] ss:$16 sps:$4 sm:$0xff]  }
  0xbc   :  { %3691 = vmatprep.subr.bf16.mxu0 %v5368_v9  ;;  %4019 = vmatprep.subr.bf16.mxu1 %v5370_v10  ;;  %v5386_v21 = vld [vmem:[#allocation8 + $0xa4] ss:$16 sps:$4 sm:$0xff]   ;;  %v5388_v22 = vld [vmem:[#allocation8 + $0xac] ss:$16 sps:$4 sm:$0xff]   ;;  %v5390_v23 = vld [vmem:[#allocation8 + $0xa0] ss:$16 sps:$4 sm:$0xff]  }
  0xbd   :  { %v5391_v24 = vld [vmem:[#allocation8 + $0xa8] ss:$16 sps:$4 sm:$0xff]   ;;  %v5392_v25 = vld [vmem:[#allocation8 + $0xc4] ss:$16 sps:$4 sm:$0xff]   ;;  %v5394_v26 = vld [vmem:[#allocation8 + $0xcc] ss:$16 sps:$4 sm:$0xff]  }
  0xbe   :  { %v5396_v27 = vld [vmem:[#allocation8 + $0xc0] ss:$16 sps:$4 sm:$0xff]   ;;  %v5397_v28 = vld [vmem:[#allocation8 + $0xc8] ss:$16 sps:$4 sm:$0xff]   ;;  %v5398_v29 = vld [vmem:[#allocation8 + $0xe4] ss:$16 sps:$4 sm:$0xff]  }
  0xbf   :  { %3692 = vmatpush1.bf16.msra.mxu0 %v5372_v11  ;;  %4020 = vmatpush1.bf16.msra.mxu1 %v5373_v12  ;;  %v5400_v30 = vld [vmem:[#allocation8 + $0xec] ss:$16 sps:$4 sm:$0xff]   ;;  %v5402_v31 = vld [vmem:[#allocation8 + $0xe0] ss:$16 sps:$4 sm:$0xff]   ;;  %v5403_v32 = vld [vmem:[#allocation8 + $0xe8] ss:$16 sps:$4 sm:$0xff]  }
  0xc0   :  { %3693 = vmatprep.subr.bf16.mxu0 %v5374_v13  ;;  %4021 = vmatprep.subr.bf16.mxu1 %v5376_v14  ;;  %v5404_v33 = vld [vmem:[#allocation8 + $0x104] ss:$16 sps:$4 sm:$0xff]   ;;  %v5406_v34 = vld [vmem:[#allocation8 + $0x10c] ss:$16 sps:$4 sm:$0xff]   ;;  %v5408_v35 = vld [vmem:[#allocation8 + $0x100] ss:$16 sps:$4 sm:$0xff]  }
  0xc1   :  { %v5409_v36 = vld [vmem:[#allocation8 + $0x108] ss:$16 sps:$4 sm:$0xff]   ;;  %v5410_v37 = vld [vmem:[#allocation8 + $0x124] ss:$16 sps:$4 sm:$0xff]   ;;  %v5412_v38 = vld [vmem:[#allocation8 + $0x12c] ss:$16 sps:$4 sm:$0xff]  }
  0xc2   :  { %v5414_v39 = vld [vmem:[#allocation8 + $0x120] ss:$16 sps:$4 sm:$0xff]   ;;  %v5415_v40 = vld [vmem:[#allocation8 + $0x128] ss:$16 sps:$4 sm:$0xff]   ;;  %v5416_v41 = vld [vmem:[#allocation8 + $0x144] ss:$16 sps:$4 sm:$0xff]  }
  0xc3   :  { %3694 = vmatpush1.bf16.msra.mxu0 %v5378_v15  ;;  %4022 = vmatpush1.bf16.msra.mxu1 %v5379_v16  ;;  %v5418_v42 = vld [vmem:[#allocation8 + $0x14c] ss:$16 sps:$4 sm:$0xff]   ;;  %v5420_v43 = vld [vmem:[#allocation8 + $0x140] ss:$16 sps:$4 sm:$0xff]   ;;  %v5421_v44 = vld [vmem:[#allocation8 + $0x148] ss:$16 sps:$4 sm:$0xff]  }
  0xc4   :  { %3695 = vmatprep.subr.bf16.mxu0 %v5380_v17  ;;  %4023 = vmatprep.subr.bf16.mxu1 %v5382_v18  ;;  %v5422_v45 = vld [vmem:[#allocation8 + $0x164] ss:$16 sps:$4 sm:$0xff]   ;;  %v5424_v46 = vld [vmem:[#allocation8 + $0x16c] ss:$16 sps:$4 sm:$0xff]   ;;  %v5426_v47 = vld [vmem:[#allocation8 + $0x160] ss:$16 sps:$4 sm:$0xff]  }
  0xc5   :  { %v5427_v48 = vld [vmem:[#allocation8 + $0x168] ss:$16 sps:$4 sm:$0xff]   ;;  %v5428_v53 = vld [vmem:[#allocation8 + $0x184] ss:$16 sps:$4 sm:$0xff]   ;;  %v5430_v56 = vld [vmem:[#allocation8 + $0x18c] ss:$16 sps:$4 sm:$0xff]  }
  0xc6   :  { %v161_v49 = vld [vmem:[#allocation3 + $0x8] sm:$0xff]  ;;  %v160_v61 = vld [vmem:[#allocation3] sm:$0xff]  ;;  %vm1078_vm0 = vcmask 1041409   ;;  %vm4591_vm1 = vcmask 1041408   ;;  %vm4747_vm2 = vcmask 1024  }
  0xc7   :  { %3696 = vmatpush1.bf16.msra.mxu0 %v5384_v19  ;;  %4024 = vmatpush1.bf16.msra.mxu1 %v5385_v20  ;;  %v177_v50 = vld [vmem:[#allocation3 + $0x88] sm:$0xff]  ;;  %v176_v62 = vld [vmem:[#allocation3 + $0x80] sm:$0xff] }
  0xc8   :  { %3697 = vmatprep.subr.bf16.mxu0 %v5386_v21  ;;  %4025 = vmatprep.subr.bf16.mxu1 %v5388_v22  ;;  %v193_v51 = vld [vmem:[#allocation3 + $0x108] sm:$0xff]  ;;  %v231_v54 = vadd.f32 %v177_v50, %v161_v49  ;;  %v192_v63 = vld [vmem:[#allocation3 + $0x100] sm:$0xff]  ;;  %v224_v3 = vadd.f32 %v176_v62, %v160_v61 }
  0xc9   :  { %v209_v52 = vld [vmem:[#allocation3 + $0x188] sm:$0xff]  ;;  %v208_v2 = vld [vmem:[#allocation3 + $0x180] sm:$0xff] }
  0xca   :  { %v343_v55 = vadd.f32 %v209_v52, %v193_v51  ;;  %v5432_v57 = vld [vmem:[#allocation8 + $0x180] ss:$16 sps:$4 sm:$0xff]   ;;  %v5433_v58 = vld [vmem:[#allocation8 + $0x188] ss:$16 sps:$4 sm:$0xff]   ;;  %v232_v59 = vrot.slane %v231_v54, 4  ;;  %v336_v6 = vadd.f32 %v208_v2, %v192_v63  ;;  %v225_v9 = vrot.slane %v224_v3, 4 }
  0xcb   :  { %3698 = vmatpush1.bf16.msra.mxu0 %v5390_v23  ;;  %4026 = vmatpush1.bf16.msra.mxu1 %v5391_v24  ;;  %v5434_v4 = vld [vmem:[#allocation8 + $0x1a4] ss:$16 sps:$4 sm:$0xff]   ;;  %v5436_v5 = vld [vmem:[#allocation8 + $0x1ac] ss:$16 sps:$4 sm:$0xff]   ;;  %v5438_v11 = vld [vmem:[#allocation8 + $0x1a0] ss:$16 sps:$4 sm:$0xff]  }
  0xcc   :  { %3699 = vmatprep.subr.bf16.mxu0 %v5392_v25  ;;  %4027 = vmatprep.subr.bf16.mxu1 %v5394_v26  ;;  %v344_v60 = vrot.slane %v343_v55, 4  ;;  %v233_v0 = vadd.f32 %v232_v59, %v231_v54  ;;  %v337_v10 = vrot.slane %v336_v6, 4  ;;  %v5439_v12 = vld [vmem:[#allocation8 + $0x1a8] ss:$16 sps:$4 sm:$0xff]   ;;  %v226_v15 = vadd.f32 %v225_v9, %v224_v3  ;;  %v5440_v16 = vld [vmem:[#allocation8 + $0x1c4] ss:$16 sps:$4 sm:$0xff]  }
  0xcd   :  { %v5442_v17 = vld [vmem:[#allocation8 + $0x1cc] ss:$16 sps:$4 sm:$0xff]   ;;  %v5444_v23 = vld [vmem:[#allocation8 + $0x1c0] ss:$16 sps:$4 sm:$0xff]   ;;  %v5445_v24 = vld [vmem:[#allocation8 + $0x1c8] ss:$16 sps:$4 sm:$0xff]  }
  0xce   :  { %v345_v1 = vadd.f32 %v344_v60, %v343_v55  ;;  %v234_v7 = vrot.slane %v233_v0, 2  ;;  %v338_v18 = vadd.f32 %v337_v10, %v336_v6  ;;  %v227_v21 = vrot.slane %v226_v15, 2  ;;  %v5452_v49 = vld [vmem:[#allocation8 + $0x200] ss:$16 sps:$4 sm:$0xff]   ;;  %v5455_v50 = vld [vmem:[#allocation8 + $0x208] ss:$16 sps:$4 sm:$0xff]  }
  0xcf   :  { %3700 = vmatpush1.bf16.msra.mxu0 %v5396_v27  ;;  %4028 = vmatpush1.bf16.msra.mxu1 %v5397_v28  ;;  %v5446_v28 = vld [vmem:[#allocation8 + $0x1e4] ss:$16 sps:$4 sm:$0xff]   ;;  %v5463_v54 = vld [vmem:[#allocation8 + $0x22c] ss:$16 sps:$4 sm:$0xff]   ;;  %v5458_v55 = vld [vmem:[#allocation8 + $0x220] ss:$16 sps:$4 sm:$0xff]  }
  0xd0   :  { %3701 = vmatprep.subr.bf16.mxu0 %v5398_v29  ;;  %4029 = vmatprep.subr.bf16.mxu1 %v5400_v30  ;;  %v346_v8 = vrot.slane %v345_v1, 2  ;;  %v235_v13 = vadd.f32 %v234_v7, %v233_v0  ;;  %v339_v22 = vrot.slane %v338_v18, 2  ;;  %v228_v27 = vadd.f32 %v227_v21, %v226_v15  ;;  %v5448_v29 = vld [vmem:[#allocation8 + $0x1ec] ss:$16 sps:$4 sm:$0xff]   ;;  %v5464_v59 = vld [vmem:[#allocation8 + $0x240] ss:$16 sps:$4 sm:$0xff]  }
  0xd1   :  { %v5467_v60 = vld [vmem:[#allocation8 + $0x248] ss:$16 sps:$4 sm:$0xff]   ;;  %v5472_v61 = vld [vmem:[#allocation8 + $0x264] ss:$16 sps:$4 sm:$0xff]   ;;  %v5475_v62 = vld [vmem:[#allocation8 + $0x26c] ss:$16 sps:$4 sm:$0xff]  }
  0xd2   :  { %v347_v14 = vadd.f32 %v346_v8, %v345_v1  ;;  %v236_v19 = vrot.slane %v235_v13, 1  ;;  %v340_v30 = vadd.f32 %v339_v22, %v338_v18  ;;  %v5470_v63 = vld [vmem:[#allocation8 + $0x260] ss:$16 sps:$4 sm:$0xff]   ;;  %v5473_v0 = vld [vmem:[#allocation8 + $0x268] ss:$16 sps:$4 sm:$0xff]  }
  0xd3   :  { %3702 = vmatpush1.bf16.msra.mxu0 %v5402_v31  ;;  %4030 = vmatpush1.bf16.msra.mxu1 %v5403_v32  ;;  %v5478_v1 = vld [vmem:[#allocation8 + $0x284] ss:$16 sps:$4 sm:$0xff]   ;;  %v5481_v2 = vld [vmem:[#allocation8 + $0x28c] ss:$16 sps:$4 sm:$0xff]   ;;  %v5476_v3 = vld [vmem:[#allocation8 + $0x280] ss:$16 sps:$4 sm:$0xff]  }
  0xd4   :  { %3703 = vmatprep.subr.bf16.mxu0 %v5404_v33  ;;  %4031 = vmatprep.subr.bf16.mxu1 %v5406_v34  ;;  %v348_v20 = vrot.slane %v347_v14, 1  ;;  %v237_v25 = vadd.f32 %v236_v19, %v235_v13  ;;  %v229_v33 = vrot.slane %v228_v27, 1  ;;  %v341_v34 = vrot.slane %v340_v30, 1  ;;  %v5487_v6 = vld [vmem:[#allocation8 + $0x2ac] ss:$16 sps:$4 sm:$0xff]  }
  0xd5   :  { %v5482_v7 = vld [vmem:[#allocation8 + $0x2a0] ss:$16 sps:$4 sm:$0xff]   ;;  %v5485_v8 = vld [vmem:[#allocation8 + $0x2a8] ss:$16 sps:$4 sm:$0xff]   ;;  %v5490_v9 = vld [vmem:[#allocation8 + $0x2c4] ss:$16 sps:$4 sm:$0xff]  }
  0xd6   :  { %v349_v26 = vadd.f32 %v348_v20, %v347_v14  ;;  %v449_v31 = vpack.c.bf16 %v237_v25, %v237_v25  ;;  %v5493_v10 = vld [vmem:[#allocation8 + $0x2cc] ss:$16 sps:$4 sm:$0xff]   ;;  %v5488_v15 = vld [vmem:[#allocation8 + $0x2c0] ss:$16 sps:$4 sm:$0xff]   ;;  %v5491_v18 = vld [vmem:[#allocation8 + $0x2c8] ss:$16 sps:$4 sm:$0xff]  }
  0xd7   :  { %3704 = vmatpush1.bf16.msra.mxu0 %v5408_v35  ;;  %4032 = vmatpush1.bf16.msra.mxu1 %v5409_v36  ;;  %v5450_v35 = vld [vmem:[#allocation8 + $0x1e0] ss:$16 sps:$4 sm:$0xff]   ;;  %v5451_v36 = vld [vmem:[#allocation8 + $0x1e8] ss:$16 sps:$4 sm:$0xff]   ;;  %v5496_v19 = vld [vmem:[#allocation8 + $0x2e4] ss:$16 sps:$4 sm:$0xff]  }
  0xd8   :  { %3705 = vmatprep.subr.bf16.mxu0 %v5410_v37  ;;  %4033 = vmatprep.subr.bf16.mxu1 %v5412_v38  ;;  %v465_v32 = vpack.c.bf16 %v349_v26, %v349_v26  ;;  %v1047_v37 = vunpack.c.l.b16 %v449_v31  ;;  %v195_v13 = vld [vmem:[#allocation3 + $0x118] sm:$0xff]  ;;  %v178_v25 = vld [vmem:[#allocation3 + $0x90] sm:$0xff] }
  0xd9   :  { %v211_v14 = vld [vmem:[#allocation3 + $0x198] sm:$0xff]  ;;  %v194_v26 = vld [vmem:[#allocation3 + $0x110] sm:$0xff] }
  0xda   :  { %v1063_v38 = vunpack.c.l.b16 %v465_v32  ;;  %v5499_v20 = vld [vmem:[#allocation8 + $0x2ec] ss:$16 sps:$4 sm:$0xff]   ;;  %v5497_v31 = vld [vmem:[#allocation8 + $0x2e8] ss:$16 sps:$4 sm:$0xff]   ;;  %v5502_v32 = vld [vmem:[#allocation8 + $0x304] ss:$16 sps:$4 sm:$0xff]  }
  0xdb   :  { %3706 = vmatpush1.bf16.msra.mxu0 %v5414_v39  ;;  %4034 = vmatpush1.bf16.msra.mxu1 %v5415_v40  ;;  %v230_v39 = vadd.f32 %v229_v33, %v228_v27  ;;  %v5454_v40 = vld [vmem:[#allocation8 + $0x204] ss:$16 sps:$4 sm:$0xff]  }
  0xdc   :  { %3707 = vmatprep.subr.bf16.mxu0 %v5416_v41  ;;  %4035 = vmatprep.subr.bf16.mxu1 %v5418_v42  ;;  %v342_v41 = vadd.f32 %v341_v34, %v340_v30  ;;  %v1080_v42 = vsel %vm1078_vm0, %v1063_v38, %v1047_v37  ;;  %v5505_v34 = vld [vmem:[#allocation8 + $0x30c] ss:$16 sps:$4 sm:$0xff]  }
  0xdf   :  { %3708 = vmatpush1.bf16.msra.mxu0 %v5420_v43  ;;  %4036 = vmatpush1.bf16.msra.mxu1 %v5421_v44  ;;  %v5457_v43 = vld [vmem:[#allocation8 + $0x20c] ss:$16 sps:$4 sm:$0xff]   ;;  %v448_v44 = vpack.c.bf16 %v230_v39, %v230_v39  ;;  %v5500_v39 = vld [vmem:[#allocation8 + $0x300] ss:$16 sps:$4 sm:$0xff]  }
  0xe0   :  { %3709 = vmatprep.subr.bf16.mxu0 %v5422_v45  ;;  %4037 = vmatprep.subr.bf16.mxu1 %v5424_v46  ;;  %v1096_v45 = vpack.c.b16 %v1080_v42, %v1080_v42  ;;  %v464_v46 = vpack.c.bf16 %v342_v41, %v342_v41 }
  0xe2   :  { %3719 = vmatprep.mubr.bf16.mxu0 %v1096_v45  ;;  %4047 = vmatprep.mubr.bf16.mxu1 %v1096_v45 }
  0xe3   :  { %3710 = vmatpush1.bf16.msra.mxu0 %v5426_v47  ;;  %4038 = vmatpush1.bf16.msra.mxu1 %v5427_v48  ;;  %v1046_v47 = vunpack.c.l.b16 %v448_v44  ;;  %v1062_v48 = vunpack.c.l.b16 %v464_v46  ;;  %v5511_v44 = vld [vmem:[#allocation8 + $0x32c] ss:$16 sps:$4 sm:$0xff]  }
  0xe4   :  { %3711 = vmatprep.subr.bf16.mxu0 %v5428_v53  ;;  %4039 = vmatprep.subr.bf16.mxu1 %v5430_v56  ;;  %v5460_v53 = vld [vmem:[#allocation8 + $0x224] ss:$16 sps:$4 sm:$0xff]   ;;  %v5461_v56 = vld [vmem:[#allocation8 + $0x228] ss:$16 sps:$4 sm:$0xff]  }
  0xe5   :  { %v1079_v51 = vsel %vm1078_vm0, %v1062_v48, %v1046_v47 }
  0xe6   :  { %v1095_v52 = vpack.c.b16 %v1079_v51, %v1079_v51 }
  0xe7   :  { %3712 = vmatpush1.bf16.msra.mxu0 %v5432_v57  ;;  %4040 = vmatpush1.bf16.msra.mxu1 %v5433_v58  ;;  %v5466_v57 = vld [vmem:[#allocation8 + $0x244] ss:$16 sps:$4 sm:$0xff]   ;;  %v5469_v58 = vld [vmem:[#allocation8 + $0x24c] ss:$16 sps:$4 sm:$0xff]  }
  0xe8   :  { %3713 = vmatprep.subr.bf16.mxu0 %v5434_v4  ;;  %4041 = vmatprep.subr.bf16.mxu1 %v5436_v5  ;;  %v5479_v4 = vld [vmem:[#allocation8 + $0x288] ss:$16 sps:$4 sm:$0xff]   ;;  %v5484_v5 = vld [vmem:[#allocation8 + $0x2a4] ss:$16 sps:$4 sm:$0xff]  }
  0xeb   :  { %3714 = vmatpush1.bf16.msra.mxu0 %v5438_v11  ;;  %4042 = vmatpush1.bf16.msra.mxu1 %v5439_v12  ;;  %v163_v11 = vld [vmem:[#allocation3 + $0x18] sm:$0xff] }
  0xec   :  { %3715 = vmatprep.subr.bf16.mxu0 %v5440_v16  ;;  %4043 = vmatprep.subr.bf16.mxu1 %v5442_v17  ;;  %v179_v12 = vld [vmem:[#allocation3 + $0x98] sm:$0xff]  ;;  %v357_v17 = vadd.f32 %v211_v14, %v195_v13  ;;  %v5532_v13 = vld [vmem:[#allocation8 + $0x3a4] ss:$16 sps:$4 sm:$0xff]  }
  0xed   :  { %v245_v16 = vadd.f32 %v179_v12, %v163_v11  ;;  %v5524_v11 = vld [vmem:[#allocation8 + $0x380] ss:$16 sps:$4 sm:$0xff]   ;;  %v5527_v12 = vld [vmem:[#allocation8 + $0x388] ss:$16 sps:$4 sm:$0xff]  }
  0xee   :  { %v358_v22 = vrot.slane %v357_v17, 4 }
  0xef   :  { %3716 = vmatpush1.bf16.msra.mxu0 %v5444_v23  ;;  %4044 = vmatpush1.bf16.msra.mxu1 %v5445_v24  ;;  %v246_v21 = vrot.slane %v245_v16, 4  ;;  %v5494_v23 = vld [vmem:[#allocation8 + $0x2e0] ss:$16 sps:$4 sm:$0xff]  }
  0xf0   :  { %3717 = vmatprep.subr.bf16.mxu0 %v5446_v28  ;;  %4045 = vmatprep.subr.bf16.mxu1 %v5448_v29  ;;  %v162_v24 = vld [vmem:[#allocation3 + $0x10] sm:$0xff]  ;;  %v359_v28 = vadd.f32 %v358_v22, %v357_v17  ;;  %v5541_v22 = vld [vmem:[#allocation8 + $0x3cc] ss:$16 sps:$4 sm:$0xff]  }
  0xf1   :  { %v247_v27 = vadd.f32 %v246_v21, %v245_v16  ;;  %v210_v29 = vld [vmem:[#allocation3 + $0x190] sm:$0xff]  ;;  %v238_v30 = vadd.f32 %v178_v25, %v162_v24  ;;  %v5535_v16 = vld [vmem:[#allocation8 + $0x3ac] ss:$16 sps:$4 sm:$0xff]  }
  0xf2   :  { %v350_v33 = vadd.f32 %v210_v29, %v194_v26  ;;  %v5530_v17 = vld [vmem:[#allocation8 + $0x3a0] ss:$16 sps:$4 sm:$0xff]   ;;  %v5539_v24 = vld [vmem:[#allocation8 + $0x3c8] ss:$16 sps:$4 sm:$0xff]   ;;  %v5544_v25 = vld [vmem:[#allocation8 + $0x3e4] ss:$16 sps:$4 sm:$0xff]  }
  0xf3   :  { %3718 = vmatpush1.bf16.msra.mxu0 %v5450_v35  ;;  %4046 = vmatpush1.bf16.msra.mxu1 %v5451_v36  ;;  %v248_v35 = vrot.slane %v247_v27, 2  ;;  %v360_v36 = vrot.slane %v359_v28, 2  ;;  %v239_v37 = vrot.slane %v238_v30, 4  ;;  %v5542_v29 = vld [vmem:[#allocation8 + $0x3e0] ss:$16 sps:$4 sm:$0xff]  }
  0xf4   :  { %3728 = vmatprep.subr.bf16.mxu0 %v5454_v40  ;;  %4056 = vmatprep.subr.bf16.mxu1 %v5457_v43  ;;  %v351_v38 = vrot.slane %v350_v33, 4  ;;  %v5503_v40 = vld [vmem:[#allocation8 + $0x308] ss:$16 sps:$4 sm:$0xff]   ;;  %v5508_v43 = vld [vmem:[#allocation8 + $0x324] ss:$16 sps:$4 sm:$0xff]  }
  0xf5   :  { %v249_v41 = vadd.f32 %v248_v35, %v247_v27  ;;  %v361_v42 = vadd.f32 %v360_v36, %v359_v28  ;;  %v240_v45 = vadd.f32 %v239_v37, %v238_v30  ;;  %v5547_v28 = vld [vmem:[#allocation8 + $0x3ec] ss:$16 sps:$4 sm:$0xff]   ;;  %v5545_v30 = vld [vmem:[#allocation8 + $0x3e8] ss:$16 sps:$4 sm:$0xff]   ;;  %v5556_v37 = vld [vmem:[#allocation8 + $0x424] ss:$16 sps:$4 sm:$0xff]  }
  0xf6   :  { %3720 = vmatmul.mubr.bf16.vlgmr.msra.gmra.mrb[0].mxu0 %v1095_v52  ;;  %4048 = vmatmul.mubr.bf16.vlgmr.msra.gmra.mrb[0].mxu1 %v1095_v52  ;;  %v352_v46 = vadd.f32 %v351_v38, %v350_v33  ;;  %v5553_v33 = vld [vmem:[#allocation8 + $0x40c] ss:$16 sps:$4 sm:$0xff]   ;;  %v5551_v36 = vld [vmem:[#allocation8 + $0x408] ss:$16 sps:$4 sm:$0xff]  }
  0xf7   :  { %3729 = vmatpush1.bf16.msra.mxu0 %v5452_v49  ;;  %4057 = vmatpush1.bf16.msra.mxu1 %v5455_v50  ;;  %v250_v47 = vrot.slane %v249_v41, 1  ;;  %v362_v48 = vrot.slane %v361_v42, 1  ;;  %v5506_v49 = vld [vmem:[#allocation8 + $0x320] ss:$16 sps:$4 sm:$0xff]   ;;  %v5509_v50 = vld [vmem:[#allocation8 + $0x328] ss:$16 sps:$4 sm:$0xff]  }
  0xf8   :  { %3730 = vmatprep.subr.bf16.mxu0 %v5460_v53  ;;  %4058 = vmatprep.subr.bf16.mxu1 %v5463_v54  ;;  %v5514_v53 = vld [vmem:[#allocation8 + $0x344] ss:$16 sps:$4 sm:$0xff]   ;;  %v241_v54 = vrot.slane %v240_v45, 2  ;;  %v5559_v38 = vld [vmem:[#allocation8 + $0x42c] ss:$16 sps:$4 sm:$0xff]  }
  0xf9   :  { %v251_v51 = vadd.f32 %v250_v47, %v249_v41  ;;  %v363_v52 = vadd.f32 %v362_v48, %v361_v42  ;;  %v5562_v41 = vld [vmem:[#allocation8 + $0x444] ss:$16 sps:$4 sm:$0xff]   ;;  %v165_v42 = vld [vmem:[#allocation3 + $0x28] sm:$0xff] }
  0xfb   :  { %3731 = vmatpush1.bf16.msra.mxu0 %v5458_v55  ;;  %4059 = vmatpush1.bf16.msra.mxu1 %v5461_v56  ;;  %v353_v55 = vrot.slane %v352_v46, 2  ;;  %v5517_v56 = vld [vmem:[#allocation8 + $0x34c] ss:$16 sps:$4 sm:$0xff]  }
  0xfc   :  { %3732 = vmatprep.subr.bf16.mxu0 %v5466_v57  ;;  %4060 = vmatprep.subr.bf16.mxu1 %v5469_v58  ;;  %v451_v57 = vpack.c.bf16 %v251_v51, %v251_v51  ;;  %v467_v58 = vpack.c.bf16 %v363_v52, %v363_v52  ;;  %v5560_v51 = vld [vmem:[#allocation8 + $0x440] ss:$16 sps:$4 sm:$0xff]   ;;  %v5563_v52 = vld [vmem:[#allocation8 + $0x448] ss:$16 sps:$4 sm:$0xff]  }
  0xff   :  { %3733 = vmatpush1.bf16.msra.mxu0 %v5464_v59  ;;  %4061 = vmatpush1.bf16.msra.mxu1 %v5467_v60  ;;  %v5512_v59 = vld [vmem:[#allocation8 + $0x340] ss:$16 sps:$4 sm:$0xff]   ;;  %v1049_v60 = vunpack.c.l.b16 %v451_v57 }
 0x100   :  { %3734 = vmatprep.subr.bf16.mxu0 %v5472_v61  ;;  %4062 = vmatprep.subr.bf16.mxu1 %v5475_v62  ;;  %v1065_v61 = vunpack.c.l.b16 %v467_v58  ;;  %v5515_v62 = vld [vmem:[#allocation8 + $0x348] ss:$16 sps:$4 sm:$0xff]   ;;  %v5566_v57 = vld [vmem:[#allocation8 + $0x460] ss:$16 sps:$4 sm:$0xff]  }
 0x103   :  { %3735 = vmatpush1.bf16.msra.mxu0 %v5470_v63  ;;  %4063 = vmatpush1.bf16.msra.mxu1 %v5473_v0  ;;  %v5520_v63 = vld [vmem:[#allocation8 + $0x364] ss:$16 sps:$4 sm:$0xff]   ;;  %v242_v0 = vadd.f32 %v241_v54, %v240_v45  ;;  %v213_v45 = vld [vmem:[#allocation3 + $0x1a8] sm:$0xff] }
 0x104   :  { %3736 = vmatprep.subr.bf16.mxu0 %v5478_v1  ;;  %4064 = vmatprep.subr.bf16.mxu1 %v5481_v2  ;;  %v354_v1 = vadd.f32 %v353_v55, %v352_v46  ;;  %v5523_v2 = vld [vmem:[#allocation8 + $0x36c] ss:$16 sps:$4 sm:$0xff]  }
 0x105   :  { %v5565_v46 = vld [vmem:[#allocation8 + $0x44c] ss:$16 sps:$4 sm:$0xff]  }
 0x106   :  { %v5571_v54 = vld [vmem:[#allocation8 + $0x46c] ss:$16 sps:$4 sm:$0xff]  }
 0x107   :  { %3737 = vmatpush1.bf16.msra.mxu0 %v5476_v3  ;;  %4065 = vmatpush1.bf16.msra.mxu1 %v5479_v4  ;;  %v1082_v3 = vsel %vm1078_vm0, %v1065_v61, %v1049_v60  ;;  %v5569_v60 = vld [vmem:[#allocation8 + $0x468] ss:$16 sps:$4 sm:$0xff]   ;;  %v5574_v61 = vld [vmem:[#allocation8 + $0x484] ss:$16 sps:$4 sm:$0xff]  }
 0x108   :  { %3738 = vmatprep.subr.bf16.mxu0 %v5484_v5  ;;  %4066 = vmatprep.subr.bf16.mxu1 %v5487_v6  ;;  %v1098_v4 = vpack.c.b16 %v1082_v3, %v1082_v3  ;;  %v5518_v5 = vld [vmem:[#allocation8 + $0x360] ss:$16 sps:$4 sm:$0xff]   ;;  %v5521_v6 = vld [vmem:[#allocation8 + $0x368] ss:$16 sps:$4 sm:$0xff]  }
 0x109   :  { %v5572_v3 = vld [vmem:[#allocation8 + $0x480] ss:$16 sps:$4 sm:$0xff]  }
 0x10a   :  { %3760 = vmatprep.mubr.bf16.mxu0 %v1098_v4  ;;  %4088 = vmatprep.mubr.bf16.mxu1 %v1098_v4  ;;  %v5575_v4 = vld [vmem:[#allocation8 + $0x488] ss:$16 sps:$4 sm:$0xff]  }
 0x10b   :  { %3739 = vmatpush1.bf16.msra.mxu0 %v5482_v7  ;;  %4067 = vmatpush1.bf16.msra.mxu1 %v5485_v8  ;;  %v5526_v7 = vld [vmem:[#allocation8 + $0x384] ss:$16 sps:$4 sm:$0xff]   ;;  %v243_v8 = vrot.slane %v242_v0, 1 }
 0x10c   :  { %3740 = vmatprep.subr.bf16.mxu0 %v5490_v9  ;;  %4068 = vmatprep.subr.bf16.mxu1 %v5493_v10  ;;  %v355_v9 = vrot.slane %v354_v1, 1  ;;  %v5529_v10 = vld [vmem:[#allocation8 + $0x38c] ss:$16 sps:$4 sm:$0xff]  }
 0x10d   :  { %v244_v14 = vadd.f32 %v243_v8, %v242_v0 }
 0x10f   :  { %3741 = vmatpush1.bf16.msra.mxu0 %v5488_v15  ;;  %4069 = vmatpush1.bf16.msra.mxu1 %v5491_v18  ;;  %v356_v15 = vadd.f32 %v355_v9, %v354_v1  ;;  %v5533_v18 = vld [vmem:[#allocation8 + $0x3a8] ss:$16 sps:$4 sm:$0xff]   ;;  %v5578_v9 = vld [vmem:[#allocation8 + $0x4a0] ss:$16 sps:$4 sm:$0xff]  }
 0x110   :  { %3742 = vmatprep.subr.bf16.mxu0 %v5496_v19  ;;  %4070 = vmatprep.subr.bf16.mxu1 %v5499_v20  ;;  %v5538_v19 = vld [vmem:[#allocation8 + $0x3c4] ss:$16 sps:$4 sm:$0xff]   ;;  %v450_v20 = vpack.c.bf16 %v244_v14, %v244_v14 }
 0x111   :  { %v466_v21 = vpack.c.bf16 %v356_v15, %v356_v15  ;;  %v164_v15 = vld [vmem:[#allocation3 + $0x20] sm:$0xff] }
 0x112   :  { %v1048_v26 = vunpack.c.l.b16 %v450_v20  ;;  %v212_v20 = vld [vmem:[#allocation3 + $0x1a0] sm:$0xff] }
 0x113   :  { %3743 = vmatpush1.bf16.msra.mxu0 %v5494_v23  ;;  %4071 = vmatpush1.bf16.msra.mxu1 %v5497_v31  ;;  %v5536_v23 = vld [vmem:[#allocation8 + $0x3c0] ss:$16 sps:$4 sm:$0xff]   ;;  %v1064_v27 = vunpack.c.l.b16 %v466_v21  ;;  %v5550_v31 = vld [vmem:[#allocation8 + $0x404] ss:$16 sps:$4 sm:$0xff]  }
 0x114   :  { %3744 = vmatprep.subr.bf16.mxu0 %v5502_v32  ;;  %4072 = vmatprep.subr.bf16.mxu1 %v5505_v34  ;;  %v5548_v34 = vld [vmem:[#allocation8 + $0x400] ss:$16 sps:$4 sm:$0xff]  }
 0x115   :  { %v1081_v32 = vsel %vm1078_vm0, %v1064_v27, %v1048_v26  ;;  %v5584_v21 = vld [vmem:[#allocation8 + $0x4c0] ss:$16 sps:$4 sm:$0xff]   ;;  %v5592_v27 = vld [vmem:[#allocation8 + $0x4e4] ss:$16 sps:$4 sm:$0xff]  }
 0x116   :  { %v1097_v35 = vpack.c.b16 %v1081_v32, %v1081_v32 }
 0x117   :  { %3745 = vmatpush1.bf16.msra.mxu0 %v5500_v39  ;;  %4073 = vmatpush1.bf16.msra.mxu1 %v5503_v40  ;;  %v5554_v39 = vld [vmem:[#allocation8 + $0x420] ss:$16 sps:$4 sm:$0xff]   ;;  %v5557_v40 = vld [vmem:[#allocation8 + $0x428] ss:$16 sps:$4 sm:$0xff]  }
 0x118   :  { %3746 = vmatprep.subr.bf16.mxu0 %v5508_v43  ;;  %4074 = vmatprep.subr.bf16.mxu1 %v5511_v44  ;;  %v181_v43 = vld [vmem:[#allocation3 + $0xa8] sm:$0xff] }
 0x119   :  { %v197_v44 = vld [vmem:[#allocation3 + $0x128] sm:$0xff]  ;;  %v259_v47 = vadd.f32 %v181_v43, %v165_v42 }
 0x11a   :  { %v371_v48 = vadd.f32 %v213_v45, %v197_v44  ;;  %v5605_v42 = vld [vmem:[#allocation8 + $0x528] ss:$16 sps:$4 sm:$0xff]   ;;  %v5610_v45 = vld [vmem:[#allocation8 + $0x544] ss:$16 sps:$4 sm:$0xff]  }
 0x11b   :  { %3747 = vmatpush1.bf16.msra.mxu0 %v5506_v49  ;;  %4075 = vmatpush1.bf16.msra.mxu1 %v5509_v50  ;;  %v260_v49 = vrot.slane %v259_v47, 4 }
 0x11c   :  { %3748 = vmatprep.subr.bf16.mxu0 %v5514_v53  ;;  %4076 = vmatprep.subr.bf16.mxu1 %v5517_v56  ;;  %v372_v50 = vrot.slane %v371_v48, 4  ;;  %v5568_v53 = vld [vmem:[#allocation8 + $0x464] ss:$16 sps:$4 sm:$0xff]  }
 0x11d   :  { %v261_v55 = vadd.f32 %v260_v49, %v259_v47  ;;  %v5608_v47 = vld [vmem:[#allocation8 + $0x540] ss:$16 sps:$4 sm:$0xff]  }
 0x11e   :  { %v373_v56 = vadd.f32 %v372_v50, %v371_v48  ;;  %v5611_v48 = vld [vmem:[#allocation8 + $0x548] ss:$16 sps:$4 sm:$0xff]  }
 0x11f   :  { %3749 = vmatpush1.bf16.msra.mxu0 %v5512_v59  ;;  %4077 = vmatpush1.bf16.msra.mxu1 %v5515_v62  ;;  %v262_v58 = vrot.slane %v261_v55, 2  ;;  %v5577_v62 = vld [vmem:[#allocation8 + $0x48c] ss:$16 sps:$4 sm:$0xff]  }
 0x120   :  { %3750 = vmatprep.subr.bf16.mxu0 %v5520_v63  ;;  %4078 = vmatprep.subr.bf16.mxu1 %v5523_v2  ;;  %v374_v59 = vrot.slane %v373_v56, 2 }
 0x121   :  { %v263_v63 = vadd.f32 %v262_v58, %v261_v55  ;;  %v5625_v58 = vld [vmem:[#allocation8 + $0x58c] ss:$16 sps:$4 sm:$0xff]  }
 0x122   :  { %v375_v0 = vadd.f32 %v374_v59, %v373_v56  ;;  %v5620_v59 = vld [vmem:[#allocation8 + $0x580] ss:$16 sps:$4 sm:$0xff]  }
 0x123   :  { %3751 = vmatpush1.bf16.msra.mxu0 %v5518_v5  ;;  %4079 = vmatpush1.bf16.msra.mxu1 %v5521_v6  ;;  %v264_v1 = vrot.slane %v263_v63, 1  ;;  %v5580_v5 = vld [vmem:[#allocation8 + $0x4a4] ss:$16 sps:$4 sm:$0xff]   ;;  %v5583_v6 = vld [vmem:[#allocation8 + $0x4ac] ss:$16 sps:$4 sm:$0xff]  }
 0x124   :  { %3752 = vmatprep.subr.bf16.mxu0 %v5526_v7  ;;  %4080 = vmatprep.subr.bf16.mxu1 %v5529_v10  ;;  %v376_v2 = vrot.slane %v375_v0, 1  ;;  %v5581_v10 = vld [vmem:[#allocation8 + $0x4a8] ss:$16 sps:$4 sm:$0xff]  }
 0x125   :  { %v265_v7 = vadd.f32 %v264_v1, %v263_v63  ;;  %v5628_v63 = vld [vmem:[#allocation8 + $0x5a4] ss:$16 sps:$4 sm:$0xff]   ;;  %v167_v1 = vld [vmem:[#allocation3 + $0x38] sm:$0xff] }
 0x126   :  { %v377_v8 = vadd.f32 %v376_v2, %v375_v0  ;;  %v5631_v0 = vld [vmem:[#allocation8 + $0x5ac] ss:$16 sps:$4 sm:$0xff]  }
 0x127   :  { %3753 = vmatpush1.bf16.msra.mxu0 %v5524_v11  ;;  %4081 = vmatpush1.bf16.msra.mxu1 %v5527_v12  ;;  %v5586_v11 = vld [vmem:[#allocation8 + $0x4c4] ss:$16 sps:$4 sm:$0xff]   ;;  %v5589_v12 = vld [vmem:[#allocation8 + $0x4cc] ss:$16 sps:$4 sm:$0xff]  }
 0x128   :  { %3754 = vmatprep.subr.bf16.mxu0 %v5532_v13  ;;  %4082 = vmatprep.subr.bf16.mxu1 %v5535_v16  ;;  %v453_v13 = vpack.c.bf16 %v265_v7, %v265_v7  ;;  %v469_v14 = vpack.c.bf16 %v377_v8, %v377_v8  ;;  %v180_v16 = vld [vmem:[#allocation3 + $0xa0] sm:$0xff]  ;;  %v183_v2 = vld [vmem:[#allocation3 + $0xb8] sm:$0xff] }
 0x129   :  { %v5629_v8 = vld [vmem:[#allocation8 + $0x5a8] ss:$16 sps:$4 sm:$0xff]  }
 0x12b   :  { %3755 = vmatpush1.bf16.msra.mxu0 %v5530_v17  ;;  %4083 = vmatpush1.bf16.msra.mxu1 %v5533_v18  ;;  %v1051_v17 = vunpack.c.l.b16 %v453_v13  ;;  %v1067_v18 = vunpack.c.l.b16 %v469_v14 }
 0x12c   :  { %3756 = vmatprep.subr.bf16.mxu0 %v5538_v19  ;;  %4084 = vmatprep.subr.bf16.mxu1 %v5541_v22  ;;  %v196_v19 = vld [vmem:[#allocation3 + $0x120] sm:$0xff] }
 0x12d   :  { %v1084_v22 = vsel %vm1078_vm0, %v1067_v18, %v1051_v17  ;;  %v364_v26 = vadd.f32 %v212_v20, %v196_v19  ;;  %v5635_v18 = vld [vmem:[#allocation8 + $0x5c8] ss:$16 sps:$4 sm:$0xff]   ;;  %v5640_v19 = vld [vmem:[#allocation8 + $0x5e4] ss:$16 sps:$4 sm:$0xff]  }
 0x12f   :  { %3757 = vmatpush1.bf16.msra.mxu0 %v5536_v23  ;;  %4085 = vmatpush1.bf16.msra.mxu1 %v5539_v24  ;;  %v5587_v23 = vld [vmem:[#allocation8 + $0x4c8] ss:$16 sps:$4 sm:$0xff]   ;;  %v1100_v24 = vpack.c.b16 %v1084_v22, %v1084_v22  ;;  %v365_v32 = vrot.slane %v364_v26, 4  ;;  %v5643_v22 = vld [vmem:[#allocation8 + $0x5ec] ss:$16 sps:$4 sm:$0xff]  }
 0x130   :  { %3758 = vmatprep.subr.bf16.mxu0 %v5544_v25  ;;  %4086 = vmatprep.subr.bf16.mxu1 %v5547_v28  ;;  %v252_v25 = vadd.f32 %v180_v16, %v164_v15  ;;  %v5595_v28 = vld [vmem:[#allocation8 + $0x4ec] ss:$16 sps:$4 sm:$0xff]   ;;  %v5632_v15 = vld [vmem:[#allocation8 + $0x5c0] ss:$16 sps:$4 sm:$0xff]  }
 0x133   :  { %3759 = vmatpush1.bf16.msra.mxu0 %v5542_v29  ;;  %4087 = vmatpush1.bf16.msra.mxu1 %v5545_v30  ;;  %v5590_v29 = vld [vmem:[#allocation8 + $0x4e0] ss:$16 sps:$4 sm:$0xff]   ;;  %v5593_v30 = vld [vmem:[#allocation8 + $0x4e8] ss:$16 sps:$4 sm:$0xff]  }
 0x134   :  { %3769 = vmatprep.subr.bf16.mxu0 %v5550_v31  ;;  %4097 = vmatprep.subr.bf16.mxu1 %v5553_v33  ;;  %v253_v31 = vrot.slane %v252_v25, 4  ;;  %v5598_v33 = vld [vmem:[#allocation8 + $0x504] ss:$16 sps:$4 sm:$0xff]  }
 0x136   :  { %3761 = vmatmul.mubr.bf16.vlgmr.msra.gmra.mrb[0].mxu0 %v1097_v35  ;;  %4089 = vmatmul.mubr.bf16.vlgmr.msra.gmra.mrb[0].mxu1 %v1097_v35  ;;  %v5596_v35 = vld [vmem:[#allocation8 + $0x500] ss:$16 sps:$4 sm:$0xff]  }
 0x137   :  { %3770 = vmatpush1.bf16.msra.mxu0 %v5548_v34  ;;  %4098 = vmatpush1.bf16.msra.mxu1 %v5551_v36  ;;  %v5601_v34 = vld [vmem:[#allocation8 + $0x50c] ss:$16 sps:$4 sm:$0xff]   ;;  %v5599_v36 = vld [vmem:[#allocation8 + $0x508] ss:$16 sps:$4 sm:$0xff]  }
 0x138   :  { %3771 = vmatprep.subr.bf16.mxu0 %v5556_v37  ;;  %4099 = vmatprep.subr.bf16.mxu1 %v5559_v38  ;;  %v254_v37 = vadd.f32 %v253_v31, %v252_v25  ;;  %v366_v38 = vadd.f32 %v365_v32, %v364_v26  ;;  %v5638_v25 = vld [vmem:[#allocation8 + $0x5e0] ss:$16 sps:$4 sm:$0xff]   ;;  %v5641_v26 = vld [vmem:[#allocation8 + $0x5e8] ss:$16 sps:$4 sm:$0xff]  }
 0x139   :  { %3801 = vmatprep.mubr.bf16.mxu0 %v1100_v24  ;;  %4129 = vmatprep.mubr.bf16.mxu1 %v1100_v24 }
 0x13a   :  { %v255_v43 = vrot.slane %v254_v37, 2  ;;  %v367_v44 = vrot.slane %v366_v38, 2 }
 0x13b   :  { %3772 = vmatpush1.bf16.msra.mxu0 %v5554_v39  ;;  %4100 = vmatpush1.bf16.msra.mxu1 %v5557_v40  ;;  %v5604_v39 = vld [vmem:[#allocation8 + $0x524] ss:$16 sps:$4 sm:$0xff]   ;;  %v5607_v40 = vld [vmem:[#allocation8 + $0x52c] ss:$16 sps:$4 sm:$0xff]  }
 0x13c   :  { %3773 = vmatprep.subr.bf16.mxu0 %v5562_v41  ;;  %4101 = vmatprep.subr.bf16.mxu1 %v5565_v46  ;;  %v5602_v41 = vld [vmem:[#allocation8 + $0x520] ss:$16 sps:$4 sm:$0xff]   ;;  %v5613_v46 = vld [vmem:[#allocation8 + $0x54c] ss:$16 sps:$4 sm:$0xff]   ;;  %v256_v49 = vadd.f32 %v255_v43, %v254_v37  ;;  %v368_v50 = vadd.f32 %v367_v44, %v366_v38  ;;  %v5647_v38 = vld [vmem:[#allocation8 + $0x608] ss:$16 sps:$4 sm:$0xff]  }
 0x13d   :  { %v5650_v43 = vld [vmem:[#allocation8 + $0x620] ss:$16 sps:$4 sm:$0xff]  }
 0x13e   :  { %v257_v55 = vrot.slane %v256_v49, 1  ;;  %v369_v56 = vrot.slane %v368_v50, 1 }
 0x13f   :  { %3774 = vmatpush1.bf16.msra.mxu0 %v5560_v51  ;;  %4102 = vmatpush1.bf16.msra.mxu1 %v5563_v52  ;;  %v5616_v51 = vld [vmem:[#allocation8 + $0x564] ss:$16 sps:$4 sm:$0xff]   ;;  %v5619_v52 = vld [vmem:[#allocation8 + $0x56c] ss:$16 sps:$4 sm:$0xff]  }
 0x140   :  { %3775 = vmatprep.subr.bf16.mxu0 %v5568_v53  ;;  %4103 = vmatprep.subr.bf16.mxu1 %v5571_v54  ;;  %v5614_v53 = vld [vmem:[#allocation8 + $0x560] ss:$16 sps:$4 sm:$0xff]   ;;  %v5617_v54 = vld [vmem:[#allocation8 + $0x568] ss:$16 sps:$4 sm:$0xff]  }
 0x143   :  { %3776 = vmatpush1.bf16.msra.mxu0 %v5566_v57  ;;  %4104 = vmatpush1.bf16.msra.mxu1 %v5569_v60  ;;  %v5622_v57 = vld [vmem:[#allocation8 + $0x584] ss:$16 sps:$4 sm:$0xff]   ;;  %v5623_v60 = vld [vmem:[#allocation8 + $0x588] ss:$16 sps:$4 sm:$0xff]  }
 0x144   :  { %3777 = vmatprep.subr.bf16.mxu0 %v5574_v61  ;;  %4105 = vmatprep.subr.bf16.mxu1 %v5577_v62  ;;  %v258_v61 = vadd.f32 %v257_v55, %v256_v49  ;;  %v370_v62 = vadd.f32 %v369_v56, %v368_v50  ;;  %v5662_v55 = vld [vmem:[#allocation8 + $0x660] ss:$16 sps:$4 sm:$0xff]   ;;  %v5665_v56 = vld [vmem:[#allocation8 + $0x668] ss:$16 sps:$4 sm:$0xff]  }
 0x147   :  { %3778 = vmatpush1.bf16.msra.mxu0 %v5572_v3  ;;  %4106 = vmatpush1.bf16.msra.mxu1 %v5575_v4  ;;  %v199_v3 = vld [vmem:[#allocation3 + $0x138] sm:$0xff] }
 0x148   :  { %3779 = vmatprep.subr.bf16.mxu0 %v5580_v5  ;;  %4107 = vmatprep.subr.bf16.mxu1 %v5583_v6  ;;  %v215_v4 = vld [vmem:[#allocation3 + $0x1b8] sm:$0xff]  ;;  %v273_v6 = vadd.f32 %v183_v2, %v167_v1  ;;  %v5682_v1 = vld [vmem:[#allocation8 + $0x6c4] ss:$16 sps:$4 sm:$0xff]  }
 0x149   :  { %v5626_v5 = vld [vmem:[#allocation8 + $0x5a0] ss:$16 sps:$4 sm:$0xff]   ;;  %v385_v7 = vadd.f32 %v215_v4, %v199_v3  ;;  %v5685_v2 = vld [vmem:[#allocation8 + $0x6cc] ss:$16 sps:$4 sm:$0xff]  }
 0x14a   :  { %v274_v13 = vrot.slane %v273_v6, 4  ;;  %v166_v3 = vld [vmem:[#allocation3 + $0x30] sm:$0xff] }
 0x14b   :  { %3780 = vmatpush1.bf16.msra.mxu0 %v5578_v9  ;;  %4108 = vmatpush1.bf16.msra.mxu1 %v5581_v10  ;;  %v452_v9 = vpack.c.bf16 %v258_v61, %v258_v61  ;;  %v468_v10 = vpack.c.bf16 %v370_v62, %v370_v62  ;;  %v386_v14 = vrot.slane %v385_v7, 4  ;;  %v5676_v61 = vld [vmem:[#allocation8 + $0x6a4] ss:$16 sps:$4 sm:$0xff]   ;;  %v5679_v62 = vld [vmem:[#allocation8 + $0x6ac] ss:$16 sps:$4 sm:$0xff]  }
 0x14c   :  { %3781 = vmatprep.subr.bf16.mxu0 %v5586_v11  ;;  %4109 = vmatprep.subr.bf16.mxu1 %v5589_v12  ;;  %v5634_v11 = vld [vmem:[#allocation8 + $0x5c4] ss:$16 sps:$4 sm:$0xff]   ;;  %v5637_v12 = vld [vmem:[#allocation8 + $0x5cc] ss:$16 sps:$4 sm:$0xff]   ;;  %v275_v16 = vadd.f32 %v274_v13, %v273_v6  ;;  %v5686_v13 = vld [vmem:[#allocation8 + $0x6e0] ss:$16 sps:$4 sm:$0xff]  }
 0x14d   :  { %v387_v17 = vadd.f32 %v386_v14, %v385_v7  ;;  %v1050_v20 = vunpack.c.l.b16 %v452_v9  ;;  %v182_v4 = vld [vmem:[#allocation3 + $0xb0] sm:$0xff] }
 0x14e   :  { %v214_v6 = vld [vmem:[#allocation3 + $0x1b0] sm:$0xff] }
 0x14f   :  { %3782 = vmatpush1.bf16.msra.mxu0 %v5584_v21  ;;  %4110 = vmatpush1.bf16.msra.mxu1 %v5587_v23  ;;  %v1066_v21 = vunpack.c.l.b16 %v468_v10  ;;  %v276_v23 = vrot.slane %v275_v16, 2  ;;  %v388_v24 = vrot.slane %v387_v17, 2  ;;  %v5680_v7 = vld [vmem:[#allocation8 + $0x6c0] ss:$16 sps:$4 sm:$0xff]   ;;  %v5688_v9 = vld [vmem:[#allocation8 + $0x6e4] ss:$16 sps:$4 sm:$0xff]   ;;  %v266_v10 = vadd.f32 %v182_v4, %v166_v3 }
 0x150   :  { %3783 = vmatprep.subr.bf16.mxu0 %v5592_v27  ;;  %4111 = vmatprep.subr.bf16.mxu1 %v5595_v28  ;;  %v5689_v14 = vld [vmem:[#allocation8 + $0x6e8] ss:$16 sps:$4 sm:$0xff]  }
 0x151   :  { %v277_v27 = vadd.f32 %v276_v23, %v275_v16  ;;  %v389_v28 = vadd.f32 %v388_v24, %v387_v17  ;;  %v1083_v31 = vsel %vm1078_vm0, %v1066_v21, %v1050_v20  ;;  %v267_v16 = vrot.slane %v266_v10, 4  ;;  %v5695_v20 = vld [vmem:[#allocation8 + $0x708] ss:$16 sps:$4 sm:$0xff]   ;;  %v5700_v21 = vld [vmem:[#allocation8 + $0x724] ss:$16 sps:$4 sm:$0xff]  }
 0x152   :  { %v5725_v4 = vld [vmem:[#allocation8 + $0x7a8] ss:$16 sps:$4 sm:$0xff]  }
 0x153   :  { %3784 = vmatpush1.bf16.msra.mxu0 %v5590_v29  ;;  %4112 = vmatpush1.bf16.msra.mxu1 %v5593_v30  ;;  %v5646_v29 = vld [vmem:[#allocation8 + $0x604] ss:$16 sps:$4 sm:$0xff]   ;;  %v5649_v30 = vld [vmem:[#allocation8 + $0x60c] ss:$16 sps:$4 sm:$0xff]   ;;  %v278_v32 = vrot.slane %v277_v27, 1  ;;  %v268_v23 = vadd.f32 %v267_v16, %v266_v10 }
 0x154   :  { %3785 = vmatprep.subr.bf16.mxu0 %v5598_v33  ;;  %4113 = vmatprep.subr.bf16.mxu1 %v5601_v34  ;;  %v390_v33 = vrot.slane %v389_v28, 1  ;;  %v5644_v34 = vld [vmem:[#allocation8 + $0x600] ss:$16 sps:$4 sm:$0xff]   ;;  %v5739_v16 = vld [vmem:[#allocation8 + $0x7ec] ss:$16 sps:$4 sm:$0xff]  }
 0x156   :  { %v391_v37 = vadd.f32 %v390_v33, %v389_v28  ;;  %v5703_v28 = vld [vmem:[#allocation8 + $0x72c] ss:$16 sps:$4 sm:$0xff]  }
 0x157   :  { %3786 = vmatpush1.bf16.msra.mxu0 %v5596_v35  ;;  %4114 = vmatpush1.bf16.msra.mxu1 %v5599_v36  ;;  %v1099_v35 = vpack.c.b16 %v1083_v31, %v1083_v31  ;;  %v279_v36 = vadd.f32 %v278_v32, %v277_v27  ;;  %v217_v27 = vld [vmem:[#allocation3 + $0x1c8] sm:$0xff] }
 0x158   :  { %3787 = vmatprep.subr.bf16.mxu0 %v5604_v39  ;;  %4115 = vmatprep.subr.bf16.mxu1 %v5607_v40  ;;  %v5652_v39 = vld [vmem:[#allocation8 + $0x624] ss:$16 sps:$4 sm:$0xff]   ;;  %v5655_v40 = vld [vmem:[#allocation8 + $0x62c] ss:$16 sps:$4 sm:$0xff]   ;;  %v5698_v31 = vld [vmem:[#allocation8 + $0x720] ss:$16 sps:$4 sm:$0xff]  }
 0x15b   :  { %3788 = vmatpush1.bf16.msra.mxu0 %v5602_v41  ;;  %4116 = vmatpush1.bf16.msra.mxu1 %v5605_v42  ;;  %v455_v41 = vpack.c.bf16 %v279_v36, %v279_v36  ;;  %v471_v42 = vpack.c.bf16 %v391_v37, %v391_v37  ;;  %v269_v36 = vrot.slane %v268_v23, 2 }
 0x15c   :  { %3789 = vmatprep.subr.bf16.mxu0 %v5610_v45  ;;  %4117 = vmatprep.subr.bf16.mxu1 %v5613_v46  ;;  %v5653_v46 = vld [vmem:[#allocation8 + $0x628] ss:$16 sps:$4 sm:$0xff]  }
 0x15d   :  { %v1053_v44 = vunpack.c.l.b16 %v455_v41  ;;  %v1069_v45 = vunpack.c.l.b16 %v471_v42  ;;  %v5704_v41 = vld [vmem:[#allocation8 + $0x740] ss:$16 sps:$4 sm:$0xff]  }
 0x15f   :  { %3790 = vmatpush1.bf16.msra.mxu0 %v5608_v47  ;;  %4118 = vmatpush1.bf16.msra.mxu1 %v5611_v48  ;;  %v5658_v47 = vld [vmem:[#allocation8 + $0x644] ss:$16 sps:$4 sm:$0xff]   ;;  %v5661_v48 = vld [vmem:[#allocation8 + $0x64c] ss:$16 sps:$4 sm:$0xff]   ;;  %v1086_v49 = vsel %vm1078_vm0, %v1069_v45, %v1053_v44  ;;  %v5707_v44 = vld [vmem:[#allocation8 + $0x748] ss:$16 sps:$4 sm:$0xff]   ;;  %v270_v45 = vadd.f32 %v269_v36, %v268_v23 }
 0x160   :  { %3791 = vmatprep.subr.bf16.mxu0 %v5616_v51  ;;  %4119 = vmatprep.subr.bf16.mxu1 %v5619_v52  ;;  %v1102_v50 = vpack.c.b16 %v1086_v49, %v1086_v49  ;;  %v5656_v51 = vld [vmem:[#allocation8 + $0x640] ss:$16 sps:$4 sm:$0xff]   ;;  %v5659_v52 = vld [vmem:[#allocation8 + $0x648] ss:$16 sps:$4 sm:$0xff]   ;;  %v5745_v23 = vld [vmem:[#allocation8 + $0x80c] ss:$16 sps:$4 sm:$0xff]  }
 0x161   :  { %v5710_v49 = vld [vmem:[#allocation8 + $0x760] ss:$16 sps:$4 sm:$0xff]   ;;  %v5755_v36 = vld [vmem:[#allocation8 + $0x848] ss:$16 sps:$4 sm:$0xff]  }
 0x163   :  { %3792 = vmatpush1.bf16.msra.mxu0 %v5614_v53  ;;  %4120 = vmatpush1.bf16.msra.mxu1 %v5617_v54  ;;  %v5664_v53 = vld [vmem:[#allocation8 + $0x664] ss:$16 sps:$4 sm:$0xff]   ;;  %v5667_v54 = vld [vmem:[#allocation8 + $0x66c] ss:$16 sps:$4 sm:$0xff]  }
 0x164   :  { %3793 = vmatprep.subr.bf16.mxu0 %v5622_v57  ;;  %4121 = vmatprep.subr.bf16.mxu1 %v5625_v58  ;;  %v5670_v57 = vld [vmem:[#allocation8 + $0x684] ss:$16 sps:$4 sm:$0xff]   ;;  %v5673_v58 = vld [vmem:[#allocation8 + $0x68c] ss:$16 sps:$4 sm:$0xff]  }
 0x167   :  { %3794 = vmatpush1.bf16.msra.mxu0 %v5620_v59  ;;  %4122 = vmatpush1.bf16.msra.mxu1 %v5623_v60  ;;  %v5668_v59 = vld [vmem:[#allocation8 + $0x680] ss:$16 sps:$4 sm:$0xff]   ;;  %v5671_v60 = vld [vmem:[#allocation8 + $0x688] ss:$16 sps:$4 sm:$0xff]  }
 0x168   :  { %3795 = vmatprep.subr.bf16.mxu0 %v5628_v63  ;;  %4123 = vmatprep.subr.bf16.mxu1 %v5631_v0  ;;  %v5674_v63 = vld [vmem:[#allocation8 + $0x6a0] ss:$16 sps:$4 sm:$0xff]   ;;  %v5677_v0 = vld [vmem:[#allocation8 + $0x6a8] ss:$16 sps:$4 sm:$0xff]  }
 0x16b   :  { %3796 = vmatpush1.bf16.msra.mxu0 %v5626_v5  ;;  %4124 = vmatpush1.bf16.msra.mxu1 %v5629_v8  ;;  %v198_v5 = vld [vmem:[#allocation3 + $0x130] sm:$0xff] }
 0x16c   :  { %3797 = vmatprep.subr.bf16.mxu0 %v5634_v11  ;;  %4125 = vmatprep.subr.bf16.mxu1 %v5637_v12  ;;  %v5683_v8 = vld [vmem:[#allocation8 + $0x6c8] ss:$16 sps:$4 sm:$0xff]   ;;  %v378_v11 = vadd.f32 %v214_v6, %v198_v5  ;;  %v5691_v12 = vld [vmem:[#allocation8 + $0x6ec] ss:$16 sps:$4 sm:$0xff]  }
 0x16e   :  { %v379_v17 = vrot.slane %v378_v11, 4 }
 0x16f   :  { %3798 = vmatpush1.bf16.msra.mxu0 %v5632_v15  ;;  %4126 = vmatpush1.bf16.msra.mxu1 %v5635_v18  ;;  %v5694_v15 = vld [vmem:[#allocation8 + $0x704] ss:$16 sps:$4 sm:$0xff]   ;;  %v5697_v18 = vld [vmem:[#allocation8 + $0x70c] ss:$16 sps:$4 sm:$0xff]  }
 0x170   :  { %3799 = vmatprep.subr.bf16.mxu0 %v5640_v19  ;;  %4127 = vmatprep.subr.bf16.mxu1 %v5643_v22  ;;  %v5692_v19 = vld [vmem:[#allocation8 + $0x700] ss:$16 sps:$4 sm:$0xff]   ;;  %v380_v24 = vadd.f32 %v379_v17, %v378_v11 }
 0x171   :  { %v169_v22 = vld [vmem:[#allocation3 + $0x48] sm:$0xff] }
 0x172   :  { %v381_v37 = vrot.slane %v380_v24, 2  ;;  %v5734_v17 = vld [vmem:[#allocation8 + $0x7e0] ss:$16 sps:$4 sm:$0xff]  }
 0x173   :  { %3800 = vmatpush1.bf16.msra.mxu0 %v5638_v25  ;;  %4128 = vmatpush1.bf16.msra.mxu1 %v5641_v26  ;;  %v185_v25 = vld [vmem:[#allocation3 + $0xc8] sm:$0xff] }
 0x174   :  { %3810 = vmatprep.subr.bf16.mxu0 %v5646_v29  ;;  %4138 = vmatprep.subr.bf16.mxu1 %v5649_v30  ;;  %v201_v26 = vld [vmem:[#allocation3 + $0x148] sm:$0xff]  ;;  %v287_v29 = vadd.f32 %v185_v25, %v169_v22  ;;  %v5742_v22 = vld [vmem:[#allocation8 + $0x804] ss:$16 sps:$4 sm:$0xff]  }
 0x175   :  { %v399_v30 = vadd.f32 %v217_v27, %v201_v26  ;;  %v5743_v27 = vld [vmem:[#allocation8 + $0x808] ss:$16 sps:$4 sm:$0xff]  }
 0x176   :  { %3802 = vmatmul.mubr.bf16.vlgmr.msra.gmra.mrb[0].mxu0 %v1099_v35  ;;  %4130 = vmatmul.mubr.bf16.vlgmr.msra.gmra.mrb[0].mxu1 %v1099_v35  ;;  %v288_v32 = vrot.slane %v287_v29, 4  ;;  %v5706_v35 = vld [vmem:[#allocation8 + $0x744] ss:$16 sps:$4 sm:$0xff]  }
 0x177   :  { %3811 = vmatpush1.bf16.msra.mxu0 %v5644_v34  ;;  %4139 = vmatpush1.bf16.msra.mxu1 %v5647_v38  ;;  %v400_v33 = vrot.slane %v399_v30, 4  ;;  %v5701_v34 = vld [vmem:[#allocation8 + $0x728] ss:$16 sps:$4 sm:$0xff]   ;;  %v5709_v38 = vld [vmem:[#allocation8 + $0x74c] ss:$16 sps:$4 sm:$0xff]  }
 0x178   :  { %3812 = vmatprep.subr.bf16.mxu0 %v5652_v39  ;;  %4140 = vmatprep.subr.bf16.mxu1 %v5655_v40  ;;  %v289_v39 = vadd.f32 %v288_v32, %v287_v29  ;;  %v5751_v29 = vld [vmem:[#allocation8 + $0x82c] ss:$16 sps:$4 sm:$0xff]   ;;  %v5749_v32 = vld [vmem:[#allocation8 + $0x828] ss:$16 sps:$4 sm:$0xff]  }
 0x179   :  { %3842 = vmatprep.mubr.bf16.mxu0 %v1102_v50  ;;  %4170 = vmatprep.mubr.bf16.mxu1 %v1102_v50  ;;  %v401_v40 = vadd.f32 %v400_v33, %v399_v30  ;;  %v5754_v33 = vld [vmem:[#allocation8 + $0x844] ss:$16 sps:$4 sm:$0xff]  }
 0x17a   :  { %v290_v42 = vrot.slane %v289_v39, 2 }
 0x17b   :  { %3813 = vmatpush1.bf16.msra.mxu0 %v5650_v43  ;;  %4141 = vmatpush1.bf16.msra.mxu1 %v5653_v46  ;;  %v402_v43 = vrot.slane %v401_v40, 2  ;;  %v382_v46 = vadd.f32 %v381_v37, %v380_v24  ;;  %v5740_v24 = vld [vmem:[#allocation8 + $0x800] ss:$16 sps:$4 sm:$0xff]   ;;  %v5760_v37 = vld [vmem:[#allocation8 + $0x864] ss:$16 sps:$4 sm:$0xff]  }
 0x17c   :  { %3814 = vmatprep.subr.bf16.mxu0 %v5658_v47  ;;  %4142 = vmatprep.subr.bf16.mxu1 %v5661_v48  ;;  %v5712_v47 = vld [vmem:[#allocation8 + $0x764] ss:$16 sps:$4 sm:$0xff]   ;;  %v5715_v48 = vld [vmem:[#allocation8 + $0x76c] ss:$16 sps:$4 sm:$0xff]   ;;  %v291_v50 = vadd.f32 %v290_v42, %v289_v39  ;;  %v5758_v39 = vld [vmem:[#allocation8 + $0x860] ss:$16 sps:$4 sm:$0xff]  }
 0x17d   :  { %v5769_v42 = vld [vmem:[#allocation8 + $0x88c] ss:$16 sps:$4 sm:$0xff]  }
 0x17f   :  { %3815 = vmatpush1.bf16.msra.mxu0 %v5656_v51  ;;  %4143 = vmatpush1.bf16.msra.mxu1 %v5659_v52  ;;  %v403_v51 = vadd.f32 %v402_v43, %v401_v40  ;;  %v5713_v52 = vld [vmem:[#allocation8 + $0x768] ss:$16 sps:$4 sm:$0xff]   ;;  %v5764_v43 = vld [vmem:[#allocation8 + $0x880] ss:$16 sps:$4 sm:$0xff]  }
 0x180   :  { %3816 = vmatprep.subr.bf16.mxu0 %v5664_v53  ;;  %4144 = vmatprep.subr.bf16.mxu1 %v5667_v54  ;;  %v271_v53 = vrot.slane %v270_v45, 1  ;;  %v383_v54 = vrot.slane %v382_v46, 1  ;;  %v5761_v40 = vld [vmem:[#allocation8 + $0x868] ss:$16 sps:$4 sm:$0xff]  }
 0x183   :  { %3817 = vmatpush1.bf16.msra.mxu0 %v5662_v55  ;;  %4145 = vmatpush1.bf16.msra.mxu1 %v5665_v56  ;;  %v5718_v55 = vld [vmem:[#allocation8 + $0x784] ss:$16 sps:$4 sm:$0xff]   ;;  %v5721_v56 = vld [vmem:[#allocation8 + $0x78c] ss:$16 sps:$4 sm:$0xff]  }
 0x184   :  { %3818 = vmatprep.subr.bf16.mxu0 %v5670_v57  ;;  %4146 = vmatprep.subr.bf16.mxu1 %v5673_v58  ;;  %v5716_v57 = vld [vmem:[#allocation8 + $0x780] ss:$16 sps:$4 sm:$0xff]   ;;  %v292_v58 = vrot.slane %v291_v50, 1 }
 0x187   :  { %3819 = vmatpush1.bf16.msra.mxu0 %v5668_v59  ;;  %4147 = vmatpush1.bf16.msra.mxu1 %v5671_v60  ;;  %v404_v59 = vrot.slane %v403_v51, 1  ;;  %v5719_v60 = vld [vmem:[#allocation8 + $0x788] ss:$16 sps:$4 sm:$0xff]  }
 0x188   :  { %3820 = vmatprep.subr.bf16.mxu0 %v5676_v61  ;;  %4148 = vmatprep.subr.bf16.mxu1 %v5679_v62  ;;  %v272_v61 = vadd.f32 %v271_v53, %v270_v45  ;;  %v384_v62 = vadd.f32 %v383_v54, %v382_v46  ;;  %v5772_v45 = vld [vmem:[#allocation8 + $0x8a4] ss:$16 sps:$4 sm:$0xff]   ;;  %v5775_v46 = vld [vmem:[#allocation8 + $0x8ac] ss:$16 sps:$4 sm:$0xff]  }
 0x189   :  { %v405_v3 = vadd.f32 %v404_v59, %v403_v51  ;;  %v168_v51 = vld [vmem:[#allocation3 + $0x40] sm:$0xff]  ;;  %v171_v59 = vld [vmem:[#allocation3 + $0x58] sm:$0xff] }
 0x18a   :  { %v454_v5 = vpack.c.bf16 %v272_v61, %v272_v61  ;;  %v470_v6 = vpack.c.bf16 %v384_v62, %v384_v62  ;;  %v200_v53 = vld [vmem:[#allocation3 + $0x140] sm:$0xff] }
 0x18b   :  { %3821 = vmatpush1.bf16.msra.mxu0 %v5674_v63  ;;  %4149 = vmatpush1.bf16.msra.mxu1 %v5677_v0  ;;  %v5724_v63 = vld [vmem:[#allocation8 + $0x7a4] ss:$16 sps:$4 sm:$0xff]   ;;  %v5727_v0 = vld [vmem:[#allocation8 + $0x7ac] ss:$16 sps:$4 sm:$0xff]   ;;  %v473_v11 = vpack.c.bf16 %v405_v3, %v405_v3 }
 0x18c   :  { %3822 = vmatprep.subr.bf16.mxu0 %v5682_v1  ;;  %4150 = vmatprep.subr.bf16.mxu1 %v5685_v2  ;;  %v5722_v1 = vld [vmem:[#allocation8 + $0x7a0] ss:$16 sps:$4 sm:$0xff]   ;;  %v293_v2 = vadd.f32 %v292_v58, %v291_v50  ;;  %v5781_v50 = vld [vmem:[#allocation8 + $0x8cc] ss:$16 sps:$4 sm:$0xff]  }
 0x18d   :  { %v216_v54 = vld [vmem:[#allocation3 + $0x1c0] sm:$0xff]  ;;  %v5787_v58 = vld [vmem:[#allocation8 + $0x8ec] ss:$16 sps:$4 sm:$0xff]  }
 0x18e   :  { %v457_v10 = vpack.c.bf16 %v293_v2, %v293_v2  ;;  %v392_v62 = vadd.f32 %v216_v54, %v200_v53  ;;  %v5785_v2 = vld [vmem:[#allocation8 + $0x8e8] ss:$16 sps:$4 sm:$0xff]   ;;  %v5826_v53 = vld [vmem:[#allocation8 + $0x9c4] ss:$16 sps:$4 sm:$0xff]  }
 0x18f   :  { %3823 = vmatpush1.bf16.msra.mxu0 %v5680_v7  ;;  %4151 = vmatpush1.bf16.msra.mxu1 %v5683_v8  ;;  %v5730_v7 = vld [vmem:[#allocation8 + $0x7c4] ss:$16 sps:$4 sm:$0xff]   ;;  %v5733_v8 = vld [vmem:[#allocation8 + $0x7cc] ss:$16 sps:$4 sm:$0xff]  }
 0x190   :  { %3824 = vmatprep.subr.bf16.mxu0 %v5688_v9  ;;  %4152 = vmatprep.subr.bf16.mxu1 %v5691_v12  ;;  %v5728_v9 = vld [vmem:[#allocation8 + $0x7c0] ss:$16 sps:$4 sm:$0xff]   ;;  %v5731_v12 = vld [vmem:[#allocation8 + $0x7c8] ss:$16 sps:$4 sm:$0xff]  }
 0x193   :  { %3825 = vmatpush1.bf16.msra.mxu0 %v5686_v13  ;;  %4153 = vmatpush1.bf16.msra.mxu1 %v5689_v14  ;;  %v1052_v13 = vunpack.c.l.b16 %v454_v5  ;;  %v1068_v14 = vunpack.c.l.b16 %v470_v6  ;;  %v5790_v5 = vld [vmem:[#allocation8 + $0x904] ss:$16 sps:$4 sm:$0xff]  }
 0x194   :  { %3826 = vmatprep.subr.bf16.mxu0 %v5694_v15  ;;  %4154 = vmatprep.subr.bf16.mxu1 %v5697_v18  ;;  %v5736_v15 = vld [vmem:[#allocation8 + $0x7e4] ss:$16 sps:$4 sm:$0xff]   ;;  %v1055_v18 = vunpack.c.l.b16 %v457_v10 }
 0x197   :  { %3827 = vmatpush1.bf16.msra.mxu0 %v5692_v19  ;;  %4155 = vmatpush1.bf16.msra.mxu1 %v5695_v20  ;;  %v1071_v19 = vunpack.c.l.b16 %v473_v11  ;;  %v5737_v20 = vld [vmem:[#allocation8 + $0x7e8] ss:$16 sps:$4 sm:$0xff]  }
 0x198   :  { %3828 = vmatprep.subr.bf16.mxu0 %v5700_v21  ;;  %4156 = vmatprep.subr.bf16.mxu1 %v5703_v28  ;;  %v1085_v21 = vsel %vm1078_vm0, %v1068_v14, %v1052_v13  ;;  %v5748_v28 = vld [vmem:[#allocation8 + $0x824] ss:$16 sps:$4 sm:$0xff]  }
 0x199   :  { %v1101_v25 = vpack.c.b16 %v1085_v21, %v1085_v21  ;;  %v1088_v26 = vsel %vm1078_vm0, %v1071_v19, %v1055_v18  ;;  %v5796_v13 = vld [vmem:[#allocation8 + $0x924] ss:$16 sps:$4 sm:$0xff]   ;;  %v5797_v18 = vld [vmem:[#allocation8 + $0x928] ss:$16 sps:$4 sm:$0xff]  }
 0x19a   :  { %v1104_v30 = vpack.c.b16 %v1088_v26, %v1088_v26  ;;  %v5802_v21 = vld [vmem:[#allocation8 + $0x944] ss:$16 sps:$4 sm:$0xff]  }
 0x19b   :  { %3829 = vmatpush1.bf16.msra.mxu0 %v5698_v31  ;;  %4157 = vmatpush1.bf16.msra.mxu1 %v5701_v34  ;;  %v5746_v31 = vld [vmem:[#allocation8 + $0x820] ss:$16 sps:$4 sm:$0xff]   ;;  %v5757_v34 = vld [vmem:[#allocation8 + $0x84c] ss:$16 sps:$4 sm:$0xff]  }
 0x19c   :  { %3830 = vmatprep.subr.bf16.mxu0 %v5706_v35  ;;  %4158 = vmatprep.subr.bf16.mxu1 %v5709_v38  ;;  %v5752_v35 = vld [vmem:[#allocation8 + $0x840] ss:$16 sps:$4 sm:$0xff]   ;;  %v5763_v38 = vld [vmem:[#allocation8 + $0x86c] ss:$16 sps:$4 sm:$0xff]  }
 0x19f   :  { %3831 = vmatpush1.bf16.msra.mxu0 %v5704_v41  ;;  %4159 = vmatpush1.bf16.msra.mxu1 %v5707_v44  ;;  %v5766_v41 = vld [vmem:[#allocation8 + $0x884] ss:$16 sps:$4 sm:$0xff]   ;;  %v5767_v44 = vld [vmem:[#allocation8 + $0x888] ss:$16 sps:$4 sm:$0xff]  }
 0x1a0   :  { %3832 = vmatprep.subr.bf16.mxu0 %v5712_v47  ;;  %4160 = vmatprep.subr.bf16.mxu1 %v5715_v48  ;;  %v5770_v47 = vld [vmem:[#allocation8 + $0x8a0] ss:$16 sps:$4 sm:$0xff]   ;;  %v5773_v48 = vld [vmem:[#allocation8 + $0x8a8] ss:$16 sps:$4 sm:$0xff]  }
 0x1a3   :  { %3833 = vmatpush1.bf16.msra.mxu0 %v5710_v49  ;;  %4161 = vmatpush1.bf16.msra.mxu1 %v5713_v52  ;;  %v5778_v49 = vld [vmem:[#allocation8 + $0x8c4] ss:$16 sps:$4 sm:$0xff]  }
 0x1a4   :  { %3834 = vmatprep.subr.bf16.mxu0 %v5718_v55  ;;  %4162 = vmatprep.subr.bf16.mxu1 %v5721_v56  ;;  %v184_v52 = vld [vmem:[#allocation3 + $0xc0] sm:$0xff] }
 0x1a5   :  { %v5776_v55 = vld [vmem:[#allocation8 + $0x8c0] ss:$16 sps:$4 sm:$0xff]   ;;  %v5779_v56 = vld [vmem:[#allocation8 + $0x8c8] ss:$16 sps:$4 sm:$0xff]   ;;  %v280_v61 = vadd.f32 %v184_v52, %v168_v51 }
 0x1a6   :  { %v5821_v52 = vld [vmem:[#allocation8 + $0x9a8] ss:$16 sps:$4 sm:$0xff]  }
 0x1a7   :  { %3835 = vmatpush1.bf16.msra.mxu0 %v5716_v57  ;;  %4163 = vmatpush1.bf16.msra.mxu1 %v5719_v60  ;;  %v5784_v57 = vld [vmem:[#allocation8 + $0x8e4] ss:$16 sps:$4 sm:$0xff]   ;;  %v187_v60 = vld [vmem:[#allocation3 + $0xd8] sm:$0xff]  ;;  %v281_v6 = vrot.slane %v280_v61, 4 }
 0x1a8   :  { %3836 = vmatprep.subr.bf16.mxu0 %v5724_v63  ;;  %4164 = vmatprep.subr.bf16.mxu1 %v5727_v0  ;;  %v203_v63 = vld [vmem:[#allocation3 + $0x158] sm:$0xff]  ;;  %v301_v3 = vadd.f32 %v187_v60, %v171_v59 }
 0x1a9   :  { %v219_v0 = vld [vmem:[#allocation3 + $0x1d8] sm:$0xff]  ;;  %v282_v14 = vadd.f32 %v281_v6, %v280_v61  ;;  %v5838_v6 = vld [vmem:[#allocation8 + $0xa04] ss:$16 sps:$4 sm:$0xff]  }
 0x1aa   :  { %v302_v10 = vrot.slane %v301_v3, 4  ;;  %v5824_v59 = vld [vmem:[#allocation8 + $0x9c0] ss:$16 sps:$4 sm:$0xff]   ;;  %v5827_v60 = vld [vmem:[#allocation8 + $0x9c8] ss:$16 sps:$4 sm:$0xff]  }
 0x1ab   :  { %3837 = vmatpush1.bf16.msra.mxu0 %v5722_v1  ;;  %4165 = vmatpush1.bf16.msra.mxu1 %v5725_v4  ;;  %v5782_v1 = vld [vmem:[#allocation8 + $0x8e0] ss:$16 sps:$4 sm:$0xff]   ;;  %v413_v4 = vadd.f32 %v219_v0, %v203_v63  ;;  %v5832_v63 = vld [vmem:[#allocation8 + $0x9e4] ss:$16 sps:$4 sm:$0xff]   ;;  %v5835_v0 = vld [vmem:[#allocation8 + $0x9ec] ss:$16 sps:$4 sm:$0xff]  }
 0x1ac   :  { %3838 = vmatprep.subr.bf16.mxu0 %v5730_v7  ;;  %4166 = vmatprep.subr.bf16.mxu1 %v5733_v8  ;;  %v393_v7 = vrot.slane %v392_v62, 4  ;;  %v5793_v8 = vld [vmem:[#allocation8 + $0x90c] ss:$16 sps:$4 sm:$0xff]   ;;  %v303_v19 = vadd.f32 %v302_v10, %v301_v3  ;;  %v5830_v3 = vld [vmem:[#allocation8 + $0x9e0] ss:$16 sps:$4 sm:$0xff]  }
 0x1ad   :  { %v414_v11 = vrot.slane %v413_v4, 4  ;;  %v5836_v10 = vld [vmem:[#allocation8 + $0xa00] ss:$16 sps:$4 sm:$0xff]  }
 0x1ae   :  { %v304_v26 = vrot.slane %v303_v19, 2 }
 0x1af   :  { %3839 = vmatpush1.bf16.msra.mxu0 %v5728_v9  ;;  %4167 = vmatpush1.bf16.msra.mxu1 %v5731_v12  ;;  %v5788_v9 = vld [vmem:[#allocation8 + $0x900] ss:$16 sps:$4 sm:$0xff]   ;;  %v5791_v12 = vld [vmem:[#allocation8 + $0x908] ss:$16 sps:$4 sm:$0xff]  }
 0x1b0   :  { %3840 = vmatprep.subr.bf16.mxu0 %v5736_v15  ;;  %4168 = vmatprep.subr.bf16.mxu1 %v5739_v16  ;;  %v394_v15 = vadd.f32 %v393_v7, %v392_v62  ;;  %v5799_v16 = vld [vmem:[#allocation8 + $0x92c] ss:$16 sps:$4 sm:$0xff]  }
 0x1b1   :  { %v5841_v7 = vld [vmem:[#allocation8 + $0xa0c] ss:$16 sps:$4 sm:$0xff]  }
 0x1b3   :  { %3841 = vmatpush1.bf16.msra.mxu0 %v5734_v17  ;;  %4169 = vmatpush1.bf16.msra.mxu1 %v5737_v20  ;;  %v5794_v17 = vld [vmem:[#allocation8 + $0x920] ss:$16 sps:$4 sm:$0xff]   ;;  %v415_v20 = vadd.f32 %v414_v11, %v413_v4  ;;  %v5833_v4 = vld [vmem:[#allocation8 + $0x9e8] ss:$16 sps:$4 sm:$0xff]  }
 0x1b4   :  { %3851 = vmatprep.subr.bf16.mxu0 %v5742_v22  ;;  %4179 = vmatprep.subr.bf16.mxu1 %v5745_v23  ;;  %v283_v22 = vrot.slane %v282_v14, 2  ;;  %v395_v23 = vrot.slane %v394_v15, 2  ;;  %v5839_v11 = vld [vmem:[#allocation8 + $0xa08] ss:$16 sps:$4 sm:$0xff]  }
 0x1b6   :  { %3843 = vmatmul.mubr.bf16.vlgmr.msra.gmra.mrb[0].mxu0 %v1101_v25  ;;  %4171 = vmatmul.mubr.bf16.vlgmr.msra.gmra.mrb[0].mxu1 %v1101_v25  ;;  %v5800_v25 = vld [vmem:[#allocation8 + $0x940] ss:$16 sps:$4 sm:$0xff]  }
 0x1b7   :  { %3852 = vmatpush1.bf16.msra.mxu0 %v5740_v24  ;;  %4180 = vmatpush1.bf16.msra.mxu1 %v5743_v27  ;;  %v5805_v24 = vld [vmem:[#allocation8 + $0x94c] ss:$16 sps:$4 sm:$0xff]   ;;  %v416_v27 = vrot.slane %v415_v20, 2 }
 0x1b8   :  { %3853 = vmatprep.subr.bf16.mxu0 %v5748_v28  ;;  %4181 = vmatprep.subr.bf16.mxu1 %v5751_v29  ;;  %v5803_v28 = vld [vmem:[#allocation8 + $0x948] ss:$16 sps:$4 sm:$0xff]   ;;  %v5808_v29 = vld [vmem:[#allocation8 + $0x964] ss:$16 sps:$4 sm:$0xff]  }
 0x1b9   :  { %3883 = vmatprep.mubr.bf16.mxu0 %v1104_v30  ;;  %4211 = vmatprep.mubr.bf16.mxu1 %v1104_v30  ;;  %v284_v30 = vadd.f32 %v283_v22, %v282_v14  ;;  %v5859_v22 = vld [vmem:[#allocation8 + $0xa6c] ss:$16 sps:$4 sm:$0xff]  }
 0x1bb   :  { %3854 = vmatpush1.bf16.msra.mxu0 %v5746_v31  ;;  %4182 = vmatpush1.bf16.msra.mxu1 %v5749_v32  ;;  %v396_v31 = vadd.f32 %v395_v23, %v394_v15  ;;  %v5811_v32 = vld [vmem:[#allocation8 + $0x96c] ss:$16 sps:$4 sm:$0xff]   ;;  %v5842_v15 = vld [vmem:[#allocation8 + $0xa20] ss:$16 sps:$4 sm:$0xff]  }
 0x1bc   :  { %3855 = vmatprep.subr.bf16.mxu0 %v5754_v33  ;;  %4183 = vmatprep.subr.bf16.mxu1 %v5757_v34  ;;  %v5806_v33 = vld [vmem:[#allocation8 + $0x960] ss:$16 sps:$4 sm:$0xff]   ;;  %v5809_v34 = vld [vmem:[#allocation8 + $0x968] ss:$16 sps:$4 sm:$0xff]  }
 0x1bd   :  { %v5854_v23 = vld [vmem:[#allocation8 + $0xa60] ss:$16 sps:$4 sm:$0xff]  }
 0x1bf   :  { %3856 = vmatpush1.bf16.msra.mxu0 %v5752_v35  ;;  %4184 = vmatpush1.bf16.msra.mxu1 %v5755_v36  ;;  %v305_v35 = vadd.f32 %v304_v26, %v303_v19  ;;  %v417_v36 = vadd.f32 %v416_v27, %v415_v20  ;;  %v5848_v19 = vld [vmem:[#allocation8 + $0xa40] ss:$16 sps:$4 sm:$0xff]   ;;  %v5851_v20 = vld [vmem:[#allocation8 + $0xa48] ss:$16 sps:$4 sm:$0xff]   ;;  %v5865_v26 = vld [vmem:[#allocation8 + $0xa8c] ss:$16 sps:$4 sm:$0xff]  }
 0x1c0   :  { %3857 = vmatprep.subr.bf16.mxu0 %v5760_v37  ;;  %4185 = vmatprep.subr.bf16.mxu1 %v5763_v38  ;;  %v5814_v37 = vld [vmem:[#allocation8 + $0x984] ss:$16 sps:$4 sm:$0xff]   ;;  %v285_v38 = vrot.slane %v284_v30, 1  ;;  %v5860_v27 = vld [vmem:[#allocation8 + $0xa80] ss:$16 sps:$4 sm:$0xff]  }
 0x1c3   :  { %3858 = vmatpush1.bf16.msra.mxu0 %v5758_v39  ;;  %4186 = vmatpush1.bf16.msra.mxu1 %v5761_v40  ;;  %v397_v39 = vrot.slane %v396_v31, 1  ;;  %v5817_v40 = vld [vmem:[#allocation8 + $0x98c] ss:$16 sps:$4 sm:$0xff]  }
 0x1c4   :  { %3859 = vmatprep.subr.bf16.mxu0 %v5766_v41  ;;  %4187 = vmatprep.subr.bf16.mxu1 %v5769_v42  ;;  %v5812_v41 = vld [vmem:[#allocation8 + $0x980] ss:$16 sps:$4 sm:$0xff]   ;;  %v306_v42 = vrot.slane %v305_v35, 1 }
 0x1c7   :  { %3860 = vmatpush1.bf16.msra.mxu0 %v5764_v43  ;;  %4188 = vmatpush1.bf16.msra.mxu1 %v5767_v44  ;;  %v418_v43 = vrot.slane %v417_v36, 1  ;;  %v5815_v44 = vld [vmem:[#allocation8 + $0x988] ss:$16 sps:$4 sm:$0xff]  }
 0x1c8   :  { %3861 = vmatprep.subr.bf16.mxu0 %v5772_v45  ;;  %4189 = vmatprep.subr.bf16.mxu1 %v5775_v46  ;;  %v5820_v45 = vld [vmem:[#allocation8 + $0x9a4] ss:$16 sps:$4 sm:$0xff]   ;;  %v286_v46 = vadd.f32 %v285_v38, %v284_v30  ;;  %v5871_v30 = vld [vmem:[#allocation8 + $0xaac] ss:$16 sps:$4 sm:$0xff]  }
 0x1c9   :  { %v419_v51 = vadd.f32 %v418_v43, %v417_v36  ;;  %v186_v36 = vld [vmem:[#allocation3 + $0xd0] sm:$0xff] }
 0x1ca   :  { %v456_v54 = vpack.c.bf16 %v286_v46, %v286_v46  ;;  %v218_v38 = vld [vmem:[#allocation3 + $0x1d0] sm:$0xff]  ;;  %v221_v46 = vld [vmem:[#allocation3 + $0x1e8] sm:$0xff] }
 0x1cb   :  { %3862 = vmatpush1.bf16.msra.mxu0 %v5770_v47  ;;  %4190 = vmatpush1.bf16.msra.mxu1 %v5773_v48  ;;  %v398_v47 = vadd.f32 %v397_v39, %v396_v31  ;;  %v5823_v48 = vld [vmem:[#allocation8 + $0x9ac] ss:$16 sps:$4 sm:$0xff]   ;;  %v5866_v31 = vld [vmem:[#allocation8 + $0xaa0] ss:$16 sps:$4 sm:$0xff]  }
 0x1cc   :  { %3863 = vmatprep.subr.bf16.mxu0 %v5778_v49  ;;  %4191 = vmatprep.subr.bf16.mxu1 %v5781_v50  ;;  %v5818_v49 = vld [vmem:[#allocation8 + $0x9a0] ss:$16 sps:$4 sm:$0xff]   ;;  %v307_v50 = vadd.f32 %v306_v42, %v305_v35  ;;  %v1054_v61 = vunpack.c.l.b16 %v456_v54 }
 0x1cd   :  { %v170_v35 = vld [vmem:[#allocation3 + $0x50] sm:$0xff]  ;;  %v189_v42 = vld [vmem:[#allocation3 + $0xe8] sm:$0xff] }
 0x1ce   :  { %v5872_v39 = vld [vmem:[#allocation8 + $0xac0] ss:$16 sps:$4 sm:$0xff]   ;;  %v294_v43 = vadd.f32 %v186_v36, %v170_v35  ;;  %v5917_v36 = vld [vmem:[#allocation8 + $0xba8] ss:$16 sps:$4 sm:$0xff]  }
 0x1cf   :  { %3864 = vmatpush1.bf16.msra.mxu0 %v5776_v55  ;;  %4192 = vmatpush1.bf16.msra.mxu1 %v5779_v56  ;;  %v472_v55 = vpack.c.bf16 %v398_v47, %v398_v47  ;;  %v5829_v56 = vld [vmem:[#allocation8 + $0x9cc] ss:$16 sps:$4 sm:$0xff]   ;;  %v5880_v47 = vld [vmem:[#allocation8 + $0xae4] ss:$16 sps:$4 sm:$0xff]   ;;  %v5914_v35 = vld [vmem:[#allocation8 + $0xba0] ss:$16 sps:$4 sm:$0xff]  }
 0x1d0   :  { %3865 = vmatprep.subr.bf16.mxu0 %v5784_v57  ;;  %4193 = vmatprep.subr.bf16.mxu1 %v5787_v58  ;;  %v459_v57 = vpack.c.bf16 %v307_v50, %v307_v50  ;;  %v475_v58 = vpack.c.bf16 %v419_v51, %v419_v51 }
 0x1d1   :  { %v1070_v62 = vunpack.c.l.b16 %v472_v55  ;;  %v5886_v55 = vld [vmem:[#allocation8 + $0xb04] ss:$16 sps:$4 sm:$0xff]  }
 0x1d3   :  { %3866 = vmatpush1.bf16.msra.mxu0 %v5782_v1  ;;  %4194 = vmatpush1.bf16.msra.mxu1 %v5785_v2  ;;  %v1057_v1 = vunpack.c.l.b16 %v459_v57  ;;  %v1073_v2 = vunpack.c.l.b16 %v475_v58 }
 0x1d4   :  { %3867 = vmatprep.subr.bf16.mxu0 %v5790_v5  ;;  %4195 = vmatprep.subr.bf16.mxu1 %v5793_v8  ;;  %v1087_v5 = vsel %vm1078_vm0, %v1070_v62, %v1054_v61 }
 0x1d5   :  { %v1103_v8 = vpack.c.b16 %v1087_v5, %v1087_v5 }
 0x1d7   :  { %3868 = vmatpush1.bf16.msra.mxu0 %v5788_v9  ;;  %4196 = vmatpush1.bf16.msra.mxu1 %v5791_v12  ;;  %v1090_v9 = vsel %vm1078_vm0, %v1073_v2, %v1057_v1  ;;  %v5844_v12 = vld [vmem:[#allocation8 + $0xa24] ss:$16 sps:$4 sm:$0xff]  }
 0x1d8   :  { %3869 = vmatprep.subr.bf16.mxu0 %v5796_v13  ;;  %4197 = vmatprep.subr.bf16.mxu1 %v5799_v16  ;;  %v5847_v13 = vld [vmem:[#allocation8 + $0xa2c] ss:$16 sps:$4 sm:$0xff]   ;;  %v1106_v14 = vpack.c.b16 %v1090_v9, %v1090_v9  ;;  %v5845_v16 = vld [vmem:[#allocation8 + $0xa28] ss:$16 sps:$4 sm:$0xff]  }
 0x1db   :  { %3870 = vmatpush1.bf16.msra.mxu0 %v5794_v17  ;;  %4198 = vmatpush1.bf16.msra.mxu1 %v5797_v18  ;;  %v5850_v17 = vld [vmem:[#allocation8 + $0xa44] ss:$16 sps:$4 sm:$0xff]   ;;  %v5853_v18 = vld [vmem:[#allocation8 + $0xa4c] ss:$16 sps:$4 sm:$0xff]  }
 0x1dc   :  { %3871 = vmatprep.subr.bf16.mxu0 %v5802_v21  ;;  %4199 = vmatprep.subr.bf16.mxu1 %v5805_v24  ;;  %v5856_v21 = vld [vmem:[#allocation8 + $0xa64] ss:$16 sps:$4 sm:$0xff]   ;;  %v5857_v24 = vld [vmem:[#allocation8 + $0xa68] ss:$16 sps:$4 sm:$0xff]  }
 0x1df   :  { %3872 = vmatpush1.bf16.msra.mxu0 %v5800_v25  ;;  %4200 = vmatpush1.bf16.msra.mxu1 %v5803_v28  ;;  %v5862_v25 = vld [vmem:[#allocation8 + $0xa84] ss:$16 sps:$4 sm:$0xff]   ;;  %v5863_v28 = vld [vmem:[#allocation8 + $0xa88] ss:$16 sps:$4 sm:$0xff]  }
 0x1e0   :  { %3873 = vmatprep.subr.bf16.mxu0 %v5808_v29  ;;  %4201 = vmatprep.subr.bf16.mxu1 %v5811_v32  ;;  %v5868_v29 = vld [vmem:[#allocation8 + $0xaa4] ss:$16 sps:$4 sm:$0xff]   ;;  %v5869_v32 = vld [vmem:[#allocation8 + $0xaa8] ss:$16 sps:$4 sm:$0xff]  }
 0x1e3   :  { %3874 = vmatpush1.bf16.msra.mxu0 %v5806_v33  ;;  %4202 = vmatpush1.bf16.msra.mxu1 %v5809_v34  ;;  %v5874_v33 = vld [vmem:[#allocation8 + $0xac4] ss:$16 sps:$4 sm:$0xff]   ;;  %v5877_v34 = vld [vmem:[#allocation8 + $0xacc] ss:$16 sps:$4 sm:$0xff]  }
 0x1e4   :  { %3875 = vmatprep.subr.bf16.mxu0 %v5814_v37  ;;  %4203 = vmatprep.subr.bf16.mxu1 %v5817_v40  ;;  %v202_v37 = vld [vmem:[#allocation3 + $0x150] sm:$0xff] }
 0x1e5   :  { %v5875_v40 = vld [vmem:[#allocation8 + $0xac8] ss:$16 sps:$4 sm:$0xff]  }
 0x1e7   :  { %3876 = vmatpush1.bf16.msra.mxu0 %v5812_v41  ;;  %4204 = vmatpush1.bf16.msra.mxu1 %v5815_v44  ;;  %v173_v41 = vld [vmem:[#allocation3 + $0x68] sm:$0xff]  ;;  %v406_v44 = vadd.f32 %v218_v38, %v202_v37 }
 0x1e8   :  { %3877 = vmatprep.subr.bf16.mxu0 %v5820_v45  ;;  %4205 = vmatprep.subr.bf16.mxu1 %v5823_v48  ;;  %v205_v45 = vld [vmem:[#allocation3 + $0x168] sm:$0xff]  ;;  %v315_v50 = vadd.f32 %v189_v42, %v173_v41 }
 0x1e9   :  { %v5883_v48 = vld [vmem:[#allocation8 + $0xaec] ss:$16 sps:$4 sm:$0xff]   ;;  %v427_v51 = vadd.f32 %v221_v46, %v205_v45  ;;  %v407_v54 = vrot.slane %v406_v44, 4 }
 0x1ea   :  { %v316_v57 = vrot.slane %v315_v50, 4 }
 0x1eb   :  { %3878 = vmatpush1.bf16.msra.mxu0 %v5818_v49  ;;  %4206 = vmatpush1.bf16.msra.mxu1 %v5821_v52  ;;  %v5878_v49 = vld [vmem:[#allocation8 + $0xae0] ss:$16 sps:$4 sm:$0xff]   ;;  %v5881_v52 = vld [vmem:[#allocation8 + $0xae8] ss:$16 sps:$4 sm:$0xff]   ;;  %v428_v58 = vrot.slane %v427_v51, 4  ;;  %v408_v62 = vadd.f32 %v407_v54, %v406_v44 }
 0x1ec   :  { %3879 = vmatprep.subr.bf16.mxu0 %v5826_v53  ;;  %4207 = vmatprep.subr.bf16.mxu1 %v5829_v56  ;;  %v295_v53 = vrot.slane %v294_v43, 4  ;;  %v5889_v56 = vld [vmem:[#allocation8 + $0xb0c] ss:$16 sps:$4 sm:$0xff]   ;;  %v317_v1 = vadd.f32 %v316_v57, %v315_v50  ;;  %v5923_v44 = vld [vmem:[#allocation8 + $0xbc8] ss:$16 sps:$4 sm:$0xff]  }
 0x1ed   :  { %v429_v2 = vadd.f32 %v428_v58, %v427_v51  ;;  %v5926_v51 = vld [vmem:[#allocation8 + $0xbe0] ss:$16 sps:$4 sm:$0xff]   ;;  %v5934_v54 = vld [vmem:[#allocation8 + $0xc04] ss:$16 sps:$4 sm:$0xff]  }
 0x1ee   :  { %v296_v61 = vadd.f32 %v295_v53, %v294_v43  ;;  %v318_v9 = vrot.slane %v317_v1, 2  ;;  %v5920_v43 = vld [vmem:[#allocation8 + $0xbc0] ss:$16 sps:$4 sm:$0xff]  }
 0x1ef   :  { %3880 = vmatpush1.bf16.msra.mxu0 %v5824_v59  ;;  %4208 = vmatpush1.bf16.msra.mxu1 %v5827_v60  ;;  %v5884_v59 = vld [vmem:[#allocation8 + $0xb00] ss:$16 sps:$4 sm:$0xff]   ;;  %v5887_v60 = vld [vmem:[#allocation8 + $0xb08] ss:$16 sps:$4 sm:$0xff]  }
 0x1f0   :  { %3881 = vmatprep.subr.bf16.mxu0 %v5832_v63  ;;  %4209 = vmatprep.subr.bf16.mxu1 %v5835_v0  ;;  %v5892_v63 = vld [vmem:[#allocation8 + $0xb24] ss:$16 sps:$4 sm:$0xff]   ;;  %v5895_v0 = vld [vmem:[#allocation8 + $0xb2c] ss:$16 sps:$4 sm:$0xff]   ;;  %v297_v5 = vrot.slane %v296_v61, 2 }
 0x1f1   :  { %v5932_v58 = vld [vmem:[#allocation8 + $0xc00] ss:$16 sps:$4 sm:$0xff]  }
 0x1f3   :  { %3882 = vmatpush1.bf16.msra.mxu0 %v5830_v3  ;;  %4210 = vmatpush1.bf16.msra.mxu1 %v5833_v4  ;;  %v5890_v3 = vld [vmem:[#allocation8 + $0xb20] ss:$16 sps:$4 sm:$0xff]   ;;  %v5893_v4 = vld [vmem:[#allocation8 + $0xb28] ss:$16 sps:$4 sm:$0xff]  }
 0x1f4   :  { %3892 = vmatprep.subr.bf16.mxu0 %v5838_v6  ;;  %4220 = vmatprep.subr.bf16.mxu1 %v5841_v7  ;;  %v409_v6 = vrot.slane %v408_v62, 2  ;;  %v5898_v7 = vld [vmem:[#allocation8 + $0xb44] ss:$16 sps:$4 sm:$0xff]  }
 0x1f6   :  { %3884 = vmatmul.mubr.bf16.vlgmr.msra.gmra.mrb[0].mxu0 %v1103_v8  ;;  %4212 = vmatmul.mubr.bf16.vlgmr.msra.gmra.mrb[0].mxu1 %v1103_v8  ;;  %v5901_v8 = vld [vmem:[#allocation8 + $0xb4c] ss:$16 sps:$4 sm:$0xff]  }
 0x1f7   :  { %3893 = vmatpush1.bf16.msra.mxu0 %v5836_v10  ;;  %4221 = vmatpush1.bf16.msra.mxu1 %v5839_v11  ;;  %v430_v10 = vrot.slane %v429_v2, 2  ;;  %v5896_v11 = vld [vmem:[#allocation8 + $0xb40] ss:$16 sps:$4 sm:$0xff]  }
 0x1f8   :  { %3894 = vmatprep.subr.bf16.mxu0 %v5844_v12  ;;  %4222 = vmatprep.subr.bf16.mxu1 %v5847_v13  ;;  %v5899_v12 = vld [vmem:[#allocation8 + $0xb48] ss:$16 sps:$4 sm:$0xff]   ;;  %v298_v13 = vadd.f32 %v297_v5, %v296_v61  ;;  %v5943_v61 = vld [vmem:[#allocation8 + $0xc2c] ss:$16 sps:$4 sm:$0xff]   ;;  %v6371_v5 = vmov 2  }
 0x1f9   :  { %3924 = vmatprep.mubr.bf16.mxu0 %v1106_v14  ;;  %4252 = vmatprep.mubr.bf16.mxu1 %v1106_v14  ;;  %v410_v14 = vadd.f32 %v409_v6, %v408_v62  ;;  %v5944_v6 = vld [vmem:[#allocation8 + $0xc40] ss:$16 sps:$4 sm:$0xff]  }
 0x1fa   :  { %5353 = vset.pattern.permute.xlu1 %v6371_v5  ;;  %v6003_v5 = vld [vmem:[#allocation8 + $0xd6c] ss:$16 sps:$4 sm:$0xff]  }
 0x1fb   :  { %3895 = vmatpush1.bf16.msra.mxu0 %v5842_v15  ;;  %4223 = vmatpush1.bf16.msra.mxu1 %v5845_v16  ;;  %v5904_v15 = vld [vmem:[#allocation8 + $0xb64] ss:$16 sps:$4 sm:$0xff]   ;;  %v5907_v16 = vld [vmem:[#allocation8 + $0xb6c] ss:$16 sps:$4 sm:$0xff]  }
 0x1fc   :  { %3896 = vmatprep.subr.bf16.mxu0 %v5850_v17  ;;  %4224 = vmatprep.subr.bf16.mxu1 %v5853_v18  ;;  %v319_v17 = vadd.f32 %v318_v9, %v317_v1  ;;  %v431_v18 = vadd.f32 %v430_v10, %v429_v2  ;;  %v5946_v1 = vld [vmem:[#allocation8 + $0xc44] ss:$16 sps:$4 sm:$0xff]   ;;  %v5949_v2 = vld [vmem:[#allocation8 + $0xc4c] ss:$16 sps:$4 sm:$0xff]   ;;  %v5950_v10 = vld [vmem:[#allocation8 + $0xc60] ss:$16 sps:$4 sm:$0xff]  }
 0x1fd   :  { %v5955_v9 = vld [vmem:[#allocation8 + $0xc6c] ss:$16 sps:$4 sm:$0xff]  }
 0x1ff   :  { %3897 = vmatpush1.bf16.msra.mxu0 %v5848_v19  ;;  %4225 = vmatpush1.bf16.msra.mxu1 %v5851_v20  ;;  %v5902_v19 = vld [vmem:[#allocation8 + $0xb60] ss:$16 sps:$4 sm:$0xff]   ;;  %v5905_v20 = vld [vmem:[#allocation8 + $0xb68] ss:$16 sps:$4 sm:$0xff]  }
 0x200   :  { %3898 = vmatprep.subr.bf16.mxu0 %v5856_v21  ;;  %4226 = vmatprep.subr.bf16.mxu1 %v5859_v22  ;;  %v299_v21 = vrot.slane %v298_v13, 1  ;;  %v411_v22 = vrot.slane %v410_v14, 1 }
 0x203   :  { %3899 = vmatpush1.bf16.msra.mxu0 %v5854_v23  ;;  %4227 = vmatpush1.bf16.msra.mxu1 %v5857_v24  ;;  %v5910_v23 = vld [vmem:[#allocation8 + $0xb84] ss:$16 sps:$4 sm:$0xff]   ;;  %v5913_v24 = vld [vmem:[#allocation8 + $0xb8c] ss:$16 sps:$4 sm:$0xff]  }
 0x204   :  { %3900 = vmatprep.subr.bf16.mxu0 %v5862_v25  ;;  %4228 = vmatprep.subr.bf16.mxu1 %v5865_v26  ;;  %v320_v25 = vrot.slane %v319_v17, 1  ;;  %v432_v26 = vrot.slane %v431_v18, 1 }
 0x207   :  { %3901 = vmatpush1.bf16.msra.mxu0 %v5860_v27  ;;  %4229 = vmatpush1.bf16.msra.mxu1 %v5863_v28  ;;  %v5908_v27 = vld [vmem:[#allocation8 + $0xb80] ss:$16 sps:$4 sm:$0xff]   ;;  %v5911_v28 = vld [vmem:[#allocation8 + $0xb88] ss:$16 sps:$4 sm:$0xff]  }
 0x208   :  { %3902 = vmatprep.subr.bf16.mxu0 %v5868_v29  ;;  %4230 = vmatprep.subr.bf16.mxu1 %v5871_v30  ;;  %v300_v29 = vadd.f32 %v299_v21, %v298_v13  ;;  %v412_v30 = vadd.f32 %v411_v22, %v410_v14  ;;  %v5961_v13 = vld [vmem:[#allocation8 + $0xc8c] ss:$16 sps:$4 sm:$0xff]   ;;  %v6372_v14 = vmov 1   ;;  %v5965_v21 = vld [vmem:[#allocation8 + $0xca8] ss:$16 sps:$4 sm:$0xff]  }
 0x209   :  { %v5970_v22 = vld [vmem:[#allocation8 + $0xcc4] ss:$16 sps:$4 sm:$0xff]  }
 0x20a   :  { %v458_v37 = vpack.c.bf16 %v300_v29, %v300_v29  ;;  %v474_v38 = vpack.c.bf16 %v412_v30, %v412_v30  ;;  %v5971_v29 = vld [vmem:[#allocation8 + $0xcc8] ss:$16 sps:$4 sm:$0xff]  }
 0x20b   :  { %3903 = vmatpush1.bf16.msra.mxu0 %v5866_v31  ;;  %4231 = vmatpush1.bf16.msra.mxu1 %v5869_v32  ;;  %v5916_v31 = vld [vmem:[#allocation8 + $0xba4] ss:$16 sps:$4 sm:$0xff]   ;;  %v5919_v32 = vld [vmem:[#allocation8 + $0xbac] ss:$16 sps:$4 sm:$0xff]  }
 0x20c   :  { %3904 = vmatprep.subr.bf16.mxu0 %v5874_v33  ;;  %4232 = vmatprep.subr.bf16.mxu1 %v5877_v34  ;;  %v321_v33 = vadd.f32 %v320_v25, %v319_v17  ;;  %v433_v34 = vadd.f32 %v432_v26, %v431_v18  ;;  %v1056_v45 = vunpack.c.l.b16 %v458_v37  ;;  %v1072_v46 = vunpack.c.l.b16 %v474_v38  ;;  %v5959_v17 = vld [vmem:[#allocation8 + $0xc88] ss:$16 sps:$4 sm:$0xff]   ;;  %v5964_v18 = vld [vmem:[#allocation8 + $0xca4] ss:$16 sps:$4 sm:$0xff]   ;;  %v5979_v37 = vld [vmem:[#allocation8 + $0xcec] ss:$16 sps:$4 sm:$0xff]  }
 0x20d   :  { %v188_v25 = vld [vmem:[#allocation3 + $0xe0] sm:$0xff]  ;;  %v175_v30 = vld [vmem:[#allocation3 + $0x78] sm:$0xff] }
 0x20e   :  { %v461_v41 = vpack.c.bf16 %v321_v33, %v321_v33  ;;  %v477_v42 = vpack.c.bf16 %v433_v34, %v433_v34  ;;  %v1089_v53 = vsel %vm1078_vm0, %v1072_v46, %v1056_v45  ;;  %v204_v26 = vld [vmem:[#allocation3 + $0x160] sm:$0xff]  ;;  %v191_v33 = vld [vmem:[#allocation3 + $0xf8] sm:$0xff] }
 0x20f   :  { %3905 = vmatpush1.bf16.msra.mxu0 %v5872_v39  ;;  %4233 = vmatpush1.bf16.msra.mxu1 %v5875_v40  ;;  %v5922_v39 = vld [vmem:[#allocation8 + $0xbc4] ss:$16 sps:$4 sm:$0xff]   ;;  %v5925_v40 = vld [vmem:[#allocation8 + $0xbcc] ss:$16 sps:$4 sm:$0xff]   ;;  %v329_v38 = vadd.f32 %v191_v33, %v175_v30  ;;  %v6019_v33 = vld [vmem:[#allocation8 + $0xdc8] ss:$16 sps:$4 sm:$0xff]  }
 0x210   :  { %3906 = vmatprep.subr.bf16.mxu0 %v5880_v47  ;;  %4234 = vmatprep.subr.bf16.mxu1 %v5883_v48  ;;  %v5928_v47 = vld [vmem:[#allocation8 + $0xbe4] ss:$16 sps:$4 sm:$0xff]   ;;  %v5931_v48 = vld [vmem:[#allocation8 + $0xbec] ss:$16 sps:$4 sm:$0xff]   ;;  %v1075_v50 = vunpack.c.l.b16 %v477_v42 }
 0x211   :  { %v207_v34 = vld [vmem:[#allocation3 + $0x178] sm:$0xff]  ;;  %v330_v46 = vrot.slane %v329_v38, 4 }
 0x212   :  { %v5985_v45 = vld [vmem:[#allocation8 + $0xd0c] ss:$16 sps:$4 sm:$0xff]  }
 0x213   :  { %3907 = vmatpush1.bf16.msra.mxu0 %v5878_v49  ;;  %4235 = vmatpush1.bf16.msra.mxu1 %v5881_v52  ;;  %v1059_v49 = vunpack.c.l.b16 %v461_v41  ;;  %v5929_v52 = vld [vmem:[#allocation8 + $0xbe8] ss:$16 sps:$4 sm:$0xff]  }
 0x214   :  { %3908 = vmatprep.subr.bf16.mxu0 %v5886_v55  ;;  %4236 = vmatprep.subr.bf16.mxu1 %v5889_v56  ;;  %v5937_v55 = vld [vmem:[#allocation8 + $0xc0c] ss:$16 sps:$4 sm:$0xff]   ;;  %v1105_v56 = vpack.c.b16 %v1089_v53, %v1089_v53  ;;  %v5977_v41 = vld [vmem:[#allocation8 + $0xce8] ss:$16 sps:$4 sm:$0xff]  }
 0x215   :  { %v1092_v57 = vsel %vm1078_vm0, %v1075_v50, %v1059_v49  ;;  %v5983_v49 = vld [vmem:[#allocation8 + $0xd08] ss:$16 sps:$4 sm:$0xff]   ;;  %v5991_v53 = vld [vmem:[#allocation8 + $0xd2c] ss:$16 sps:$4 sm:$0xff]  }
 0x216   :  { %v1108_v62 = vpack.c.b16 %v1092_v57, %v1092_v57  ;;  %v5989_v57 = vld [vmem:[#allocation8 + $0xd28] ss:$16 sps:$4 sm:$0xff]  }
 0x217   :  { %3909 = vmatpush1.bf16.msra.mxu0 %v5884_v59  ;;  %4237 = vmatpush1.bf16.msra.mxu1 %v5887_v60  ;;  %v5935_v59 = vld [vmem:[#allocation8 + $0xc08] ss:$16 sps:$4 sm:$0xff]   ;;  %v5940_v60 = vld [vmem:[#allocation8 + $0xc24] ss:$16 sps:$4 sm:$0xff]  }
 0x218   :  { %3910 = vmatprep.subr.bf16.mxu0 %v5892_v63  ;;  %4238 = vmatprep.subr.bf16.mxu1 %v5895_v0  ;;  %v5938_v63 = vld [vmem:[#allocation8 + $0xc20] ss:$16 sps:$4 sm:$0xff]   ;;  %v5941_v0 = vld [vmem:[#allocation8 + $0xc28] ss:$16 sps:$4 sm:$0xff]  }
 0x21b   :  { %3911 = vmatpush1.bf16.msra.mxu0 %v5890_v3  ;;  %4239 = vmatpush1.bf16.msra.mxu1 %v5893_v4  ;;  %v6370_v3 = vmov 0   ;;  %v4343_v4 = vld [vmem:[#allocation7] sm:$0x3] }
 0x21c   :  { %3912 = vmatprep.subr.bf16.mxu0 %v5898_v7  ;;  %4240 = vmatprep.subr.bf16.mxu1 %v5901_v8  ;;  %v5947_v7 = vld [vmem:[#allocation8 + $0xc48] ss:$16 sps:$4 sm:$0xff]   ;;  %v5952_v8 = vld [vmem:[#allocation8 + $0xc64] ss:$16 sps:$4 sm:$0xff]  }
 0x21d   :  { %5351 = vset.pattern.permute.xlu0 %v6370_v3  ;;  %4442 = vperm.xlu1 %5353, %v4343_v4  }
 0x21e   :  { %4348 = vperm.xlu0 %5351, %v4343_v4  }
 0x21f   :  { %3913 = vmatpush1.bf16.msra.mxu0 %v5896_v11  ;;  %4241 = vmatpush1.bf16.msra.mxu1 %v5899_v12  ;;  %v5953_v11 = vld [vmem:[#allocation8 + $0xc68] ss:$16 sps:$4 sm:$0xff]   ;;  %v5958_v12 = vld [vmem:[#allocation8 + $0xc84] ss:$16 sps:$4 sm:$0xff]  }
 0x220   :  { %3914 = vmatprep.subr.bf16.mxu0 %v5904_v15  ;;  %4242 = vmatprep.subr.bf16.mxu1 %v5907_v16  ;;  %v6373_v15 = vmov 3   ;;  %v5956_v16 = vld [vmem:[#allocation8 + $0xc80] ss:$16 sps:$4 sm:$0xff]  }
 0x221   :  { %5354 = vset.pattern.permute.xlu1 %v6373_v15 }
 0x222   :  { %5352 = vset.pattern.permute.xlu0 %v6372_v14  ;;  %4490 = vperm.xlu1 %5354, %v4343_v4  }
 0x223   :  { %3915 = vmatpush1.bf16.msra.mxu0 %v5902_v19  ;;  %4243 = vmatpush1.bf16.msra.mxu1 %v5905_v20  ;;  %v5967_v19 = vld [vmem:[#allocation8 + $0xcac] ss:$16 sps:$4 sm:$0xff]   ;;  %v5962_v20 = vld [vmem:[#allocation8 + $0xca0] ss:$16 sps:$4 sm:$0xff]  }
 0x224   :  { %3916 = vmatprep.subr.bf16.mxu0 %v5910_v23  ;;  %4244 = vmatprep.subr.bf16.mxu1 %v5913_v24  ;;  %v5973_v23 = vld [vmem:[#allocation8 + $0xccc] ss:$16 sps:$4 sm:$0xff]   ;;  %v172_v24 = vld [vmem:[#allocation3 + $0x60] sm:$0xff] }
 0x225   :  { %4394 = vperm.xlu0 %5352, %v4343_v4   ;;  %v6000_v4 = vld [vmem:[#allocation8 + $0xd64] ss:$16 sps:$4 sm:$0xff]  }
 0x227   :  { %3917 = vmatpush1.bf16.msra.mxu0 %v5908_v27  ;;  %4245 = vmatpush1.bf16.msra.mxu1 %v5911_v28  ;;  %v220_v27 = vld [vmem:[#allocation3 + $0x1e0] sm:$0xff] }
 0x228   :  { %3918 = vmatprep.subr.bf16.mxu0 %v5916_v31  ;;  %4246 = vmatprep.subr.bf16.mxu1 %v5919_v32  ;;  %v5968_v28 = vld [vmem:[#allocation8 + $0xcc0] ss:$16 sps:$4 sm:$0xff]   ;;  %v308_v31 = vadd.f32 %v188_v25, %v172_v24  ;;  %v420_v32 = vadd.f32 %v220_v27, %v204_v26  ;;  %v6013_v25 = vld [vmem:[#allocation8 + $0xda8] ss:$16 sps:$4 sm:$0xff]  }
 0x229   :  { %5355 = vset.pattern.permute.xlu0 %v6373_v15  ;;  %v6010_v24 = vld [vmem:[#allocation8 + $0xda0] ss:$16 sps:$4 sm:$0xff]  }
 0x22a   :  { %v309_v42 = vrot.slane %v308_v31, 4 }
 0x22b   :  { %3919 = vmatpush1.bf16.msra.mxu0 %v5914_v35  ;;  %4247 = vmatpush1.bf16.msra.mxu1 %v5917_v36  ;;  %v223_v35 = vld [vmem:[#allocation3 + $0x1f8] sm:$0xff]  ;;  %v5976_v36 = vld [vmem:[#allocation8 + $0xce4] ss:$16 sps:$4 sm:$0xff]  }
 0x22c   :  { %3920 = vmatprep.subr.bf16.mxu0 %v5922_v39  ;;  %4248 = vmatprep.subr.bf16.mxu1 %v5925_v40  ;;  %v441_v39 = vadd.f32 %v223_v35, %v207_v34  ;;  %v5974_v40 = vld [vmem:[#allocation8 + $0xce0] ss:$16 sps:$4 sm:$0xff]   ;;  %v310_v50 = vadd.f32 %v309_v42, %v308_v31 }
 0x22f   :  { %3921 = vmatpush1.bf16.msra.mxu0 %v5920_v43  ;;  %4249 = vmatpush1.bf16.msra.mxu1 %v5923_v44  ;;  %v421_v43 = vrot.slane %v420_v32, 4  ;;  %v5982_v44 = vld [vmem:[#allocation8 + $0xd04] ss:$16 sps:$4 sm:$0xff]  }
 0x230   :  { %3922 = vmatprep.subr.bf16.mxu0 %v5928_v47  ;;  %4250 = vmatprep.subr.bf16.mxu1 %v5931_v48  ;;  %v442_v47 = vrot.slane %v441_v39, 4  ;;  %v5980_v48 = vld [vmem:[#allocation8 + $0xd00] ss:$16 sps:$4 sm:$0xff]  }
 0x233   :  { %3923 = vmatpush1.bf16.msra.mxu0 %v5926_v51  ;;  %4251 = vmatpush1.bf16.msra.mxu1 %v5929_v52  ;;  %v422_v51 = vadd.f32 %v421_v43, %v420_v32  ;;  %v5988_v52 = vld [vmem:[#allocation8 + $0xd24] ss:$16 sps:$4 sm:$0xff]   ;;  %v6016_v32 = vld [vmem:[#allocation8 + $0xdc0] ss:$16 sps:$4 sm:$0xff]  }
 0x234   :  { %3933 = vmatprep.subr.bf16.mxu0 %v5934_v54  ;;  %4261 = vmatprep.subr.bf16.mxu1 %v5937_v55  ;;  %v331_v54 = vadd.f32 %v330_v46, %v329_v38  ;;  %v443_v55 = vadd.f32 %v442_v47, %v441_v39  ;;  %v6030_v43 = vld [vmem:[#allocation8 + $0xe04] ss:$16 sps:$4 sm:$0xff]   ;;  %v6028_v47 = vld [vmem:[#allocation8 + $0xe00] ss:$16 sps:$4 sm:$0xff]  }
 0x236   :  { %3925 = vmatmul.mubr.bf16.vlgmr.msra.gmra.mrb[0].mxu0 %v1105_v56  ;;  %4253 = vmatmul.mubr.bf16.vlgmr.msra.gmra.mrb[0].mxu1 %v1105_v56  ;;  %v5986_v56 = vld [vmem:[#allocation8 + $0xd20] ss:$16 sps:$4 sm:$0xff]  }
 0x237   :  { %3934 = vmatpush1.bf16.msra.mxu0 %v5932_v58  ;;  %4262 = vmatpush1.bf16.msra.mxu1 %v5935_v59  ;;  %v311_v58 = vrot.slane %v310_v50, 2  ;;  %v423_v59 = vrot.slane %v422_v51, 2 }
 0x238   :  { %3935 = vmatprep.subr.bf16.mxu0 %v5940_v60  ;;  %4263 = vmatprep.subr.bf16.mxu1 %v5943_v61  ;;  %v5994_v60 = vld [vmem:[#allocation8 + $0xd44] ss:$16 sps:$4 sm:$0xff]   ;;  %v5997_v61 = vld [vmem:[#allocation8 + $0xd4c] ss:$16 sps:$4 sm:$0xff]  }
 0x239   :  { %3965 = vmatprep.mubr.bf16.mxu0 %v1108_v62  ;;  %4293 = vmatprep.mubr.bf16.mxu1 %v1108_v62  ;;  %v332_v62 = vrot.slane %v331_v54, 2  ;;  %v424_v3 = vadd.f32 %v423_v59, %v422_v51  ;;  %v6051_v59 = vld [vmem:[#allocation8 + $0xe6c] ss:$16 sps:$4 sm:$0xff]  }
 0x23b   :  { %3936 = vmatpush1.bf16.msra.mxu0 %v5938_v63  ;;  %4264 = vmatpush1.bf16.msra.mxu1 %v5941_v0  ;;  %v444_v63 = vrot.slane %v443_v55, 2  ;;  %v5992_v0 = vld [vmem:[#allocation8 + $0xd40] ss:$16 sps:$4 sm:$0xff]  }
 0x23c   :  { %3937 = vmatprep.subr.bf16.mxu0 %v5946_v1  ;;  %4265 = vmatprep.subr.bf16.mxu1 %v5949_v2  ;;  %v5995_v1 = vld [vmem:[#allocation8 + $0xd48] ss:$16 sps:$4 sm:$0xff]   ;;  %v312_v2 = vadd.f32 %v311_v58, %v310_v50  ;;  %v6039_v50 = vld [vmem:[#allocation8 + $0xe2c] ss:$16 sps:$4 sm:$0xff]   ;;  %v6048_v58 = vld [vmem:[#allocation8 + $0xe64] ss:$16 sps:$4 sm:$0xff]  }
 0x23f   :  { %3938 = vmatpush1.bf16.msra.mxu0 %v5944_v6  ;;  %4266 = vmatpush1.bf16.msra.mxu1 %v5947_v7  ;;  %v333_v6 = vadd.f32 %v332_v62, %v331_v54  ;;  %v445_v7 = vadd.f32 %v444_v63, %v443_v55  ;;  %v6042_v54 = vld [vmem:[#allocation8 + $0xe44] ss:$16 sps:$4 sm:$0xff]   ;;  %v6045_v55 = vld [vmem:[#allocation8 + $0xe4c] ss:$16 sps:$4 sm:$0xff]  }
 0x240   :  { %3939 = vmatprep.subr.bf16.mxu0 %v5952_v8  ;;  %4267 = vmatprep.subr.bf16.mxu1 %v5955_v9  ;;  %v5998_v8 = vld [vmem:[#allocation8 + $0xd60] ss:$16 sps:$4 sm:$0xff]   ;;  %v6001_v9 = vld [vmem:[#allocation8 + $0xd68] ss:$16 sps:$4 sm:$0xff]   ;;  %v6054_v62 = vld [vmem:[#allocation8 + $0xe84] ss:$16 sps:$4 sm:$0xff]  }
 0x241   :  { %v334_v14 = vrot.slane %v333_v6, 1  ;;  %v446_v15 = vrot.slane %v445_v7, 1  ;;  %v6057_v63 = vld [vmem:[#allocation8 + $0xe8c] ss:$16 sps:$4 sm:$0xff]  }
 0x243   :  { %3940 = vmatpush1.bf16.msra.mxu0 %v5950_v10  ;;  %4268 = vmatpush1.bf16.msra.mxu1 %v5953_v11  ;;  %v313_v10 = vrot.slane %v312_v2, 1  ;;  %v425_v11 = vrot.slane %v424_v3, 1 }
 0x244   :  { %3941 = vmatprep.subr.bf16.mxu0 %v5958_v12  ;;  %4269 = vmatprep.subr.bf16.mxu1 %v5961_v13  ;;  %v6006_v12 = vld [vmem:[#allocation8 + $0xd84] ss:$16 sps:$4 sm:$0xff]   ;;  %v6009_v13 = vld [vmem:[#allocation8 + $0xd8c] ss:$16 sps:$4 sm:$0xff]  }
 0x247   :  { %3942 = vmatpush1.bf16.msra.mxu0 %v5956_v16  ;;  %4270 = vmatpush1.bf16.msra.mxu1 %v5959_v17  ;;  %v6004_v16 = vld [vmem:[#allocation8 + $0xd80] ss:$16 sps:$4 sm:$0xff]   ;;  %v6007_v17 = vld [vmem:[#allocation8 + $0xd88] ss:$16 sps:$4 sm:$0xff]  }
 0x248   :  { %3943 = vmatprep.subr.bf16.mxu0 %v5964_v18  ;;  %4271 = vmatprep.subr.bf16.mxu1 %v5967_v19  ;;  %v314_v18 = vadd.f32 %v313_v10, %v312_v2  ;;  %v426_v19 = vadd.f32 %v425_v11, %v424_v3  ;;  %v6060_v2 = vld [vmem:[#allocation8 + $0xea4] ss:$16 sps:$4 sm:$0xff]   ;;  %v6063_v3 = vld [vmem:[#allocation8 + $0xeac] ss:$16 sps:$4 sm:$0xff]  }
 0x249   :  { %v206_v10 = vld [vmem:[#allocation3 + $0x170] sm:$0xff] }
 0x24a   :  { %v460_v26 = vpack.c.bf16 %v314_v18, %v314_v18  ;;  %v476_v27 = vpack.c.bf16 %v426_v19, %v426_v19  ;;  %v222_v11 = vld [vmem:[#allocation3 + $0x1f0] sm:$0xff] }
 0x24b   :  { %3944 = vmatpush1.bf16.msra.mxu0 %v5962_v20  ;;  %4272 = vmatpush1.bf16.msra.mxu1 %v5965_v21  ;;  %v6012_v20 = vld [vmem:[#allocation8 + $0xda4] ss:$16 sps:$4 sm:$0xff]   ;;  %v6015_v21 = vld [vmem:[#allocation8 + $0xdac] ss:$16 sps:$4 sm:$0xff]   ;;  %v6070_v18 = vld [vmem:[#allocation8 + $0xee0] ss:$16 sps:$4 sm:$0xff]  }
 0x24c   :  { %3945 = vmatprep.subr.bf16.mxu0 %v5970_v22  ;;  %4273 = vmatprep.subr.bf16.mxu1 %v5973_v23  ;;  %v335_v22 = vadd.f32 %v334_v14, %v333_v6  ;;  %v447_v23 = vadd.f32 %v446_v15, %v445_v7  ;;  %v1058_v34 = vunpack.c.l.b16 %v460_v26  ;;  %v1074_v35 = vunpack.c.l.b16 %v476_v27  ;;  %v6066_v6 = vld [vmem:[#allocation8 + $0xec4] ss:$16 sps:$4 sm:$0xff]   ;;  %v6069_v7 = vld [vmem:[#allocation8 + $0xecc] ss:$16 sps:$4 sm:$0xff]   ;;  %v6073_v19 = vld [vmem:[#allocation8 + $0xee8] ss:$16 sps:$4 sm:$0xff]  }
 0x24d   :  { %v434_v15 = vadd.f32 %v222_v11, %v206_v10  ;;  %v6585_v11 = vld [vmem:[#allocation11 + $0x8] sm:$0xff] }
 0x24e   :  { %v463_v30 = vpack.c.bf16 %v335_v22, %v335_v22  ;;  %v479_v31 = vpack.c.bf16 %v447_v23, %v447_v23  ;;  %v1091_v42 = vsel %vm1078_vm0, %v1074_v35, %v1058_v34  ;;  %v6078_v22 = vld [vmem:[#allocation8 + $0xf04] ss:$16 sps:$4 sm:$0xff]   ;;  %v6081_v23 = vld [vmem:[#allocation8 + $0xf0c] ss:$16 sps:$4 sm:$0xff]  }
 0x24f   :  { %3946 = vmatpush1.bf16.msra.mxu0 %v5968_v28  ;;  %4274 = vmatpush1.bf16.msra.mxu1 %v5971_v29  ;;  %v6018_v28 = vld [vmem:[#allocation8 + $0xdc4] ss:$16 sps:$4 sm:$0xff]   ;;  %v6021_v29 = vld [vmem:[#allocation8 + $0xdcc] ss:$16 sps:$4 sm:$0xff]  }
 0x250   :  { %3947 = vmatprep.subr.bf16.mxu0 %v5976_v36  ;;  %4275 = vmatprep.subr.bf16.mxu1 %v5979_v37  ;;  %v6024_v36 = vld [vmem:[#allocation8 + $0xde4] ss:$16 sps:$4 sm:$0xff]   ;;  %v6027_v37 = vld [vmem:[#allocation8 + $0xdec] ss:$16 sps:$4 sm:$0xff]   ;;  %v1061_v38 = vunpack.c.l.b16 %v463_v30  ;;  %v1077_v39 = vunpack.c.l.b16 %v479_v31  ;;  %v6082_v30 = vld [vmem:[#allocation8 + $0xf20] ss:$16 sps:$4 sm:$0xff]  }
 0x251   :  { %v6085_v31 = vld [vmem:[#allocation8 + $0xf28] ss:$16 sps:$4 sm:$0xff]   ;;  %v6090_v34 = vld [vmem:[#allocation8 + $0xf44] ss:$16 sps:$4 sm:$0xff]   ;;  %v6093_v35 = vld [vmem:[#allocation8 + $0xf4c] ss:$16 sps:$4 sm:$0xff]  }
 0x252   :  { %v1094_v46 = vsel %vm1078_vm0, %v1077_v39, %v1061_v38 }
 0x253   :  { %3948 = vmatpush1.bf16.msra.mxu0 %v5974_v40  ;;  %4276 = vmatpush1.bf16.msra.mxu1 %v5977_v41  ;;  %v6022_v40 = vld [vmem:[#allocation8 + $0xde0] ss:$16 sps:$4 sm:$0xff]   ;;  %v6025_v41 = vld [vmem:[#allocation8 + $0xde8] ss:$16 sps:$4 sm:$0xff]   ;;  %v1110_v51 = vpack.c.b16 %v1094_v46, %v1094_v46  ;;  %v6102_v46 = vld [vmem:[#allocation8 + $0xf84] ss:$16 sps:$4 sm:$0xff]  }
 0x254   :  { %3949 = vmatprep.subr.bf16.mxu0 %v5982_v44  ;;  %4277 = vmatprep.subr.bf16.mxu1 %v5985_v45  ;;  %v6033_v44 = vld [vmem:[#allocation8 + $0xe0c] ss:$16 sps:$4 sm:$0xff]   ;;  %v1107_v45 = vpack.c.b16 %v1091_v42, %v1091_v42  ;;  %v6094_v42 = vld [vmem:[#allocation8 + $0xf60] ss:$16 sps:$4 sm:$0xff]  }
 0x257   :  { %3950 = vmatpush1.bf16.msra.mxu0 %v5980_v48  ;;  %4278 = vmatpush1.bf16.msra.mxu1 %v5983_v49  ;;  %v6031_v48 = vld [vmem:[#allocation8 + $0xe08] ss:$16 sps:$4 sm:$0xff]   ;;  %v6036_v49 = vld [vmem:[#allocation8 + $0xe24] ss:$16 sps:$4 sm:$0xff]  }
 0x258   :  { %3951 = vmatprep.subr.bf16.mxu0 %v5988_v52  ;;  %4279 = vmatprep.subr.bf16.mxu1 %v5991_v53  ;;  %v6034_v52 = vld [vmem:[#allocation8 + $0xe20] ss:$16 sps:$4 sm:$0xff]   ;;  %v6037_v53 = vld [vmem:[#allocation8 + $0xe28] ss:$16 sps:$4 sm:$0xff]  }
 0x25b   :  { %3952 = vmatpush1.bf16.msra.mxu0 %v5986_v56  ;;  %4280 = vmatpush1.bf16.msra.mxu1 %v5989_v57  ;;  %v6040_v56 = vld [vmem:[#allocation8 + $0xe40] ss:$16 sps:$4 sm:$0xff]   ;;  %v6043_v57 = vld [vmem:[#allocation8 + $0xe48] ss:$16 sps:$4 sm:$0xff]  }
 0x25c   :  { %3953 = vmatprep.subr.bf16.mxu0 %v5994_v60  ;;  %4281 = vmatprep.subr.bf16.mxu1 %v5997_v61  ;;  %v6046_v60 = vld [vmem:[#allocation8 + $0xe60] ss:$16 sps:$4 sm:$0xff]   ;;  %v6049_v61 = vld [vmem:[#allocation8 + $0xe68] ss:$16 sps:$4 sm:$0xff]  }
 0x25f   :  { %3954 = vmatpush1.bf16.msra.mxu0 %v5992_v0  ;;  %4282 = vmatpush1.bf16.msra.mxu1 %v5995_v1  ;;  %v6052_v0 = vld [vmem:[#allocation8 + $0xe80] ss:$16 sps:$4 sm:$0xff]   ;;  %v6055_v1 = vld [vmem:[#allocation8 + $0xe88] ss:$16 sps:$4 sm:$0xff]  }
 0x260   :  { %3955 = vmatprep.subr.bf16.mxu0 %v6000_v4  ;;  %4283 = vmatprep.subr.bf16.mxu1 %v6003_v5  ;;  %v6058_v4 = vld [vmem:[#allocation8 + $0xea0] ss:$16 sps:$4 sm:$0xff]   ;;  %v6061_v5 = vld [vmem:[#allocation8 + $0xea8] ss:$16 sps:$4 sm:$0xff]  }
 0x263   :  { %3956 = vmatpush1.bf16.msra.mxu0 %v5998_v8  ;;  %4284 = vmatpush1.bf16.msra.mxu1 %v6001_v9  ;;  %v174_v8 = vld [vmem:[#allocation3 + $0x70] sm:$0xff] }
 0x264   :  { %3957 = vmatprep.subr.bf16.mxu0 %v6006_v12  ;;  %4285 = vmatprep.subr.bf16.mxu1 %v6009_v13  ;;  %v190_v9 = vld [vmem:[#allocation3 + $0xf0] sm:$0xff] }
 0x265   :  { %v6064_v12 = vld [vmem:[#allocation8 + $0xec0] ss:$16 sps:$4 sm:$0xff]   ;;  %v6067_v13 = vld [vmem:[#allocation8 + $0xec8] ss:$16 sps:$4 sm:$0xff]   ;;  %v322_v14 = vadd.f32 %v190_v9, %v174_v8 }
 0x266   :  { %v4344_v8 = vld [vmem:[#allocation11] sm:$0xff] }
 0x267   :  { %3958 = vmatpush1.bf16.msra.mxu0 %v6004_v16  ;;  %4286 = vmatpush1.bf16.msra.mxu1 %v6007_v17  ;;  %v6072_v16 = vld [vmem:[#allocation8 + $0xee4] ss:$16 sps:$4 sm:$0xff]   ;;  %v6075_v17 = vld [vmem:[#allocation8 + $0xeec] ss:$16 sps:$4 sm:$0xff]  }
 0x268   :  { %3959 = vmatprep.subr.bf16.mxu0 %v6012_v20  ;;  %4287 = vmatprep.subr.bf16.mxu1 %v6015_v21  ;;  %v323_v20 = vrot.slane %v322_v14, 4  ;;  %v435_v21 = vrot.slane %v434_v15, 4 }
 0x26a   :  { %v324_v26 = vadd.f32 %v323_v20, %v322_v14  ;;  %v436_v27 = vadd.f32 %v435_v21, %v434_v15 }
 0x26b   :  { %3960 = vmatpush1.bf16.msra.mxu0 %v6010_v24  ;;  %4288 = vmatpush1.bf16.msra.mxu1 %v6013_v25  ;;  %v6076_v24 = vld [vmem:[#allocation8 + $0xf00] ss:$16 sps:$4 sm:$0xff]   ;;  %v6079_v25 = vld [vmem:[#allocation8 + $0xf08] ss:$16 sps:$4 sm:$0xff]  }
 0x26c   :  { %3961 = vmatprep.subr.bf16.mxu0 %v6018_v28  ;;  %4289 = vmatprep.subr.bf16.mxu1 %v6021_v29  ;;  %v6084_v28 = vld [vmem:[#allocation8 + $0xf24] ss:$16 sps:$4 sm:$0xff]   ;;  %v6087_v29 = vld [vmem:[#allocation8 + $0xf2c] ss:$16 sps:$4 sm:$0xff]  }
 0x26f   :  { %3962 = vmatpush1.bf16.msra.mxu0 %v6016_v32  ;;  %4290 = vmatpush1.bf16.msra.mxu1 %v6019_v33  ;;  %v325_v32 = vrot.slane %v324_v26, 2  ;;  %v437_v33 = vrot.slane %v436_v27, 2 }
 0x270   :  { %3963 = vmatprep.subr.bf16.mxu0 %v6024_v36  ;;  %4291 = vmatprep.subr.bf16.mxu1 %v6027_v37  ;;  %v6088_v36 = vld [vmem:[#allocation8 + $0xf40] ss:$16 sps:$4 sm:$0xff]   ;;  %v6091_v37 = vld [vmem:[#allocation8 + $0xf48] ss:$16 sps:$4 sm:$0xff]  }
 0x271   :  { %v326_v38 = vadd.f32 %v325_v32, %v324_v26  ;;  %v438_v39 = vadd.f32 %v437_v33, %v436_v27 }
 0x273   :  { %3964 = vmatpush1.bf16.msra.mxu0 %v6022_v40  ;;  %4292 = vmatpush1.bf16.msra.mxu1 %v6025_v41  ;;  %v6096_v40 = vld [vmem:[#allocation8 + $0xf64] ss:$16 sps:$4 sm:$0xff]   ;;  %v6099_v41 = vld [vmem:[#allocation8 + $0xf6c] ss:$16 sps:$4 sm:$0xff]  }
 0x274   :  { %3974 = vmatprep.subr.bf16.mxu0 %v6030_v43  ;;  %4302 = vmatprep.subr.bf16.mxu1 %v6033_v44  ;;  %v6097_v43 = vld [vmem:[#allocation8 + $0xf68] ss:$16 sps:$4 sm:$0xff]   ;;  %v327_v44 = vrot.slane %v326_v38, 1 }
 0x276   :  { %3966 = vmatmul.mubr.bf16.vlgmr.msra.gmra.mrb[0].mxu0 %v1107_v45  ;;  %4294 = vmatmul.mubr.bf16.vlgmr.msra.gmra.mrb[0].mxu1 %v1107_v45  ;;  %v439_v45 = vrot.slane %v438_v39, 1 }
 0x277   :  { %3975 = vmatpush1.bf16.msra.mxu0 %v6028_v47  ;;  %4303 = vmatpush1.bf16.msra.mxu1 %v6031_v48  ;;  %v6105_v47 = vld [vmem:[#allocation8 + $0xf8c] ss:$16 sps:$4 sm:$0xff]   ;;  %v6100_v48 = vld [vmem:[#allocation8 + $0xf80] ss:$16 sps:$4 sm:$0xff]  }
 0x278   :  { %3976 = vmatprep.subr.bf16.mxu0 %v6036_v49  ;;  %4304 = vmatprep.subr.bf16.mxu1 %v6039_v50  ;;  %v6103_v49 = vld [vmem:[#allocation8 + $0xf88] ss:$16 sps:$4 sm:$0xff]   ;;  %v328_v50 = vadd.f32 %v327_v44, %v326_v38  ;;  %v6374_v44 = vmov 1983009808  }
 0x279   :  { %4006 = vmatprep.mubr.bf16.mxu0 %v1110_v51  ;;  %4334 = vmatprep.mubr.bf16.mxu1 %v1110_v51  ;;  %v440_v51 = vadd.f32 %v439_v45, %v438_v39  ;;  %v4630_v45 = vunpack.c.l.s4 %v6374_v44 }
 0x27b   :  { %3977 = vmatpush1.bf16.msra.mxu0 %v6034_v52  ;;  %4305 = vmatpush1.bf16.msra.mxu1 %v6037_v53  ;;  %v6108_v52 = vld [vmem:[#allocation8 + $0xfa4] ss:$16 sps:$4 sm:$0xff]   ;;  %v6111_v53 = vld [vmem:[#allocation8 + $0xfac] ss:$16 sps:$4 sm:$0xff]  }
 0x27c   :  { %3978 = vmatprep.subr.bf16.mxu0 %v6042_v54  ;;  %4306 = vmatprep.subr.bf16.mxu1 %v6045_v55  ;;  %v6106_v54 = vld [vmem:[#allocation8 + $0xfa0] ss:$16 sps:$4 sm:$0xff]   ;;  %v6109_v55 = vld [vmem:[#allocation8 + $0xfa8] ss:$16 sps:$4 sm:$0xff]  }
 0x27f   :  { %3979 = vmatpush1.bf16.msra.mxu0 %v6040_v56  ;;  %4307 = vmatpush1.bf16.msra.mxu1 %v6043_v57  ;;  %v462_v56 = vpack.c.bf16 %v328_v50, %v328_v50  ;;  %v478_v57 = vpack.c.bf16 %v440_v51, %v440_v51  ;;  %v4601_v51 = vld [vmem:[#allocation16] sm:$0x3f] }
 0x280   :  { %3980 = vmatprep.subr.bf16.mxu0 %v6048_v58  ;;  %4308 = vmatprep.subr.bf16.mxu1 %v6051_v59  ;;  %v6114_v58 = vld [vmem:[#allocation8 + $0xfc4] ss:$16 sps:$4 sm:$0xff]   ;;  %v6117_v59 = vld [vmem:[#allocation8 + $0xfcc] ss:$16 sps:$4 sm:$0xff]  }
 0x283   :  { %3981 = vmatpush1.bf16.msra.mxu0 %v6046_v60  ;;  %4309 = vmatpush1.bf16.msra.mxu1 %v6049_v61  ;;  %v6112_v60 = vld [vmem:[#allocation8 + $0xfc0] ss:$16 sps:$4 sm:$0xff]   ;;  %v6115_v61 = vld [vmem:[#allocation8 + $0xfc8] ss:$16 sps:$4 sm:$0xff]  }
 0x284   :  { %3982 = vmatprep.subr.bf16.mxu0 %v6054_v62  ;;  %4310 = vmatprep.subr.bf16.mxu1 %v6057_v63  ;;  %v1060_v62 = vunpack.c.l.b16 %v462_v56  ;;  %v1076_v63 = vunpack.c.l.b16 %v478_v57 }
 0x287   :  { %3983 = vmatpush1.bf16.msra.mxu0 %v6052_v0  ;;  %4311 = vmatpush1.bf16.msra.mxu1 %v6055_v1  ;;  %v6120_v0 = vld [vmem:[#allocation8 + $0xfe4] ss:$16 sps:$4 sm:$0xff]   ;;  %v6123_v1 = vld [vmem:[#allocation8 + $0xfec] ss:$16 sps:$4 sm:$0xff]  }
 0x288   :  { %3984 = vmatprep.subr.bf16.mxu0 %v6060_v2  ;;  %4312 = vmatprep.subr.bf16.mxu1 %v6063_v3  ;;  %v6118_v2 = vld [vmem:[#allocation8 + $0xfe0] ss:$16 sps:$4 sm:$0xff]   ;;  %v6121_v3 = vld [vmem:[#allocation8 + $0xfe8] ss:$16 sps:$4 sm:$0xff]  }
 0x28b   :  { %3985 = vmatpush1.bf16.msra.mxu0 %v6058_v4  ;;  %4313 = vmatpush1.bf16.msra.mxu1 %v6061_v5  ;;  %v1093_v4 = vsel %vm1078_vm0, %v1076_v63, %v1060_v62 }
 0x28c   :  { %3986 = vmatprep.subr.bf16.mxu0 %v6066_v6  ;;  %4314 = vmatprep.subr.bf16.mxu1 %v6069_v7  ;;  %v1109_v5 = vpack.c.b16 %v1093_v4, %v1093_v4  ;;  %v994_v6 = vlaneseq }
 0x28e   :  { %v995_v7 = vshrl.u32 %v994_v6, 7 }
 0x28f   :  { %3987 = vmatpush1.bf16.msra.mxu0 %v6064_v12  ;;  %4315 = vmatpush1.bf16.msra.mxu1 %v6067_v13 }
 0x290   :  { %3988 = vmatprep.subr.bf16.mxu0 %v6072_v16  ;;  %4316 = vmatprep.subr.bf16.mxu1 %v6075_v17  ;;  %v6581_v9 = vsub.s32 4, %v995_v7  ;;  %v6583_v10 = vsub.s32 0, %v995_v7  ;;  %v4451_v12 = vsub.s32 6, %v995_v7  ;;  %v6587_v13 = vsub.s32 5, %v995_v7 }
 0x291   :  { %v6590_v15 = vsub.s32 2, %v995_v7  ;;  %v4499_v32 = vsub.s32 7, %v995_v7 }
 0x292   :  { %v4356_v14 = vrot.slane %v4344_v8, %v6583_v10  ;;  %v4360_v16 = vrot.slane %v4344_v8, %v6581_v9  ;;  %v4364_v17 = vrot.slane %v6585_v11, %v6583_v10  ;;  %v4460_v27 = vrot.slane %v6585_v11, %v4451_v12 }
 0x293   :  { %3989 = vmatpush1.bf16.msra.mxu0 %v6070_v18  ;;  %4317 = vmatpush1.bf16.msra.mxu1 %v6073_v19  ;;  %v6595_v18 = vsub.s32 1, %v995_v7  ;;  %v4368_v19 = vrot.slane %v6585_v11, %v6581_v9  ;;  %v4448_v21 = vrot.slane %v4344_v8, %v6590_v15 }
 0x294   :  { %3990 = vmatprep.subr.bf16.mxu0 %v6078_v22  ;;  %4318 = vmatprep.subr.bf16.mxu1 %v6081_v23  ;;  %v4452_v22 = vrot.slane %v4344_v8, %v4451_v12  ;;  %v4456_v23 = vrot.slane %v6585_v11, %v6590_v15  ;;  %v4376_v26 = vrot.slane %v4356_v14, %v6583_v10 }
 0x295   :  { %v4388_v33 = vrot.slane %v4368_v19, %v6583_v10 }
 0x297   :  { %3991 = vmatpush1.bf16.msra.mxu0 %v6076_v24  ;;  %4319 = vmatpush1.bf16.msra.mxu1 %v6079_v25  ;;  %v4400_v24 = vrot.slane %v4344_v8, %v6595_v18  ;;  %v4404_v25 = vrot.slane %v4344_v8, %v6587_v13 }
 0x298   :  { %3992 = vmatprep.subr.bf16.mxu0 %v6084_v28  ;;  %4320 = vmatprep.subr.bf16.mxu1 %v6087_v29  ;;  %v4408_v28 = vrot.slane %v6585_v11, %v6595_v18  ;;  %v4380_v29 = vrot.slane %v4360_v16, %v6583_v10 }
 0x299   :  { %v4420_v38 = vrot.slane %v4400_v24, %v6595_v18  ;;  %v4424_v39 = vrot.slane %v4404_v25, %v6595_v18  ;;  %v4563_v24 = vld [vmem:[#allocation5] sm:$0xff] }
 0x29b   :  { %3993 = vmatpush1.bf16.msra.mxu0 %v6082_v30  ;;  %4321 = vmatpush1.bf16.msra.mxu1 %v6085_v31  ;;  %v4384_v30 = vrot.slane %v4364_v17, %v6583_v10  ;;  %v4412_v31 = vrot.slane %v6585_v11, %v6587_v13 }
 0x29c   :  { %3994 = vmatprep.subr.bf16.mxu0 %v6090_v34  ;;  %4322 = vmatprep.subr.bf16.mxu1 %v6093_v35  ;;  %v4468_v34 = vrot.slane %v4448_v21, %v6590_v15  ;;  %v4472_v35 = vrot.slane %v4452_v22, %v6590_v15 }
 0x29d   :  { %v4349_v20 = vpop.permute.xlu0 %4348 }
 0x29e   :  { %v4390_v56 = vmul.f32 %v4380_v29, %v4349_v20 }
 0x29f   :  { %3995 = vmatpush1.bf16.msra.mxu0 %v6088_v36  ;;  %4323 = vmatpush1.bf16.msra.mxu1 %v6091_v37  ;;  %v6615_v36 = vsub.s32 3, %v995_v7  ;;  %v4476_v37 = vrot.slane %v4456_v23, %v6590_v15  ;;  %v4537_v23 = vld [vmem:[#allocation13] sm:$0xf] }
 0x2a0   :  { %3996 = vmatprep.subr.bf16.mxu0 %v6096_v40  ;;  %4324 = vmatprep.subr.bf16.mxu1 %v6099_v41  ;;  %v4480_v40 = vrot.slane %v4460_v27, %v6590_v15  ;;  %v4428_v41 = vrot.slane %v4408_v28, %v6595_v18 }
 0x2a1   :  { %v4504_v50 = vrot.slane %v6585_v11, %v6615_v36 }
 0x2a3   :  { %3997 = vmatpush1.bf16.msra.mxu0 %v6094_v42  ;;  %4325 = vmatpush1.bf16.msra.mxu1 %v6097_v43  ;;  %v4496_v43 = vrot.slane %v4344_v8, %v6615_v36 }
 0x2a4   :  { %3998 = vmatprep.subr.bf16.mxu0 %v6102_v46  ;;  %4326 = vmatprep.subr.bf16.mxu1 %v6105_v47  ;;  %v4395_v42 = vpop.permute.xlu0 %4394  ;;  %v4389_v46 = vmul.f32 %v4376_v26, %v4349_v20  ;;  %v4443_v47 = vpop.permute.xlu1 %4442 }
 0x2a5   :  { %v4433_v57 = vmul.f32 %v4420_v38, %v4395_v42  ;;  %v4481_v4 = vmul.f32 %v4468_v34, %v4443_v47  ;;  %v4435_v6 = vmul.f32 %v4428_v41, %v4395_v42  ;;  %v4483_v21 = vmul.f32 %v4476_v37, %v4443_v47 }
 0x2a6   :  { %v4484_v25 = vmul.f32 %v4480_v40, %v4443_v47  ;;  %v4626_v34 = vrot.slane %v4601_v51, %v6587_v13 }
 0x2a7   :  { %3999 = vmatpush1.bf16.msra.mxu0 %v6100_v48  ;;  %4327 = vmatpush1.bf16.msra.mxu1 %v6103_v49  ;;  %v4432_v48 = vrot.slane %v4412_v31, %v6595_v18  ;;  %v4500_v49 = vrot.slane %v4344_v8, %v4499_v32  ;;  %v4437_v12 = vadd.f32 %v4433_v57, %v4389_v46 }
 0x2a8   :  { %4000 = vmatprep.subr.bf16.mxu0 %v6108_v52  ;;  %4328 = vmatprep.subr.bf16.mxu1 %v6111_v53  ;;  %v4606_v52 = vrot.slane %v4601_v51, %v6583_v10  ;;  %v4610_v53 = vrot.slane %v4601_v51, %v6595_v18  ;;  %v4491_v16 = vpop.permute.xlu1 %4490 }
 0x2a9   :  { %v4436_v8 = vmul.f32 %v4432_v48, %v4395_v42  ;;  %v4485_v28 = vadd.f32 %v4481_v4, %v4437_v12 }
 0x2aa   :  { %v4627_v62 = vcombine.low %v4606_v52, %v4610_v53 }
 0x2ab   :  { %4001 = vmatpush1.bf16.msra.mxu0 %v6106_v54  ;;  %4329 = vmatpush1.bf16.msra.mxu1 %v6109_v55  ;;  %v4614_v54 = vrot.slane %v4601_v51, %v6590_v15  ;;  %v4618_v55 = vrot.slane %v4601_v51, %v6615_v36 }
 0x2ac   :  { %4002 = vmatprep.subr.bf16.mxu0 %v6114_v58  ;;  %4330 = vmatprep.subr.bf16.mxu1 %v6117_v59  ;;  %v4434_v58 = vmul.f32 %v4424_v39, %v4395_v42  ;;  %v4631_v59 = vunpack.c.0.s8 %v4630_v45 }
 0x2ad   :  { %v4628_v63 = vcombine.low %v4614_v54, %v4618_v55 }
 0x2ae   :  { %v4438_v14 = vadd.f32 %v4434_v58, %v4390_v56  ;;  %v4703_v58 = vld [vmem:[#allocation17] sm:$0xf] }
 0x2af   :  { %4003 = vmatpush1.bf16.msra.mxu0 %v6112_v60  ;;  %4331 = vmatpush1.bf16.msra.mxu1 %v6115_v61  ;;  %v4508_v60 = vrot.slane %v6585_v11, %v4499_v32  ;;  %v4516_v61 = vrot.slane %v4496_v43, %v6615_v36  ;;  %v4524_v11 = vrot.slane %v4504_v50, %v6615_v36 }
 0x2b0   :  { %4004 = vmatprep.subr.bf16.mxu0 %v6120_v0  ;;  %4332 = vmatprep.subr.bf16.mxu1 %v6123_v1  ;;  %v4391_v0 = vmul.f32 %v4384_v30, %v4349_v20  ;;  %v4392_v1 = vmul.f32 %v4388_v33, %v4349_v20  ;;  %v4542_v32 = vrot.slane %v4537_v23, %v6583_v10 }
 0x2b1   :  { %v4528_v22 = vrot.slane %v4508_v60, %v6615_v36  ;;  %v4529_v27 = vmul.f32 %v4516_v61, %v4491_v16  ;;  %v4622_v33 = vrot.slane %v4601_v51, %v6581_v9  ;;  %v4531_v37 = vmul.f32 %v4524_v11, %v4491_v16  ;;  %v4564_v9 = vld [vmem:[#allocation5 + $0x8] sm:$0xf] }
 0x2b2   :  { %v4439_v26 = vadd.f32 %v4435_v6, %v4391_v0  ;;  %v4712_v0 = vrot.slane %v4703_v58, %v6595_v18 }
 0x2b3   :  { %4005 = vmatpush1.bf16.msra.mxu0 %v6118_v2  ;;  %4333 = vmatpush1.bf16.msra.mxu1 %v6121_v3  ;;  %v4520_v2 = vrot.slane %v4500_v49, %v6615_v36  ;;  %v4634_v3 = vsub.s32 %v4631_v59, %v995_v7  ;;  %v4440_v7 = vadd.f32 %v4436_v8, %v4392_v1 }
 0x2b4   :  { %v4532_v38 = vmul.f32 %v4528_v22, %v4491_v16  ;;  %v4487_v41 = vadd.f32 %v4483_v21, %v4439_v26  ;;  %v4644_v42 = vcombine.low %v4622_v33, %v4626_v34  ;;  %v4533_v44 = vadd.f32 %v4529_v27, %v4485_v28  ;;  %v992_v28 = vld [vmem:[#allocation10] sm:$0xf] }
 0x2b5   :  { %v4635_v17 = vrot.slane %v4627_v62, %v4634_v3  ;;  %v4642_v19 = vrot.slane %v4628_v63, %v4634_v3  ;;  %v4530_v30 = vmul.f32 %v4520_v2, %v4491_v16  ;;  %v4488_v40 = vadd.f32 %v4484_v25, %v4440_v7 }
 0x2b6   :  { %4007 = vmatmul.mubr.bf16.vlgmr.msra.gmra.mrb[0].mxu0 %v1109_v5  ;;  %4335 = vmatmul.mubr.bf16.vlgmr.msra.gmra.mrb[0].mxu1 %v1109_v5  ;;  %v4482_v5 = vmul.f32 %v4472_v35, %v4443_v47  ;;  %v4546_v35 = vrot.slane %v4537_v23, %v6595_v18  ;;  %v4651_v47 = vrot.slane %v4644_v42, %v4634_v3 }
 0x2b7   :  { %v4643_v20 = vcombine.low %v4635_v17, %v4642_v19  ;;  %v4535_v54 = vadd.f32 %v4531_v37, %v4487_v41  ;;  %v4536_v55 = vadd.f32 %v4532_v38, %v4488_v40  ;;  %v4559_v56 = vadd.f32 %v4542_v32, %v4533_v44 }
 0x2b8   :  { %v4486_v29 = vadd.f32 %v4482_v5, %v4438_v14  ;;  %v4655_v50 = vmul.f32 %v4651_v47, %v4564_v9  ;;  %v4550_v62 = vrot.slane %v4537_v23, %v6590_v15  ;;  %v4708_v63 = vrot.slane %v4703_v58, %v6583_v10 }
 0x2b9   :  { %v4654_v31 = vmul.f32 %v4643_v20, %v4563_v24  ;;  %v4554_v5 = vrot.slane %v4537_v23, %v6615_v36  ;;  %v4716_v8 = vrot.slane %v4703_v58, %v6590_v15  ;;  %v4720_v19 = vrot.slane %v4703_v58, %v6615_v36 }
 0x2ba   :  { %v4534_v45 = vadd.f32 %v4530_v30, %v4486_v29  ;;  %v4681_v59 = vrot.slane %v4655_v50, %v4634_v3  ;;  %v4561_v6 = vadd.f32 %v4550_v62, %v4535_v54  ;;  %v4725_v12 = vmul.f32 %v4708_v63, %v4559_v56  ;;  %v4565_v29 = vld [vmem:[#allocation14] sm:$0xf] }
 0x2bb   :  { %v4665_v39 = vrot.slane %v4654_v31, %v4634_v3  ;;  %v4658_v43 = vcombine.high %v4654_v31, %v4654_v31  ;;  %v4562_v17 = vadd.f32 %v4554_v5, %v4536_v55  ;;  %v997_v30 = vrot.slane %v992_v28, %v6583_v10 }
 0x2bc   :  { %v4560_v57 = vadd.f32 %v4546_v35, %v4534_v45  ;;  %v4682_v1 = vcombine.high %v4681_v59, %v4681_v59  ;;  %v4696_v4 = vsel %vm4591_vm1, %v4681_v59, 0.0  ;;  %v4727_v21 = vmul.f32 %v4716_v8, %v4561_v6 }
 0x2bd   :  { %v4673_v46 = vcombine.high %v4665_v39, %v4665_v39  ;;  %v4672_v48 = vrot.slane %v4658_v43, %v4634_v3  ;;  %v4689_v49 = vsel %vm4591_vm1, %v4665_v39, 0.0  ;;  %v4729_v22 = vsel %vm4591_vm1, %v4725_v12, 0.0 }
 0x2be   :  { %v4726_v3 = vmul.f32 %v4712_v0, %v4560_v57  ;;  %v4698_v16 = vsel %vm4591_vm1, %v4682_v1, 0.0  ;;  %v4728_v24 = vmul.f32 %v4720_v19, %v4562_v17  ;;  %v4732_v25 = vsel %vm4591_vm1, %v4727_v21, 0.0 }
 0x2bf   :  { %v4690_v13 = vsel %vm4591_vm1, %v4673_v46, 0.0  ;;  %v4674_v51 = vcombine.high %v4672_v48, %v4672_v48  ;;  %v4692_v53 = vsel %vm4591_vm1, %v4672_v48, 0.0  ;;  %v1005_v31 = vrot.slane %v992_v28, %v6590_v15 }
 0x2c0   :  { %v4691_v52 = vadd.f32 %v4690_v13, %v4689_v49  ;;  %v4730_v20 = vsel %vm4591_vm1, %v4726_v3, 0.0  ;;  %v4734_v26 = vsel %vm4591_vm1, %v4728_v24, 0.0  ;;  %v1001_v32 = vrot.slane %v992_v28, %v6595_v18 }
 0x2c1   :  { %v4694_v61 = vsel %vm4591_vm1, %v4674_v51, 0.0  ;;  %v4731_v23 = vadd.f32 %v4730_v20, %v4729_v22  ;;  %v1009_v33 = vrot.slane %v992_v28, %v6615_v36  ;;  %v4570_v34 = vrot.slane %v4565_v29, %v6583_v10 }
 0x2c2   :  { %v4693_v60 = vadd.f32 %v4692_v53, %v4691_v52  ;;  %v4578_v38 = vrot.slane %v4565_v29, %v6590_v15  ;;  %v4574_v39 = vrot.slane %v4565_v29, %v6595_v18  ;;  %v4582_v46 = vrot.slane %v4565_v29, %v6615_v36 }
 0x2c3   :  { %v4733_v7 = vadd.f32 %v4732_v25, %v4731_v23 }
 0x2c4   :  { %v4695_v2 = vadd.f32 %v4694_v61, %v4693_v60  ;;  %v5271_v60 = vld [vmem:[#allocation2] ss:$0 sm:$0xff] }
 0x2c5   :  { %v4735_v27 = vadd.f32 %v4734_v26, %v4733_v7 }
 0x2c6   :  { %v4697_v14 = vadd.f32 %v4696_v4, %v4695_v2 }
 0x2c8   :  { %v4699_v11 = vadd.f32 %v4698_v16, %v4697_v14 }
 0x2ca   :  { %4700 = vadd.xlane.f32.xlu0 %v4699_v11 }
 0x2ce   :  { %4736 = vadd.xlane.f32.xlu0 %v4735_v27 }
 0x357   :  { %v4701_v36 = vpop.xlane.xlu0 %4700 }
 0x35b   :  { %v4737_v59 = vpop.xlane.xlu0 %4736 }
 0x389   :  { %v4008_v35 = vpop.f32.mrb[0].mxu0  ;;  %v4336_v37 = vpop.f32.mrb[0].mxu1 }
 0x38a   :  { %v5272_v41 = vadd.f32 %v4008_v35, %v997_v30  ;;  %v5274_v40 = vadd.f32 %v4336_v37, %v1005_v31  ;;  %v4010_v42 = vpop.f32.mrb[1].mxu0  ;;  %v4338_v43 = vpop.f32.mrb[1].mxu1 }
 0x38b   :  { %v5273_v44 = vadd.f32 %v4010_v42, %v1001_v32  ;;  %v5275_v45 = vadd.f32 %v4338_v43, %v1009_v33  ;;  %v4012_v47 = vpop.f32.mrb[2].mxu0  ;;  %v4340_v48 = vpop.f32.mrb[2].mxu1 }
 0x38c   :  { %v4587_v49 = vmul.f32 %v5272_v41, %v4570_v34  ;;  %v4013_v9 = vpop.f32.mrb[3].mxu0  ;;  %v4341_v13 = vpop.f32.mrb[3].mxu1  ;;  %v4589_v10 = vmul.f32 %v5274_v40, %v4578_v38 }
 0x38d   :  { %v4588_v50 = vmul.f32 %v5273_v44, %v4574_v39  ;;  %v4590_v18 = vmul.f32 %v5275_v45, %v4582_v46 }
 0x38e   :  { %v4592_v51 = vsel %vm4591_vm1, %v4587_v49, 0.0  ;;  %v4595_v53 = vsel %vm4591_vm1, %v4589_v10, 0.0 }
 0x38f   :  { %v4593_v15 = vsel %vm4591_vm1, %v4588_v50, 0.0  ;;  %v4597_v55 = vsel %vm4591_vm1, %v4590_v18, 0.0 }
 0x390   :  { %v4594_v52 = vadd.f32 %v4593_v15, %v4592_v51 }
 0x392   :  { %v4596_v54 = vadd.f32 %v4595_v53, %v4594_v52 }
 0x394   :  { %v4598_v56 = vadd.f32 %v4597_v55, %v4596_v54 }
 0x396   :  { %4599 = vadd.xlane.f32.xlu1 %v4598_v56 }
 0x423   :  { %v4600_v57 = vpop.xlane.xlu1 %4599 }
 0x424   :  { %v4702_v58 = vadd.f32 %v4701_v36, %v4600_v57 }
 0x426   :  { %v4738_v61 = vadd.f32 %v4737_v59, %v4702_v58 }
 0x428   :  { %v4746_v62 = vadd.f32 %v5271_v60, %v4738_v61 }
 0x42a   :  { %4748 = vst.msk [vmem:[%s6681_s11] sm:$0x3] %vm4747_vm2, %v4746_v62 }
 0x42b   :  { %4753 = vsyncpa [#allocation4], 1 }
 0x42c   :  { %4754 = vsyncpa [#allocation6], 1 }
 0x42d   :  { %4755 = vsyncpa [#allocation9], 1 }
 0x42e   :  { %4756 = vsyncpa [#allocation12], 1 }
 0x42f   :  { %4757 = vsyncpa [#allocation15], 1 }
 0x430   :  { %4758 = vsyncpa [#allocation18], 1 }

</bundles_post_ra>
